<compile_context>
chip_gen: v7x
topology: tpu7x:2x2x1
jax: 0.10.0
libtpu: 0.0.40
codegen_flags: <defaults>
</compile_context>

<pallas_src>
import math

import jax
import jax.numpy as jnp
from jax.experimental import pallas as pl
from jax.experimental.pallas import tpu as pltpu


# --------------------------------------------------------------------------- #
# In-kernel helpers
# --------------------------------------------------------------------------- #
def _zero_pad_borders(pr):
    """Zero the only pad cells a 3x3 / stride-2 / pad-1 depthwise conv reads.

    pr holds zero_pad(y, 1) in phase-split form:
        pr[r, s, u, v, :] == pad(y)[2u + r, 2v + s, :].
    Padded row 0 lives at (r=0, u=0) and padded col 0 at (s=0, v=0); the
    bottom / right pad rows are never read for even input sizes, so 4 thin
    stores per stage replace the old full-buffer memset.
    """
    Hp, Wp, C = pr.shape[2], pr.shape[3], pr.shape[4]
    zrow = jnp.zeros((1, Wp, C), jnp.float32)
    zcol = jnp.zeros((Hp, 1, C), jnp.float32)
    pr[0, 0, 0:1, :, :] = zrow          # top pad row, even-col phase
    pr[0, 1, 0:1, :, :] = zrow          # top pad row, odd-col phase
    pr[0, 0, :, 0:1, :] = zcol          # left pad col, even-row phase
    pr[1, 0, :, 0:1, :] = zcol          # left pad col, odd-row phase


def _scatter_padded_phases(y, pr):
    """Store y (H, W, C) into pr (2, 2, H//2+1, W//2+1, C) so that
       pr[r, s, u, v, :] == zero_pad(y, 1)[2u + r, 2v + s, :].

    One parity reshape of y plus exactly 4 contiguous (H/2, W/2, C) slab
    stores (the interior); the pad border is handled by _zero_pad_borders.
    """
    H, W, C = y.shape
    Hh, Wh = H // 2, W // 2
    yp = y.reshape(Hh, 2, Wh, 2, C)                        # row/col parity split
    # even rows -> padded rows 1,3,.. (r=1);  even cols -> padded cols 1,3,.. (s=1)
    pr[1, 1, 0:Hh, 0:Wh, :] = yp[:, 0, :, 0, :]
    # even rows / odd cols -> padded cols 2,4,.. (s=0, v>=1)
    pr[1, 0, 0:Hh, 1:Wh + 1, :] = yp[:, 0, :, 1, :]
    # odd rows -> padded rows 2,4,.. (r=0, u>=1) / even cols
    pr[0, 1, 1:Hh + 1, 0:Wh, :] = yp[:, 1, :, 0, :]
    # odd rows / odd cols
    pr[0, 0, 1:Hh + 1, 1:Wh + 1, :] = yp[:, 1, :, 1, :]


def _depthwise_relu6(pr, wdw_ref):
    """3x3 / stride-2 / pad-1 depthwise conv (BN scale folded into weights)
    + ReLU6, reading the phase-split padded input with contiguous slices."""
    Ho = pr.shape[2] - 1
    Wo = pr.shape[3] - 1
    C = pr.shape[4]
    wdw = wdw_ref[...]                                     # (9, C), loaded once
    acc = jnp.zeros((Ho, Wo, C), jnp.float32)
    # TODO(synk): on v6e/v7x this 9-tap accumulate could run in bf16 (2x packed
    # VALU rate); kept in f32 so the same kernel stays optimal on v5e.
    for kh in range(3):
        for kw in range(3):
            patch = pr[kh % 2, kw % 2,
                       kh // 2:kh // 2 + Ho,
                       kw // 2:kw // 2 + Wo, :]
            acc = acc + patch * wdw[kh * 3 + kw:kh * 3 + kw + 1, :]
    # TODO(synk): a nonzero folded-BN bias would be fused here (acc + bias)
    # before the clip; with the synthetic BN stats it is exactly zero.
    return jnp.clip(acc, 0.0, 6.0)


def _lane_dense(y2):
    """Repack (M, C) with C < 128 into (M*C//128, 128) -- row-major identical
    data -- so every HBM output row is a full, unmasked 128-lane store.
    Uses only a sublane-splitting reshape + lane concatenation."""
    M, C = y2.shape
    if C >= 128:
        return y2                                          # already lane-dense
    g = 128 // C
    yg = y2.reshape(M // g, g, C)
    return jnp.concatenate([yg[:, i, :] for i in range(g)], axis=-1)


# --------------------------------------------------------------------------- #
# Fused 4-stage kernel (one image per grid step)
# --------------------------------------------------------------------------- #
def _backbone_kernel(x_ref,
                     wdw1, wpw1, wdw2, wpw2, wdw3, wpw3, wdw4, wpw4,
                     o1, o2, o3, o4,
                     pr1, pr2, pr3, pr4):
    # Per-step pad-border zeroing (only the cells the depthwise reads).
    for pr in (pr1, pr2, pr3, pr4):
        _zero_pad_borders(pr)

    # ------------------------- stage 1 (Cin = 3) -------------------------- #
    _scatter_padded_phases(x_ref[0], pr1)                  # (H, W, 3) -> phases
    h = _depthwise_relu6(pr1, wdw1)                        # (H/2, W/2, 3) f32
    w1 = wpw1[...]                                         # (3, C1) f32, BN folded
    # K=3 pointwise as three VPU scaled-adds (avoids a degenerate K=3 MXU op).
    y = (h[:, :, 0:1] * w1[0:1, :]
         + h[:, :, 1:2] * w1[1:2, :]
         + h[:, :, 2:3] * w1[2:3, :])
    y = jnp.clip(y, 0.0, 6.0)                              # (Ho, Wo, C1) f32
    Ho, Wo, C1 = y.shape
    o1[0] = _lane_dense(y.reshape(Ho * Wo, C1))            # lane-dense store
    _scatter_padded_phases(y, pr2)

    # ------------------------- stages 2 .. 4 ------------------------------ #
    for wdw, wpw, o, pr_in, pr_out in (
            (wdw2, wpw2, o2, pr2, pr3),
            (wdw3, wpw3, o3, pr3, pr4),
            (wdw4, wpw4, o4, pr4, None)):
        h = _depthwise_relu6(pr_in, wdw)                   # (Ho, Wo, Cin) f32
        Ho, Wo, Cin = h.shape
        # Pointwise 1x1 conv on the MXU: bf16 operands, f32 accumulation,
        # M batched over the whole spatial extent of this image.
        h2 = h.reshape(Ho * Wo, Cin).astype(jnp.bfloat16)
        yf = jnp.dot(h2, wpw[...], preferred_element_type=jnp.float32)
        yf = jnp.clip(yf, 0.0, 6.0)                        # (Ho*Wo, Cout) f32
        o[0] = _lane_dense(yf)                             # lane-dense store
        if pr_out is not None:
            _scatter_padded_phases(yf.reshape(Ho, Wo, yf.shape[-1]), pr_out)


# --------------------------------------------------------------------------- #
# Host wrapper
# --------------------------------------------------------------------------- #
def mobilenet_backbone(x_nchw, params):
    """Forward pass: NCHW input -> list of 4 multi-scale feature maps (NHWC)."""
    assert len(params) == 4
    x = jnp.transpose(x_nchw, (0, 2, 3, 1)).astype(jnp.float32)  # NCHW -> NHWC, once
    N, H, W, Cin0 = x.shape
    assert H == W and H % 16 == 0, "spatial dims must be equal and divisible by 16"

    cins = [p[0].shape[1] for p in params]                  # wdw: (9, Cin)
    chans = [p[1].shape[1] for p in params]                 # wpw: (Cin, Cout)
    s_in = [H // (2 ** k) for k in range(4)]                # input  H=W per stage
    spatial = [H // (2 ** (k + 1)) for k in range(4)]       # output H=W per stage

    in_specs = [pl.BlockSpec((1, H, W, Cin0), lambda n: (n, 0, 0, 0))]
    flat_params = []
    for (wdw, wpw) in params:
        for arr in (wdw, wpw):
            flat_params.append(arr)
            in_specs.append(pl.BlockSpec(arr.shape, lambda n: (0, 0)))

    # Lane-dense flat output slabs: (H*W*C/128, 128) when C < 128, else (H*W, C).
    out_rc = []
    for s, c in zip(spatial, chans):
        if c >= 128:
            assert c % 128 == 0
            out_rc.append((s * s, c))
        else:
            assert 128 % c == 0 and (s * s * c) % 128 == 0
            out_rc.append((s * s * c // 128, 128))
    out_shape = tuple(jax.ShapeDtypeStruct((N, r, cc), jnp.float32) for r, cc in out_rc)
    out_specs = [pl.BlockSpec((1, r, cc), lambda n: (n, 0, 0)) for r, cc in out_rc]

    # One padded phase-split scratch buffer per stage input, resident in VMEM.
    scratch_shapes = [pltpu.VMEM((2, 2, si // 2 + 1, si // 2 + 1, ci), jnp.float32)
                      for si, ci in zip(s_in, cins)]

    # Explicit VMEM budget: phase scratch + double-buffered I/O blocks + params.
    scratch_bytes = sum(4 * 2 * 2 * (si // 2 + 1) ** 2 * ci
                        for si, ci in zip(s_in, cins))
    io_bytes = 2 * 4 * H * W * Cin0 + 2 * 4 * sum(r * cc for r, cc in out_rc)
    param_bytes = sum(int(a.size) * a.dtype.itemsize for a in flat_params)
    vmem_limit = int(max(2 * (scratch_bytes + io_bytes + param_bytes),
                         4 * 1024 * 1024))
    # Must fit v7x's 64 MiB physical VMEM with headroom; larger inputs need a
    # row-block grid (see TODO at top of file).
    assert vmem_limit <= 48 * 1024 * 1024, "re-tile with a spatial row-block grid"

    feats_flat = pl.pallas_call(
        _backbone_kernel,
        out_shape=out_shape,
        grid_spec=pltpu.PrefetchScalarGridSpec(
            num_scalar_prefetch=0,
            grid=(N,),
            in_specs=in_specs,
            out_specs=out_specs,
            scratch_shapes=scratch_shapes),
        compiler_params=pltpu.CompilerParams(
            dimension_semantics=("parallel",),
            vmem_limit_bytes=vmem_limit),
    )(x, *flat_params)

    # Free (row-major compatible) reshape of the flat lane-dense outputs.
    return [f.reshape(N, s, s, c) for f, s, c in zip(feats_flat, spatial, chans)]


# --------------------------------------------------------------------------- #
# Parameters (deterministic synthetic, BN folded) and pure-JAX reference
# --------------------------------------------------------------------------- #
def _make_divisible(v, divisor=8):
    return max(divisor, int(v + divisor / 2) // divisor * divisor)


def init_params(key, width_multiplier=1.0):
    """Synthetic parameters matching the backbone's stage shapes, with
    inference-mode BatchNorm (gamma=1, beta=0, mean=0, var=1, eps=1e-5) folded
    into the conv weights.  The folded biases are exactly zero and therefore
    omitted from the parameter set (and from the kernel)."""
    base = [32, 64, 128, 256]
    chans = [_make_divisible(c * width_multiplier) for c in base]
    eps = 1e-5
    bn_scale = 1.0 / math.sqrt(1.0 + eps)
    params = []
    in_c = 3
    for si, out_c in enumerate(chans):
        key, k1, k2 = jax.random.split(key, 3)
        std_dw = math.sqrt(2.0 / (in_c * 9))
        wdw = jax.random.normal(k1, (9, in_c), jnp.float32) * std_dw * bn_scale
        std_pw = math.sqrt(2.0 / out_c)
        wpw = jax.random.normal(k2, (in_c, out_c), jnp.float32) * std_pw * bn_scale
        if si > 0:
            wpw = wpw.astype(jnp.bfloat16)          # MXU operand for stages 2-4
        params.append((wdw, wpw))
        in_c = out_c
    return params, chans


def _reference(x_nchw, params):
    """Pure-JAX reference mirroring the kernel's precision choices
    (f32 depthwise; bf16 operands with f32 accumulation for stages 2-4)."""
    x = jnp.transpose(x_nchw, (0, 2, 3, 1)).astype(jnp.float32)
    feats = []
    for si, (wdw, wpw) in enumerate(params):
        cin = wdw.shape[1]
        w_hwio = wdw.reshape(3, 3, 1, cin)
        y = jax.lax.conv_general_dilated(
            x, w_hwio, window_strides=(2, 2), padding=((1, 1), (1, 1)),
            dimension_numbers=("NHWC", "HWIO", "NHWC"), feature_group_count=cin)
        y = jnp.clip(y, 0.0, 6.0)
        if si == 0:
            y = jnp.einsum("nhwc,cd->nhwd", y, wpw)
        else:
            y = jnp.einsum("nhwc,cd->nhwd",
                           y.astype(jnp.bfloat16).astype(jnp.float32),
                           wpw.astype(jnp.float32))
        y = jnp.clip(y, 0.0, 6.0)
        feats.append(y)
        x = y
    return feats


if __name__ == "__main__":
    key = jax.random.PRNGKey(0)
    kx, kp = jax.random.split(key)

    # Small NCHW input, as the PyTorch module expects.
    x = jax.random.normal(kx, (2, 3, 16, 16), jnp.float32)
    params, chans = init_params(kp, width_multiplier=1.0)

    feats = jax.block_until_ready(mobilenet_backbone(x, params))

    # Shapes: 16 -> 8 -> 4 -> 2 -> 1, channels [32, 64, 128, 256].
    expected_hw = [8, 4, 2, 1]
    for f, c, hw in zip(feats, chans, expected_hw):
        assert f.shape == (2, hw, hw, c), f.shape

    ref = _reference(x, params)
    for f, r in zip(feats, ref):
        err = float(jnp.max(jnp.abs(f - r)))
        # Both sides use identical bf16 operand rounding and f32 accumulation
        # for stages 2-4; tolerance covers f32 accumulation-order differences
        # (and rare bf16 rounding-boundary divergence they can trigger).
        assert err < 5e-3, err

    print("KERNEL_OK")
</pallas_src>

<mosaic_0001>
module attributes {stable_mosaic.version = 11 : i64} {
  func.func @_backbone_kernel(%arg0: i32, %arg1: memref<1x16x16x3xf32, #tpu.memory_space<vmem>>, %arg2: memref<9x3xf32, #tpu.memory_space<vmem>>, %arg3: memref<3x32xf32, #tpu.memory_space<vmem>>, %arg4: memref<9x32xf32, #tpu.memory_space<vmem>>, %arg5: memref<32x64xbf16, #tpu.memory_space<vmem>>, %arg6: memref<9x64xf32, #tpu.memory_space<vmem>>, %arg7: memref<64x128xbf16, #tpu.memory_space<vmem>>, %arg8: memref<9x128xf32, #tpu.memory_space<vmem>>, %arg9: memref<128x256xbf16, #tpu.memory_space<vmem>>, %arg10: memref<1x16x128xf32, #tpu.memory_space<vmem>>, %arg11: memref<1x8x128xf32, #tpu.memory_space<vmem>>, %arg12: memref<1x4x128xf32, #tpu.memory_space<vmem>>, %arg13: memref<1x1x256xf32, #tpu.memory_space<vmem>>, %arg14: memref<2x2x9x9x3xf32, #tpu.memory_space<vmem>>, %arg15: memref<2x2x5x5x32xf32, #tpu.memory_space<vmem>>, %arg16: memref<2x2x3x3x64xf32, #tpu.memory_space<vmem>>, %arg17: memref<2x2x2x2x128xf32, #tpu.memory_space<vmem>>) attributes {dimension_semantics = [#tpu.dimension_semantics<parallel>], iteration_bounds = array<i64: 2>, scalar_prefetch = 0 : i64, scratch_operands = 4 : i64, tpu.core_type = #tpu.core_type<tc>, window_params = [{transform_indices = @transform_0, window_bounds = array<i64: 1, 16, 16, 3>}, {pipeline_mode = #tpu.pipeline_mode<synchronous>, transform_indices = @transform_1, window_bounds = array<i64: 9, 3>}, {pipeline_mode = #tpu.pipeline_mode<synchronous>, transform_indices = @transform_2, window_bounds = array<i64: 3, 32>}, {pipeline_mode = #tpu.pipeline_mode<synchronous>, transform_indices = @transform_3, window_bounds = array<i64: 9, 32>}, {pipeline_mode = #tpu.pipeline_mode<synchronous>, transform_indices = @transform_4, window_bounds = array<i64: 32, 64>}, {pipeline_mode = #tpu.pipeline_mode<synchronous>, transform_indices = @transform_5, window_bounds = array<i64: 9, 64>}, {pipeline_mode = #tpu.pipeline_mode<synchronous>, transform_indices = @transform_6, window_bounds = array<i64: 64, 128>}, {pipeline_mode = #tpu.pipeline_mode<synchronous>, transform_indices = @transform_7, window_bounds = array<i64: 9, 128>}, {pipeline_mode = #tpu.pipeline_mode<synchronous>, transform_indices = @transform_8, window_bounds = array<i64: 128, 256>}, {transform_indices = @transform_9, window_bounds = array<i64: 1, 16, 128>}, {transform_indices = @transform_10, window_bounds = array<i64: 1, 8, 128>}, {transform_indices = @transform_11, window_bounds = array<i64: 1, 4, 128>}, {transform_indices = @transform_12, window_bounds = array<i64: 1, 1, 256>}]} {
    %cst = arith.constant 0.000000e+00 : f32
    %0 = vector.broadcast %cst : f32 to vector<1x9x3xf32>
    %cst_0 = arith.constant 0.000000e+00 : f32
    %1 = vector.broadcast %cst_0 : f32 to vector<9x1x3xf32>
    %c0 = arith.constant 0 : index
    %c0_1 = arith.constant 0 : index
    %c0_2 = arith.constant 0 : index
    %c0_3 = arith.constant 0 : index
    %c0_4 = arith.constant 0 : index
    %2 = vector.load %arg14[%c0, %c0_1, %c0_2, %c0_3, %c0_4] : memref<2x2x9x9x3xf32, #tpu.memory_space<vmem>>, vector<1x1x1x9x3xf32>
    %3 = vector.shape_cast %2 : vector<1x1x1x9x3xf32> to vector<1x9x3xf32>
    %4 = vector.shape_cast %0 : vector<1x9x3xf32> to vector<1x1x1x9x3xf32>
    tpu.vector_store %arg14[%c0, %c0_1, %c0_2, %c0_3, %c0_4], %4 {strides = array<i32>} : memref<2x2x9x9x3xf32, #tpu.memory_space<vmem>>, vector<1x1x1x9x3xf32>,
    %c0_5 = arith.constant 0 : index
    %c1 = arith.constant 1 : index
    %c0_6 = arith.constant 0 : index
    %c0_7 = arith.constant 0 : index
    %c0_8 = arith.constant 0 : index
    %5 = vector.load %arg14[%c0_5, %c1, %c0_6, %c0_7, %c0_8] : memref<2x2x9x9x3xf32, #tpu.memory_space<vmem>>, vector<1x1x1x9x3xf32>
    %6 = vector.shape_cast %5 : vector<1x1x1x9x3xf32> to vector<1x9x3xf32>
    %7 = vector.shape_cast %0 : vector<1x9x3xf32> to vector<1x1x1x9x3xf32>
    tpu.vector_store %arg14[%c0_5, %c1, %c0_6, %c0_7, %c0_8], %7 {strides = array<i32>} : memref<2x2x9x9x3xf32, #tpu.memory_space<vmem>>, vector<1x1x1x9x3xf32>,
    %c0_9 = arith.constant 0 : index
    %c0_10 = arith.constant 0 : index
    %c0_11 = arith.constant 0 : index
    %c0_12 = arith.constant 0 : index
    %c0_13 = arith.constant 0 : index
    %8 = vector.load %arg14[%c0_9, %c0_10, %c0_11, %c0_12, %c0_13] : memref<2x2x9x9x3xf32, #tpu.memory_space<vmem>>, vector<1x1x9x1x3xf32>
    %9 = vector.shape_cast %8 : vector<1x1x9x1x3xf32> to vector<9x1x3xf32>
    %10 = vector.shape_cast %1 : vector<9x1x3xf32> to vector<1x1x9x1x3xf32>
    tpu.vector_store %arg14[%c0_9, %c0_10, %c0_11, %c0_12, %c0_13], %10 {strides = array<i32>} : memref<2x2x9x9x3xf32, #tpu.memory_space<vmem>>, vector<1x1x9x1x3xf32>,
    %c1_14 = arith.constant 1 : index
    %c0_15 = arith.constant 0 : index
    %c0_16 = arith.constant 0 : index
    %c0_17 = arith.constant 0 : index
    %c0_18 = arith.constant 0 : index
    %11 = vector.load %arg14[%c1_14, %c0_15, %c0_16, %c0_17, %c0_18] : memref<2x2x9x9x3xf32, #tpu.memory_space<vmem>>, vector<1x1x9x1x3xf32>
    %12 = vector.shape_cast %11 : vector<1x1x9x1x3xf32> to vector<9x1x3xf32>
    %13 = vector.shape_cast %1 : vector<9x1x3xf32> to vector<1x1x9x1x3xf32>
    tpu.vector_store %arg14[%c1_14, %c0_15, %c0_16, %c0_17, %c0_18], %13 {strides = array<i32>} : memref<2x2x9x9x3xf32, #tpu.memory_space<vmem>>, vector<1x1x9x1x3xf32>,
    %cst_19 = arith.constant 0.000000e+00 : f32
    %14 = vector.broadcast %cst_19 : f32 to vector<1x5x32xf32>
    %cst_20 = arith.constant 0.000000e+00 : f32
    %15 = vector.broadcast %cst_20 : f32 to vector<5x1x32xf32>
    %c0_21 = arith.constant 0 : index
    %c0_22 = arith.constant 0 : index
    %c0_23 = arith.constant 0 : index
    %c0_24 = arith.constant 0 : index
    %c0_25 = arith.constant 0 : index
    %16 = vector.load %arg15[%c0_21, %c0_22, %c0_23, %c0_24, %c0_25] : memref<2x2x5x5x32xf32, #tpu.memory_space<vmem>>, vector<1x1x1x5x32xf32>
    %17 = vector.shape_cast %16 : vector<1x1x1x5x32xf32> to vector<1x5x32xf32>
    %18 = vector.shape_cast %14 : vector<1x5x32xf32> to vector<1x1x1x5x32xf32>
    tpu.vector_store %arg15[%c0_21, %c0_22, %c0_23, %c0_24, %c0_25], %18 {strides = array<i32>} : memref<2x2x5x5x32xf32, #tpu.memory_space<vmem>>, vector<1x1x1x5x32xf32>,
    %c0_26 = arith.constant 0 : index
    %c1_27 = arith.constant 1 : index
    %c0_28 = arith.constant 0 : index
    %c0_29 = arith.constant 0 : index
    %c0_30 = arith.constant 0 : index
    %19 = vector.load %arg15[%c0_26, %c1_27, %c0_28, %c0_29, %c0_30] : memref<2x2x5x5x32xf32, #tpu.memory_space<vmem>>, vector<1x1x1x5x32xf32>
    %20 = vector.shape_cast %19 : vector<1x1x1x5x32xf32> to vector<1x5x32xf32>
    %21 = vector.shape_cast %14 : vector<1x5x32xf32> to vector<1x1x1x5x32xf32>
    tpu.vector_store %arg15[%c0_26, %c1_27, %c0_28, %c0_29, %c0_30], %21 {strides = array<i32>} : memref<2x2x5x5x32xf32, #tpu.memory_space<vmem>>, vector<1x1x1x5x32xf32>,
    %c0_31 = arith.constant 0 : index
    %c0_32 = arith.constant 0 : index
    %c0_33 = arith.constant 0 : index
    %c0_34 = arith.constant 0 : index
    %c0_35 = arith.constant 0 : index
    %22 = vector.load %arg15[%c0_31, %c0_32, %c0_33, %c0_34, %c0_35] : memref<2x2x5x5x32xf32, #tpu.memory_space<vmem>>, vector<1x1x5x1x32xf32>
    %23 = vector.shape_cast %22 : vector<1x1x5x1x32xf32> to vector<5x1x32xf32>
    %24 = vector.shape_cast %15 : vector<5x1x32xf32> to vector<1x1x5x1x32xf32>
    tpu.vector_store %arg15[%c0_31, %c0_32, %c0_33, %c0_34, %c0_35], %24 {strides = array<i32>} : memref<2x2x5x5x32xf32, #tpu.memory_space<vmem>>, vector<1x1x5x1x32xf32>,
    %c1_36 = arith.constant 1 : index
    %c0_37 = arith.constant 0 : index
    %c0_38 = arith.constant 0 : index
    %c0_39 = arith.constant 0 : index
    %c0_40 = arith.constant 0 : index
    %25 = vector.load %arg15[%c1_36, %c0_37, %c0_38, %c0_39, %c0_40] : memref<2x2x5x5x32xf32, #tpu.memory_space<vmem>>, vector<1x1x5x1x32xf32>
    %26 = vector.shape_cast %25 : vector<1x1x5x1x32xf32> to vector<5x1x32xf32>
    %27 = vector.shape_cast %15 : vector<5x1x32xf32> to vector<1x1x5x1x32xf32>
    tpu.vector_store %arg15[%c1_36, %c0_37, %c0_38, %c0_39, %c0_40], %27 {strides = array<i32>} : memref<2x2x5x5x32xf32, #tpu.memory_space<vmem>>, vector<1x1x5x1x32xf32>,
    %cst_41 = arith.constant 0.000000e+00 : f32
    %28 = vector.broadcast %cst_41 : f32 to vector<1x3x64xf32>
    %cst_42 = arith.constant 0.000000e+00 : f32
    %29 = vector.broadcast %cst_42 : f32 to vector<3x1x64xf32>
    %c0_43 = arith.constant 0 : index
    %c0_44 = arith.constant 0 : index
    %c0_45 = arith.constant 0 : index
    %c0_46 = arith.constant 0 : index
    %c0_47 = arith.constant 0 : index
    %30 = vector.load %arg16[%c0_43, %c0_44, %c0_45, %c0_46, %c0_47] : memref<2x2x3x3x64xf32, #tpu.memory_space<vmem>>, vector<1x1x1x3x64xf32>
    %31 = vector.shape_cast %30 : vector<1x1x1x3x64xf32> to vector<1x3x64xf32>
    %32 = vector.shape_cast %28 : vector<1x3x64xf32> to vector<1x1x1x3x64xf32>
    tpu.vector_store %arg16[%c0_43, %c0_44, %c0_45, %c0_46, %c0_47], %32 {strides = array<i32>} : memref<2x2x3x3x64xf32, #tpu.memory_space<vmem>>, vector<1x1x1x3x64xf32>,
    %c0_48 = arith.constant 0 : index
    %c1_49 = arith.constant 1 : index
    %c0_50 = arith.constant 0 : index
    %c0_51 = arith.constant 0 : index
    %c0_52 = arith.constant 0 : index
    %33 = vector.load %arg16[%c0_48, %c1_49, %c0_50, %c0_51, %c0_52] : memref<2x2x3x3x64xf32, #tpu.memory_space<vmem>>, vector<1x1x1x3x64xf32>
    %34 = vector.shape_cast %33 : vector<1x1x1x3x64xf32> to vector<1x3x64xf32>
    %35 = vector.shape_cast %28 : vector<1x3x64xf32> to vector<1x1x1x3x64xf32>
    tpu.vector_store %arg16[%c0_48, %c1_49, %c0_50, %c0_51, %c0_52], %35 {strides = array<i32>} : memref<2x2x3x3x64xf32, #tpu.memory_space<vmem>>, vector<1x1x1x3x64xf32>,
    %c0_53 = arith.constant 0 : index
    %c0_54 = arith.constant 0 : index
    %c0_55 = arith.constant 0 : index
    %c0_56 = arith.constant 0 : index
    %c0_57 = arith.constant 0 : index
    %36 = vector.load %arg16[%c0_53, %c0_54, %c0_55, %c0_56, %c0_57] : memref<2x2x3x3x64xf32, #tpu.memory_space<vmem>>, vector<1x1x3x1x64xf32>
    %37 = vector.shape_cast %36 : vector<1x1x3x1x64xf32> to vector<3x1x64xf32>
    %38 = vector.shape_cast %29 : vector<3x1x64xf32> to vector<1x1x3x1x64xf32>
    tpu.vector_store %arg16[%c0_53, %c0_54, %c0_55, %c0_56, %c0_57], %38 {strides = array<i32>} : memref<2x2x3x3x64xf32, #tpu.memory_space<vmem>>, vector<1x1x3x1x64xf32>,
    %c1_58 = arith.constant 1 : index
    %c0_59 = arith.constant 0 : index
    %c0_60 = arith.constant 0 : index
    %c0_61 = arith.constant 0 : index
    %c0_62 = arith.constant 0 : index
    %39 = vector.load %arg16[%c1_58, %c0_59, %c0_60, %c0_61, %c0_62] : memref<2x2x3x3x64xf32, #tpu.memory_space<vmem>>, vector<1x1x3x1x64xf32>
    %40 = vector.shape_cast %39 : vector<1x1x3x1x64xf32> to vector<3x1x64xf32>
    %41 = vector.shape_cast %29 : vector<3x1x64xf32> to vector<1x1x3x1x64xf32>
    tpu.vector_store %arg16[%c1_58, %c0_59, %c0_60, %c0_61, %c0_62], %41 {strides = array<i32>} : memref<2x2x3x3x64xf32, #tpu.memory_space<vmem>>, vector<1x1x3x1x64xf32>,
    %cst_63 = arith.constant 0.000000e+00 : f32
    %42 = vector.broadcast %cst_63 : f32 to vector<1x2x128xf32>
    %cst_64 = arith.constant 0.000000e+00 : f32
    %43 = vector.broadcast %cst_64 : f32 to vector<2x1x128xf32>
    %c0_65 = arith.constant 0 : index
    %c0_66 = arith.constant 0 : index
    %c0_67 = arith.constant 0 : index
    %c0_68 = arith.constant 0 : index
    %c0_69 = arith.constant 0 : index
    %44 = vector.load %arg17[%c0_65, %c0_66, %c0_67, %c0_68, %c0_69] : memref<2x2x2x2x128xf32, #tpu.memory_space<vmem>>, vector<1x1x1x2x128xf32>
    %45 = vector.shape_cast %44 : vector<1x1x1x2x128xf32> to vector<1x2x128xf32>
    %46 = vector.shape_cast %42 : vector<1x2x128xf32> to vector<1x1x1x2x128xf32>
    tpu.vector_store %arg17[%c0_65, %c0_66, %c0_67, %c0_68, %c0_69], %46 {strides = array<i32>} : memref<2x2x2x2x128xf32, #tpu.memory_space<vmem>>, vector<1x1x1x2x128xf32>,
    %c0_70 = arith.constant 0 : index
    %c1_71 = arith.constant 1 : index
    %c0_72 = arith.constant 0 : index
    %c0_73 = arith.constant 0 : index
    %c0_74 = arith.constant 0 : index
    %47 = vector.load %arg17[%c0_70, %c1_71, %c0_72, %c0_73, %c0_74] : memref<2x2x2x2x128xf32, #tpu.memory_space<vmem>>, vector<1x1x1x2x128xf32>
    %48 = vector.shape_cast %47 : vector<1x1x1x2x128xf32> to vector<1x2x128xf32>
    %49 = vector.shape_cast %42 : vector<1x2x128xf32> to vector<1x1x1x2x128xf32>
    tpu.vector_store %arg17[%c0_70, %c1_71, %c0_72, %c0_73, %c0_74], %49 {strides = array<i32>} : memref<2x2x2x2x128xf32, #tpu.memory_space<vmem>>, vector<1x1x1x2x128xf32>,
    %c0_75 = arith.constant 0 : index
    %c0_76 = arith.constant 0 : index
    %c0_77 = arith.constant 0 : index
    %c0_78 = arith.constant 0 : index
    %c0_79 = arith.constant 0 : index
    %50 = vector.load %arg17[%c0_75, %c0_76, %c0_77, %c0_78, %c0_79] : memref<2x2x2x2x128xf32, #tpu.memory_space<vmem>>, vector<1x1x2x1x128xf32>
    %51 = vector.shape_cast %50 : vector<1x1x2x1x128xf32> to vector<2x1x128xf32>
    %52 = vector.shape_cast %43 : vector<2x1x128xf32> to vector<1x1x2x1x128xf32>
    tpu.vector_store %arg17[%c0_75, %c0_76, %c0_77, %c0_78, %c0_79], %52 {strides = array<i32>} : memref<2x2x2x2x128xf32, #tpu.memory_space<vmem>>, vector<1x1x2x1x128xf32>,
    %c1_80 = arith.constant 1 : index
    %c0_81 = arith.constant 0 : index
    %c0_82 = arith.constant 0 : index
    %c0_83 = arith.constant 0 : index
    %c0_84 = arith.constant 0 : index
    %53 = vector.load %arg17[%c1_80, %c0_81, %c0_82, %c0_83, %c0_84] : memref<2x2x2x2x128xf32, #tpu.memory_space<vmem>>, vector<1x1x2x1x128xf32>
    %54 = vector.shape_cast %53 : vector<1x1x2x1x128xf32> to vector<2x1x128xf32>
    %55 = vector.shape_cast %43 : vector<2x1x128xf32> to vector<1x1x2x1x128xf32>
    tpu.vector_store %arg17[%c1_80, %c0_81, %c0_82, %c0_83, %c0_84], %55 {strides = array<i32>} : memref<2x2x2x2x128xf32, #tpu.memory_space<vmem>>, vector<1x1x2x1x128xf32>,
    %c0_85 = arith.constant 0 : index
    %c0_86 = arith.constant 0 : index
    %c0_87 = arith.constant 0 : index
    %c0_88 = arith.constant 0 : index
    %56 = vector.load %arg1[%c0_85, %c0_86, %c0_87, %c0_88] : memref<1x16x16x3xf32, #tpu.memory_space<vmem>>, vector<1x16x16x3xf32>
    %57 = vector.shape_cast %56 : vector<1x16x16x3xf32> to vector<16x16x3xf32>
    %58 = vector.shape_cast %57 : vector<16x16x3xf32> to vector<8x2x8x2x3xf32>
    %59 = vector.extract_strided_slice %58 {offsets = [0, 0, 0, 0, 0], sizes = [8, 1, 8, 1, 3], strides = [1, 1, 1, 1, 1]} : vector<8x2x8x2x3xf32> to vector<8x1x8x1x3xf32>
    %60 = vector.shape_cast %59 : vector<8x1x8x1x3xf32> to vector<8x8x3xf32>
    %c1_89 = arith.constant 1 : index
    %c1_90 = arith.constant 1 : index
    %c0_91 = arith.constant 0 : index
    %c0_92 = arith.constant 0 : index
    %c0_93 = arith.constant 0 : index
    %61 = vector.load %arg14[%c1_89, %c1_90, %c0_91, %c0_92, %c0_93] : memref<2x2x9x9x3xf32, #tpu.memory_space<vmem>>, vector<1x1x8x8x3xf32>
    %62 = vector.shape_cast %61 : vector<1x1x8x8x3xf32> to vector<8x8x3xf32>
    %63 = vector.shape_cast %60 : vector<8x8x3xf32> to vector<1x1x8x8x3xf32>
    tpu.vector_store %arg14[%c1_89, %c1_90, %c0_91, %c0_92, %c0_93], %63 {strides = array<i32>} : memref<2x2x9x9x3xf32, #tpu.memory_space<vmem>>, vector<1x1x8x8x3xf32>,
    %64 = vector.extract_strided_slice %58 {offsets = [0, 0, 0, 1, 0], sizes = [8, 1, 8, 1, 3], strides = [1, 1, 1, 1, 1]} : vector<8x2x8x2x3xf32> to vector<8x1x8x1x3xf32>
    %65 = vector.shape_cast %64 : vector<8x1x8x1x3xf32> to vector<8x8x3xf32>
    %c1_94 = arith.constant 1 : index
    %c0_95 = arith.constant 0 : index
    %c0_96 = arith.constant 0 : index
    %c1_97 = arith.constant 1 : index
    %c0_98 = arith.constant 0 : index
    %66 = vector.load %arg14[%c1_94, %c0_95, %c0_96, %c1_97, %c0_98] : memref<2x2x9x9x3xf32, #tpu.memory_space<vmem>>, vector<1x1x8x8x3xf32>
    %67 = vector.shape_cast %66 : vector<1x1x8x8x3xf32> to vector<8x8x3xf32>
    %68 = vector.shape_cast %65 : vector<8x8x3xf32> to vector<1x1x8x8x3xf32>
    tpu.vector_store %arg14[%c1_94, %c0_95, %c0_96, %c1_97, %c0_98], %68 {strides = array<i32>} : memref<2x2x9x9x3xf32, #tpu.memory_space<vmem>>, vector<1x1x8x8x3xf32>,
    %69 = vector.extract_strided_slice %58 {offsets = [0, 1, 0, 0, 0], sizes = [8, 1, 8, 1, 3], strides = [1, 1, 1, 1, 1]} : vector<8x2x8x2x3xf32> to vector<8x1x8x1x3xf32>
    %70 = vector.shape_cast %69 : vector<8x1x8x1x3xf32> to vector<8x8x3xf32>
    %c0_99 = arith.constant 0 : index
    %c1_100 = arith.constant 1 : index
    %c1_101 = arith.constant 1 : index
    %c0_102 = arith.constant 0 : index
    %c0_103 = arith.constant 0 : index
    %71 = vector.load %arg14[%c0_99, %c1_100, %c1_101, %c0_102, %c0_103] : memref<2x2x9x9x3xf32, #tpu.memory_space<vmem>>, vector<1x1x8x8x3xf32>
    %72 = vector.shape_cast %71 : vector<1x1x8x8x3xf32> to vector<8x8x3xf32>
    %73 = vector.shape_cast %70 : vector<8x8x3xf32> to vector<1x1x8x8x3xf32>
    tpu.vector_store %arg14[%c0_99, %c1_100, %c1_101, %c0_102, %c0_103], %73 {strides = array<i32>} : memref<2x2x9x9x3xf32, #tpu.memory_space<vmem>>, vector<1x1x8x8x3xf32>,
    %74 = vector.extract_strided_slice %58 {offsets = [0, 1, 0, 1, 0], sizes = [8, 1, 8, 1, 3], strides = [1, 1, 1, 1, 1]} : vector<8x2x8x2x3xf32> to vector<8x1x8x1x3xf32>
    %75 = vector.shape_cast %74 : vector<8x1x8x1x3xf32> to vector<8x8x3xf32>
    %c0_104 = arith.constant 0 : index
    %c0_105 = arith.constant 0 : index
    %c1_106 = arith.constant 1 : index
    %c1_107 = arith.constant 1 : index
    %c0_108 = arith.constant 0 : index
    %76 = vector.load %arg14[%c0_104, %c0_105, %c1_106, %c1_107, %c0_108] : memref<2x2x9x9x3xf32, #tpu.memory_space<vmem>>, vector<1x1x8x8x3xf32>
    %77 = vector.shape_cast %76 : vector<1x1x8x8x3xf32> to vector<8x8x3xf32>
    %78 = vector.shape_cast %75 : vector<8x8x3xf32> to vector<1x1x8x8x3xf32>
    tpu.vector_store %arg14[%c0_104, %c0_105, %c1_106, %c1_107, %c0_108], %78 {strides = array<i32>} : memref<2x2x9x9x3xf32, #tpu.memory_space<vmem>>, vector<1x1x8x8x3xf32>,
    %c0_109 = arith.constant 0 : index
    %c0_110 = arith.constant 0 : index
    %79 = vector.load %arg2[%c0_109, %c0_110] : memref<9x3xf32, #tpu.memory_space<vmem>>, vector<9x3xf32>
    %cst_111 = arith.constant 0.000000e+00 : f32
    %80 = vector.broadcast %cst_111 : f32 to vector<8x8x3xf32>
    %c0_112 = arith.constant 0 : index
    %c0_113 = arith.constant 0 : index
    %c0_114 = arith.constant 0 : index
    %c0_115 = arith.constant 0 : index
    %c0_116 = arith.constant 0 : index
    %81 = vector.load %arg14[%c0_112, %c0_113, %c0_114, %c0_115, %c0_116] : memref<2x2x9x9x3xf32, #tpu.memory_space<vmem>>, vector<1x1x8x8x3xf32>
    %82 = vector.shape_cast %81 : vector<1x1x8x8x3xf32> to vector<8x8x3xf32>
    %83 = vector.extract_strided_slice %79 {offsets = [0, 0], sizes = [1, 3], strides = [1, 1]} : vector<9x3xf32> to vector<1x3xf32>
    %84 = vector.shape_cast %83 : vector<1x3xf32> to vector<1x1x3xf32>
    %85 = vector.broadcast %84 : vector<1x1x3xf32> to vector<8x8x3xf32>
    %86 = arith.mulf %82, %85 : vector<8x8x3xf32>
    %87 = arith.addf %80, %86 : vector<8x8x3xf32>
    %c0_117 = arith.constant 0 : index
    %c1_118 = arith.constant 1 : index
    %c0_119 = arith.constant 0 : index
    %c0_120 = arith.constant 0 : index
    %c0_121 = arith.constant 0 : index
    %88 = vector.load %arg14[%c0_117, %c1_118, %c0_119, %c0_120, %c0_121] : memref<2x2x9x9x3xf32, #tpu.memory_space<vmem>>, vector<1x1x8x8x3xf32>
    %89 = vector.shape_cast %88 : vector<1x1x8x8x3xf32> to vector<8x8x3xf32>
    %90 = vector.extract_strided_slice %79 {offsets = [1, 0], sizes = [1, 3], strides = [1, 1]} : vector<9x3xf32> to vector<1x3xf32>
    %91 = vector.shape_cast %90 : vector<1x3xf32> to vector<1x1x3xf32>
    %92 = vector.broadcast %91 : vector<1x1x3xf32> to vector<8x8x3xf32>
    %93 = arith.mulf %89, %92 : vector<8x8x3xf32>
    %94 = arith.addf %87, %93 : vector<8x8x3xf32>
    %c0_122 = arith.constant 0 : index
    %c0_123 = arith.constant 0 : index
    %c0_124 = arith.constant 0 : index
    %c1_125 = arith.constant 1 : index
    %c0_126 = arith.constant 0 : index
    %95 = vector.load %arg14[%c0_122, %c0_123, %c0_124, %c1_125, %c0_126] : memref<2x2x9x9x3xf32, #tpu.memory_space<vmem>>, vector<1x1x8x8x3xf32>
    %96 = vector.shape_cast %95 : vector<1x1x8x8x3xf32> to vector<8x8x3xf32>
    %97 = vector.extract_strided_slice %79 {offsets = [2, 0], sizes = [1, 3], strides = [1, 1]} : vector<9x3xf32> to vector<1x3xf32>
    %98 = vector.shape_cast %97 : vector<1x3xf32> to vector<1x1x3xf32>
    %99 = vector.broadcast %98 : vector<1x1x3xf32> to vector<8x8x3xf32>
    %100 = arith.mulf %96, %99 : vector<8x8x3xf32>
    %101 = arith.addf %94, %100 : vector<8x8x3xf32>
    %c1_127 = arith.constant 1 : index
    %c0_128 = arith.constant 0 : index
    %c0_129 = arith.constant 0 : index
    %c0_130 = arith.constant 0 : index
    %c0_131 = arith.constant 0 : index
    %102 = vector.load %arg14[%c1_127, %c0_128, %c0_129, %c0_130, %c0_131] : memref<2x2x9x9x3xf32, #tpu.memory_space<vmem>>, vector<1x1x8x8x3xf32>
    %103 = vector.shape_cast %102 : vector<1x1x8x8x3xf32> to vector<8x8x3xf32>
    %104 = vector.extract_strided_slice %79 {offsets = [3, 0], sizes = [1, 3], strides = [1, 1]} : vector<9x3xf32> to vector<1x3xf32>
    %105 = vector.shape_cast %104 : vector<1x3xf32> to vector<1x1x3xf32>
    %106 = vector.broadcast %105 : vector<1x1x3xf32> to vector<8x8x3xf32>
    %107 = arith.mulf %103, %106 : vector<8x8x3xf32>
    %108 = arith.addf %101, %107 : vector<8x8x3xf32>
    %c1_132 = arith.constant 1 : index
    %c1_133 = arith.constant 1 : index
    %c0_134 = arith.constant 0 : index
    %c0_135 = arith.constant 0 : index
    %c0_136 = arith.constant 0 : index
    %109 = vector.load %arg14[%c1_132, %c1_133, %c0_134, %c0_135, %c0_136] : memref<2x2x9x9x3xf32, #tpu.memory_space<vmem>>, vector<1x1x8x8x3xf32>
    %110 = vector.shape_cast %109 : vector<1x1x8x8x3xf32> to vector<8x8x3xf32>
    %111 = vector.extract_strided_slice %79 {offsets = [4, 0], sizes = [1, 3], strides = [1, 1]} : vector<9x3xf32> to vector<1x3xf32>
    %112 = vector.shape_cast %111 : vector<1x3xf32> to vector<1x1x3xf32>
    %113 = vector.broadcast %112 : vector<1x1x3xf32> to vector<8x8x3xf32>
    %114 = arith.mulf %110, %113 : vector<8x8x3xf32>
    %115 = arith.addf %108, %114 : vector<8x8x3xf32>
    %c1_137 = arith.constant 1 : index
    %c0_138 = arith.constant 0 : index
    %c0_139 = arith.constant 0 : index
    %c1_140 = arith.constant 1 : index
    %c0_141 = arith.constant 0 : index
    %116 = vector.load %arg14[%c1_137, %c0_138, %c0_139, %c1_140, %c0_141] : memref<2x2x9x9x3xf32, #tpu.memory_space<vmem>>, vector<1x1x8x8x3xf32>
    %117 = vector.shape_cast %116 : vector<1x1x8x8x3xf32> to vector<8x8x3xf32>
    %118 = vector.extract_strided_slice %79 {offsets = [5, 0], sizes = [1, 3], strides = [1, 1]} : vector<9x3xf32> to vector<1x3xf32>
    %119 = vector.shape_cast %118 : vector<1x3xf32> to vector<1x1x3xf32>
    %120 = vector.broadcast %119 : vector<1x1x3xf32> to vector<8x8x3xf32>
    %121 = arith.mulf %117, %120 : vector<8x8x3xf32>
    %122 = arith.addf %115, %121 : vector<8x8x3xf32>
    %c0_142 = arith.constant 0 : index
    %c0_143 = arith.constant 0 : index
    %c1_144 = arith.constant 1 : index
    %c0_145 = arith.constant 0 : index
    %c0_146 = arith.constant 0 : index
    %123 = vector.load %arg14[%c0_142, %c0_143, %c1_144, %c0_145, %c0_146] : memref<2x2x9x9x3xf32, #tpu.memory_space<vmem>>, vector<1x1x8x8x3xf32>
    %124 = vector.shape_cast %123 : vector<1x1x8x8x3xf32> to vector<8x8x3xf32>
    %125 = vector.extract_strided_slice %79 {offsets = [6, 0], sizes = [1, 3], strides = [1, 1]} : vector<9x3xf32> to vector<1x3xf32>
    %126 = vector.shape_cast %125 : vector<1x3xf32> to vector<1x1x3xf32>
    %127 = vector.broadcast %126 : vector<1x1x3xf32> to vector<8x8x3xf32>
    %128 = arith.mulf %124, %127 : vector<8x8x3xf32>
    %129 = arith.addf %122, %128 : vector<8x8x3xf32>
    %c0_147 = arith.constant 0 : index
    %c1_148 = arith.constant 1 : index
    %c1_149 = arith.constant 1 : index
    %c0_150 = arith.constant 0 : index
    %c0_151 = arith.constant 0 : index
    %130 = vector.load %arg14[%c0_147, %c1_148, %c1_149, %c0_150, %c0_151] : memref<2x2x9x9x3xf32, #tpu.memory_space<vmem>>, vector<1x1x8x8x3xf32>
    %131 = vector.shape_cast %130 : vector<1x1x8x8x3xf32> to vector<8x8x3xf32>
    %132 = vector.extract_strided_slice %79 {offsets = [7, 0], sizes = [1, 3], strides = [1, 1]} : vector<9x3xf32> to vector<1x3xf32>
    %133 = vector.shape_cast %132 : vector<1x3xf32> to vector<1x1x3xf32>
    %134 = vector.broadcast %133 : vector<1x1x3xf32> to vector<8x8x3xf32>
    %135 = arith.mulf %131, %134 : vector<8x8x3xf32>
    %136 = arith.addf %129, %135 : vector<8x8x3xf32>
    %c0_152 = arith.constant 0 : index
    %c0_153 = arith.constant 0 : index
    %c1_154 = arith.constant 1 : index
    %c1_155 = arith.constant 1 : index
    %c0_156 = arith.constant 0 : index
    %137 = vector.load %arg14[%c0_152, %c0_153, %c1_154, %c1_155, %c0_156] : memref<2x2x9x9x3xf32, #tpu.memory_space<vmem>>, vector<1x1x8x8x3xf32>
    %138 = vector.shape_cast %137 : vector<1x1x8x8x3xf32> to vector<8x8x3xf32>
    %139 = vector.extract_strided_slice %79 {offsets = [8, 0], sizes = [1, 3], strides = [1, 1]} : vector<9x3xf32> to vector<1x3xf32>
    %140 = vector.shape_cast %139 : vector<1x3xf32> to vector<1x1x3xf32>
    %141 = vector.broadcast %140 : vector<1x1x3xf32> to vector<8x8x3xf32>
    %142 = arith.mulf %138, %141 : vector<8x8x3xf32>
    %143 = arith.addf %136, %142 : vector<8x8x3xf32>
    %cst_157 = arith.constant 0.000000e+00 : f32
    %cst_158 = arith.constant 6.000000e+00 : f32
    %144 = vector.broadcast %cst_157 : f32 to vector<8x8x3xf32>
    %145 = arith.maximumf %144, %143 : vector<8x8x3xf32>
    %146 = vector.broadcast %cst_158 : f32 to vector<8x8x3xf32>
    %147 = arith.minimumf %146, %145 : vector<8x8x3xf32>
    %c0_159 = arith.constant 0 : index
    %c0_160 = arith.constant 0 : index
    %148 = vector.load %arg3[%c0_159, %c0_160] : memref<3x32xf32, #tpu.memory_space<vmem>>, vector<3x32xf32>
    %149 = vector.extract_strided_slice %147 {offsets = [0, 0, 0], sizes = [8, 8, 1], strides = [1, 1, 1]} : vector<8x8x3xf32> to vector<8x8x1xf32>
    %150 = vector.extract_strided_slice %148 {offsets = [0, 0], sizes = [1, 32], strides = [1, 1]} : vector<3x32xf32> to vector<1x32xf32>
    %151 = vector.shape_cast %150 : vector<1x32xf32> to vector<1x1x32xf32>
    %152 = vector.broadcast %149 : vector<8x8x1xf32> to vector<8x8x32xf32>
    %153 = vector.broadcast %151 : vector<1x1x32xf32> to vector<8x8x32xf32>
    %154 = arith.mulf %152, %153 : vector<8x8x32xf32>
    %155 = vector.extract_strided_slice %147 {offsets = [0, 0, 1], sizes = [8, 8, 1], strides = [1, 1, 1]} : vector<8x8x3xf32> to vector<8x8x1xf32>
    %156 = vector.extract_strided_slice %148 {offsets = [1, 0], sizes = [1, 32], strides = [1, 1]} : vector<3x32xf32> to vector<1x32xf32>
    %157 = vector.shape_cast %156 : vector<1x32xf32> to vector<1x1x32xf32>
    %158 = vector.broadcast %155 : vector<8x8x1xf32> to vector<8x8x32xf32>
    %159 = vector.broadcast %157 : vector<1x1x32xf32> to vector<8x8x32xf32>
    %160 = arith.mulf %158, %159 : vector<8x8x32xf32>
    %161 = arith.addf %154, %160 : vector<8x8x32xf32>
    %162 = vector.extract_strided_slice %147 {offsets = [0, 0, 2], sizes = [8, 8, 1], strides = [1, 1, 1]} : vector<8x8x3xf32> to vector<8x8x1xf32>
    %163 = vector.extract_strided_slice %148 {offsets = [2, 0], sizes = [1, 32], strides = [1, 1]} : vector<3x32xf32> to vector<1x32xf32>
    %164 = vector.shape_cast %163 : vector<1x32xf32> to vector<1x1x32xf32>
    %165 = vector.broadcast %162 : vector<8x8x1xf32> to vector<8x8x32xf32>
    %166 = vector.broadcast %164 : vector<1x1x32xf32> to vector<8x8x32xf32>
    %167 = arith.mulf %165, %166 : vector<8x8x32xf32>
    %168 = arith.addf %161, %167 : vector<8x8x32xf32>
    %cst_161 = arith.constant 0.000000e+00 : f32
    %cst_162 = arith.constant 6.000000e+00 : f32
    %169 = vector.broadcast %cst_161 : f32 to vector<8x8x32xf32>
    %170 = arith.maximumf %169, %168 : vector<8x8x32xf32>
    %171 = vector.broadcast %cst_162 : f32 to vector<8x8x32xf32>
    %172 = arith.minimumf %171, %170 : vector<8x8x32xf32>
    %173 = vector.shape_cast %172 : vector<8x8x32xf32> to vector<64x32xf32>
    %174 = vector.shape_cast %173 : vector<64x32xf32> to vector<16x4x32xf32>
    %175 = vector.extract_strided_slice %174 {offsets = [0, 0, 0], sizes = [16, 1, 32], strides = [1, 1, 1]} : vector<16x4x32xf32> to vector<16x1x32xf32>
    %176 = vector.shape_cast %175 : vector<16x1x32xf32> to vector<16x32xf32>
    %177 = vector.extract_strided_slice %174 {offsets = [0, 1, 0], sizes = [16, 1, 32], strides = [1, 1, 1]} : vector<16x4x32xf32> to vector<16x1x32xf32>
    %178 = vector.shape_cast %177 : vector<16x1x32xf32> to vector<16x32xf32>
    %179 = vector.extract_strided_slice %174 {offsets = [0, 2, 0], sizes = [16, 1, 32], strides = [1, 1, 1]} : vector<16x4x32xf32> to vector<16x1x32xf32>
    %180 = vector.shape_cast %179 : vector<16x1x32xf32> to vector<16x32xf32>
    %181 = vector.extract_strided_slice %174 {offsets = [0, 3, 0], sizes = [16, 1, 32], strides = [1, 1, 1]} : vector<16x4x32xf32> to vector<16x1x32xf32>
    %182 = vector.shape_cast %181 : vector<16x1x32xf32> to vector<16x32xf32>
    %183 = tpu.concatenate %176, %178, %180, %182 in 1 : vector<16x32xf32>, vector<16x32xf32>, vector<16x32xf32>, vector<16x32xf32> -> vector<16x128xf32>
    %c0_163 = arith.constant 0 : index
    %c0_164 = arith.constant 0 : index
    %c0_165 = arith.constant 0 : index
    %184 = vector.load %arg10[%c0_163, %c0_164, %c0_165] : memref<1x16x128xf32, #tpu.memory_space<vmem>>, vector<1x16x128xf32>
    %185 = vector.shape_cast %184 : vector<1x16x128xf32> to vector<16x128xf32>
    %186 = vector.shape_cast %183 : vector<16x128xf32> to vector<1x16x128xf32>
    tpu.vector_store %arg10[%c0_163, %c0_164, %c0_165], %186 {strides = array<i32>} : memref<1x16x128xf32, #tpu.memory_space<vmem>>, vector<1x16x128xf32>,
    %187 = vector.shape_cast %172 : vector<8x8x32xf32> to vector<4x2x4x2x32xf32>
    %188 = vector.extract_strided_slice %187 {offsets = [0, 0, 0, 0, 0], sizes = [4, 1, 4, 1, 32], strides = [1, 1, 1, 1, 1]} : vector<4x2x4x2x32xf32> to vector<4x1x4x1x32xf32>
    %189 = vector.shape_cast %188 : vector<4x1x4x1x32xf32> to vector<4x4x32xf32>
    %c1_166 = arith.constant 1 : index
    %c1_167 = arith.constant 1 : index
    %c0_168 = arith.constant 0 : index
    %c0_169 = arith.constant 0 : index
    %c0_170 = arith.constant 0 : index
    %190 = vector.load %arg15[%c1_166, %c1_167, %c0_168, %c0_169, %c0_170] : memref<2x2x5x5x32xf32, #tpu.memory_space<vmem>>, vector<1x1x4x4x32xf32>
    %191 = vector.shape_cast %190 : vector<1x1x4x4x32xf32> to vector<4x4x32xf32>
    %192 = vector.shape_cast %189 : vector<4x4x32xf32> to vector<1x1x4x4x32xf32>
    tpu.vector_store %arg15[%c1_166, %c1_167, %c0_168, %c0_169, %c0_170], %192 {strides = array<i32>} : memref<2x2x5x5x32xf32, #tpu.memory_space<vmem>>, vector<1x1x4x4x32xf32>,
    %193 = vector.extract_strided_slice %187 {offsets = [0, 0, 0, 1, 0], sizes = [4, 1, 4, 1, 32], strides = [1, 1, 1, 1, 1]} : vector<4x2x4x2x32xf32> to vector<4x1x4x1x32xf32>
    %194 = vector.shape_cast %193 : vector<4x1x4x1x32xf32> to vector<4x4x32xf32>
    %c1_171 = arith.constant 1 : index
    %c0_172 = arith.constant 0 : index
    %c0_173 = arith.constant 0 : index
    %c1_174 = arith.constant 1 : index
    %c0_175 = arith.constant 0 : index
    %195 = vector.load %arg15[%c1_171, %c0_172, %c0_173, %c1_174, %c0_175] : memref<2x2x5x5x32xf32, #tpu.memory_space<vmem>>, vector<1x1x4x4x32xf32>
    %196 = vector.shape_cast %195 : vector<1x1x4x4x32xf32> to vector<4x4x32xf32>
    %197 = vector.shape_cast %194 : vector<4x4x32xf32> to vector<1x1x4x4x32xf32>
    tpu.vector_store %arg15[%c1_171, %c0_172, %c0_173, %c1_174, %c0_175], %197 {strides = array<i32>} : memref<2x2x5x5x32xf32, #tpu.memory_space<vmem>>, vector<1x1x4x4x32xf32>,
    %198 = vector.extract_strided_slice %187 {offsets = [0, 1, 0, 0, 0], sizes = [4, 1, 4, 1, 32], strides = [1, 1, 1, 1, 1]} : vector<4x2x4x2x32xf32> to vector<4x1x4x1x32xf32>
    %199 = vector.shape_cast %198 : vector<4x1x4x1x32xf32> to vector<4x4x32xf32>
    %c0_176 = arith.constant 0 : index
    %c1_177 = arith.constant 1 : index
    %c1_178 = arith.constant 1 : index
    %c0_179 = arith.constant 0 : index
    %c0_180 = arith.constant 0 : index
    %200 = vector.load %arg15[%c0_176, %c1_177, %c1_178, %c0_179, %c0_180] : memref<2x2x5x5x32xf32, #tpu.memory_space<vmem>>, vector<1x1x4x4x32xf32>
    %201 = vector.shape_cast %200 : vector<1x1x4x4x32xf32> to vector<4x4x32xf32>
    %202 = vector.shape_cast %199 : vector<4x4x32xf32> to vector<1x1x4x4x32xf32>
    tpu.vector_store %arg15[%c0_176, %c1_177, %c1_178, %c0_179, %c0_180], %202 {strides = array<i32>} : memref<2x2x5x5x32xf32, #tpu.memory_space<vmem>>, vector<1x1x4x4x32xf32>,
    %203 = vector.extract_strided_slice %187 {offsets = [0, 1, 0, 1, 0], sizes = [4, 1, 4, 1, 32], strides = [1, 1, 1, 1, 1]} : vector<4x2x4x2x32xf32> to vector<4x1x4x1x32xf32>
    %204 = vector.shape_cast %203 : vector<4x1x4x1x32xf32> to vector<4x4x32xf32>
    %c0_181 = arith.constant 0 : index
    %c0_182 = arith.constant 0 : index
    %c1_183 = arith.constant 1 : index
    %c1_184 = arith.constant 1 : index
    %c0_185 = arith.constant 0 : index
    %205 = vector.load %arg15[%c0_181, %c0_182, %c1_183, %c1_184, %c0_185] : memref<2x2x5x5x32xf32, #tpu.memory_space<vmem>>, vector<1x1x4x4x32xf32>
    %206 = vector.shape_cast %205 : vector<1x1x4x4x32xf32> to vector<4x4x32xf32>
    %207 = vector.shape_cast %204 : vector<4x4x32xf32> to vector<1x1x4x4x32xf32>
    tpu.vector_store %arg15[%c0_181, %c0_182, %c1_183, %c1_184, %c0_185], %207 {strides = array<i32>} : memref<2x2x5x5x32xf32, #tpu.memory_space<vmem>>, vector<1x1x4x4x32xf32>,
    %c0_186 = arith.constant 0 : index
    %c0_187 = arith.constant 0 : index
    %208 = vector.load %arg4[%c0_186, %c0_187] : memref<9x32xf32, #tpu.memory_space<vmem>>, vector<9x32xf32>
    %cst_188 = arith.constant 0.000000e+00 : f32
    %209 = vector.broadcast %cst_188 : f32 to vector<4x4x32xf32>
    %c0_189 = arith.constant 0 : index
    %c0_190 = arith.constant 0 : index
    %c0_191 = arith.constant 0 : index
    %c0_192 = arith.constant 0 : index
    %c0_193 = arith.constant 0 : index
    %210 = vector.load %arg15[%c0_189, %c0_190, %c0_191, %c0_192, %c0_193] : memref<2x2x5x5x32xf32, #tpu.memory_space<vmem>>, vector<1x1x4x4x32xf32>
    %211 = vector.shape_cast %210 : vector<1x1x4x4x32xf32> to vector<4x4x32xf32>
    %212 = vector.extract_strided_slice %208 {offsets = [0, 0], sizes = [1, 32], strides = [1, 1]} : vector<9x32xf32> to vector<1x32xf32>
    %213 = vector.shape_cast %212 : vector<1x32xf32> to vector<1x1x32xf32>
    %214 = vector.broadcast %213 : vector<1x1x32xf32> to vector<4x4x32xf32>
    %215 = arith.mulf %211, %214 : vector<4x4x32xf32>
    %216 = arith.addf %209, %215 : vector<4x4x32xf32>
    %c0_194 = arith.constant 0 : index
    %c1_195 = arith.constant 1 : index
    %c0_196 = arith.constant 0 : index
    %c0_197 = arith.constant 0 : index
    %c0_198 = arith.constant 0 : index
    %217 = vector.load %arg15[%c0_194, %c1_195, %c0_196, %c0_197, %c0_198] : memref<2x2x5x5x32xf32, #tpu.memory_space<vmem>>, vector<1x1x4x4x32xf32>
    %218 = vector.shape_cast %217 : vector<1x1x4x4x32xf32> to vector<4x4x32xf32>
    %219 = vector.extract_strided_slice %208 {offsets = [1, 0], sizes = [1, 32], strides = [1, 1]} : vector<9x32xf32> to vector<1x32xf32>
    %220 = vector.shape_cast %219 : vector<1x32xf32> to vector<1x1x32xf32>
    %221 = vector.broadcast %220 : vector<1x1x32xf32> to vector<4x4x32xf32>
    %222 = arith.mulf %218, %221 : vector<4x4x32xf32>
    %223 = arith.addf %216, %222 : vector<4x4x32xf32>
    %c0_199 = arith.constant 0 : index
    %c0_200 = arith.constant 0 : index
    %c0_201 = arith.constant 0 : index
    %c1_202 = arith.constant 1 : index
    %c0_203 = arith.constant 0 : index
    %224 = vector.load %arg15[%c0_199, %c0_200, %c0_201, %c1_202, %c0_203] : memref<2x2x5x5x32xf32, #tpu.memory_space<vmem>>, vector<1x1x4x4x32xf32>
    %225 = vector.shape_cast %224 : vector<1x1x4x4x32xf32> to vector<4x4x32xf32>
    %226 = vector.extract_strided_slice %208 {offsets = [2, 0], sizes = [1, 32], strides = [1, 1]} : vector<9x32xf32> to vector<1x32xf32>
    %227 = vector.shape_cast %226 : vector<1x32xf32> to vector<1x1x32xf32>
    %228 = vector.broadcast %227 : vector<1x1x32xf32> to vector<4x4x32xf32>
    %229 = arith.mulf %225, %228 : vector<4x4x32xf32>
    %230 = arith.addf %223, %229 : vector<4x4x32xf32>
    %c1_204 = arith.constant 1 : index
    %c0_205 = arith.constant 0 : index
    %c0_206 = arith.constant 0 : index
    %c0_207 = arith.constant 0 : index
    %c0_208 = arith.constant 0 : index
    %231 = vector.load %arg15[%c1_204, %c0_205, %c0_206, %c0_207, %c0_208] : memref<2x2x5x5x32xf32, #tpu.memory_space<vmem>>, vector<1x1x4x4x32xf32>
    %232 = vector.shape_cast %231 : vector<1x1x4x4x32xf32> to vector<4x4x32xf32>
    %233 = vector.extract_strided_slice %208 {offsets = [3, 0], sizes = [1, 32], strides = [1, 1]} : vector<9x32xf32> to vector<1x32xf32>
    %234 = vector.shape_cast %233 : vector<1x32xf32> to vector<1x1x32xf32>
    %235 = vector.broadcast %234 : vector<1x1x32xf32> to vector<4x4x32xf32>
    %236 = arith.mulf %232, %235 : vector<4x4x32xf32>
    %237 = arith.addf %230, %236 : vector<4x4x32xf32>
    %c1_209 = arith.constant 1 : index
    %c1_210 = arith.constant 1 : index
    %c0_211 = arith.constant 0 : index
    %c0_212 = arith.constant 0 : index
    %c0_213 = arith.constant 0 : index
    %238 = vector.load %arg15[%c1_209, %c1_210, %c0_211, %c0_212, %c0_213] : memref<2x2x5x5x32xf32, #tpu.memory_space<vmem>>, vector<1x1x4x4x32xf32>
    %239 = vector.shape_cast %238 : vector<1x1x4x4x32xf32> to vector<4x4x32xf32>
    %240 = vector.extract_strided_slice %208 {offsets = [4, 0], sizes = [1, 32], strides = [1, 1]} : vector<9x32xf32> to vector<1x32xf32>
    %241 = vector.shape_cast %240 : vector<1x32xf32> to vector<1x1x32xf32>
    %242 = vector.broadcast %241 : vector<1x1x32xf32> to vector<4x4x32xf32>
    %243 = arith.mulf %239, %242 : vector<4x4x32xf32>
    %244 = arith.addf %237, %243 : vector<4x4x32xf32>
    %c1_214 = arith.constant 1 : index
    %c0_215 = arith.constant 0 : index
    %c0_216 = arith.constant 0 : index
    %c1_217 = arith.constant 1 : index
    %c0_218 = arith.constant 0 : index
    %245 = vector.load %arg15[%c1_214, %c0_215, %c0_216, %c1_217, %c0_218] : memref<2x2x5x5x32xf32, #tpu.memory_space<vmem>>, vector<1x1x4x4x32xf32>
    %246 = vector.shape_cast %245 : vector<1x1x4x4x32xf32> to vector<4x4x32xf32>
    %247 = vector.extract_strided_slice %208 {offsets = [5, 0], sizes = [1, 32], strides = [1, 1]} : vector<9x32xf32> to vector<1x32xf32>
    %248 = vector.shape_cast %247 : vector<1x32xf32> to vector<1x1x32xf32>
    %249 = vector.broadcast %248 : vector<1x1x32xf32> to vector<4x4x32xf32>
    %250 = arith.mulf %246, %249 : vector<4x4x32xf32>
    %251 = arith.addf %244, %250 : vector<4x4x32xf32>
    %c0_219 = arith.constant 0 : index
    %c0_220 = arith.constant 0 : index
    %c1_221 = arith.constant 1 : index
    %c0_222 = arith.constant 0 : index
    %c0_223 = arith.constant 0 : index
    %252 = vector.load %arg15[%c0_219, %c0_220, %c1_221, %c0_222, %c0_223] : memref<2x2x5x5x32xf32, #tpu.memory_space<vmem>>, vector<1x1x4x4x32xf32>
    %253 = vector.shape_cast %252 : vector<1x1x4x4x32xf32> to vector<4x4x32xf32>
    %254 = vector.extract_strided_slice %208 {offsets = [6, 0], sizes = [1, 32], strides = [1, 1]} : vector<9x32xf32> to vector<1x32xf32>
    %255 = vector.shape_cast %254 : vector<1x32xf32> to vector<1x1x32xf32>
    %256 = vector.broadcast %255 : vector<1x1x32xf32> to vector<4x4x32xf32>
    %257 = arith.mulf %253, %256 : vector<4x4x32xf32>
    %258 = arith.addf %251, %257 : vector<4x4x32xf32>
    %c0_224 = arith.constant 0 : index
    %c1_225 = arith.constant 1 : index
    %c1_226 = arith.constant 1 : index
    %c0_227 = arith.constant 0 : index
    %c0_228 = arith.constant 0 : index
    %259 = vector.load %arg15[%c0_224, %c1_225, %c1_226, %c0_227, %c0_228] : memref<2x2x5x5x32xf32, #tpu.memory_space<vmem>>, vector<1x1x4x4x32xf32>
    %260 = vector.shape_cast %259 : vector<1x1x4x4x32xf32> to vector<4x4x32xf32>
    %261 = vector.extract_strided_slice %208 {offsets = [7, 0], sizes = [1, 32], strides = [1, 1]} : vector<9x32xf32> to vector<1x32xf32>
    %262 = vector.shape_cast %261 : vector<1x32xf32> to vector<1x1x32xf32>
    %263 = vector.broadcast %262 : vector<1x1x32xf32> to vector<4x4x32xf32>
    %264 = arith.mulf %260, %263 : vector<4x4x32xf32>
    %265 = arith.addf %258, %264 : vector<4x4x32xf32>
    %c0_229 = arith.constant 0 : index
    %c0_230 = arith.constant 0 : index
    %c1_231 = arith.constant 1 : index
    %c1_232 = arith.constant 1 : index
    %c0_233 = arith.constant 0 : index
    %266 = vector.load %arg15[%c0_229, %c0_230, %c1_231, %c1_232, %c0_233] : memref<2x2x5x5x32xf32, #tpu.memory_space<vmem>>, vector<1x1x4x4x32xf32>
    %267 = vector.shape_cast %266 : vector<1x1x4x4x32xf32> to vector<4x4x32xf32>
    %268 = vector.extract_strided_slice %208 {offsets = [8, 0], sizes = [1, 32], strides = [1, 1]} : vector<9x32xf32> to vector<1x32xf32>
    %269 = vector.shape_cast %268 : vector<1x32xf32> to vector<1x1x32xf32>
    %270 = vector.broadcast %269 : vector<1x1x32xf32> to vector<4x4x32xf32>
    %271 = arith.mulf %267, %270 : vector<4x4x32xf32>
    %272 = arith.addf %265, %271 : vector<4x4x32xf32>
    %cst_234 = arith.constant 0.000000e+00 : f32
    %cst_235 = arith.constant 6.000000e+00 : f32
    %273 = vector.broadcast %cst_234 : f32 to vector<4x4x32xf32>
    %274 = arith.maximumf %273, %272 : vector<4x4x32xf32>
    %275 = vector.broadcast %cst_235 : f32 to vector<4x4x32xf32>
    %276 = arith.minimumf %275, %274 : vector<4x4x32xf32>
    %277 = vector.shape_cast %276 : vector<4x4x32xf32> to vector<16x32xf32>
    %278 = arith.truncf %277 : vector<16x32xf32> to vector<16x32xbf16>
    %c0_236 = arith.constant 0 : index
    %c0_237 = arith.constant 0 : index
    %279 = vector.load %arg5[%c0_236, %c0_237] : memref<32x64xbf16, #tpu.memory_space<vmem>>, vector<32x64xbf16>
    %cst_238 = arith.constant dense<0.000000e+00> : vector<16x64xf32>
    %280 = tpu.matmul %278, %279, %cst_238 {dimension_numbers = #tpu.dot_dimension_numbers<[1], [0], [0], [1], [0, 0, 1, 1], [], []>} : vector<16x32xbf16>, vector<32x64xbf16>, vector<16x64xf32> -> vector<16x64xf32>
    %cst_239 = arith.constant 0.000000e+00 : f32
    %cst_240 = arith.constant 6.000000e+00 : f32
    %281 = vector.broadcast %cst_239 : f32 to vector<16x64xf32>
    %282 = arith.maximumf %281, %280 : vector<16x64xf32>
    %283 = vector.broadcast %cst_240 : f32 to vector<16x64xf32>
    %284 = arith.minimumf %283, %282 : vector<16x64xf32>
    %285 = vector.shape_cast %284 : vector<16x64xf32> to vector<8x2x64xf32>
    %286 = vector.extract_strided_slice %285 {offsets = [0, 0, 0], sizes = [8, 1, 64], strides = [1, 1, 1]} : vector<8x2x64xf32> to vector<8x1x64xf32>
    %287 = vector.shape_cast %286 : vector<8x1x64xf32> to vector<8x64xf32>
    %288 = vector.extract_strided_slice %285 {offsets = [0, 1, 0], sizes = [8, 1, 64], strides = [1, 1, 1]} : vector<8x2x64xf32> to vector<8x1x64xf32>
    %289 = vector.shape_cast %288 : vector<8x1x64xf32> to vector<8x64xf32>
    %290 = tpu.concatenate %287, %289 in 1 : vector<8x64xf32>, vector<8x64xf32> -> vector<8x128xf32>
    %c0_241 = arith.constant 0 : index
    %c0_242 = arith.constant 0 : index
    %c0_243 = arith.constant 0 : index
    %291 = vector.load %arg11[%c0_241, %c0_242, %c0_243] : memref<1x8x128xf32, #tpu.memory_space<vmem>>, vector<1x8x128xf32>
    %292 = vector.shape_cast %291 : vector<1x8x128xf32> to vector<8x128xf32>
    %293 = vector.shape_cast %290 : vector<8x128xf32> to vector<1x8x128xf32>
    tpu.vector_store %arg11[%c0_241, %c0_242, %c0_243], %293 {strides = array<i32>} : memref<1x8x128xf32, #tpu.memory_space<vmem>>, vector<1x8x128xf32>,
    %294 = vector.shape_cast %284 : vector<16x64xf32> to vector<4x4x64xf32>
    %295 = vector.shape_cast %294 : vector<4x4x64xf32> to vector<2x2x2x2x64xf32>
    %296 = vector.extract_strided_slice %295 {offsets = [0, 0, 0, 0, 0], sizes = [2, 1, 2, 1, 64], strides = [1, 1, 1, 1, 1]} : vector<2x2x2x2x64xf32> to vector<2x1x2x1x64xf32>
    %297 = vector.shape_cast %296 : vector<2x1x2x1x64xf32> to vector<2x2x64xf32>
    %c1_244 = arith.constant 1 : index
    %c1_245 = arith.constant 1 : index
    %c0_246 = arith.constant 0 : index
    %c0_247 = arith.constant 0 : index
    %c0_248 = arith.constant 0 : index
    %298 = vector.load %arg16[%c1_244, %c1_245, %c0_246, %c0_247, %c0_248] : memref<2x2x3x3x64xf32, #tpu.memory_space<vmem>>, vector<1x1x2x2x64xf32>
    %299 = vector.shape_cast %298 : vector<1x1x2x2x64xf32> to vector<2x2x64xf32>
    %300 = vector.shape_cast %297 : vector<2x2x64xf32> to vector<1x1x2x2x64xf32>
    tpu.vector_store %arg16[%c1_244, %c1_245, %c0_246, %c0_247, %c0_248], %300 {strides = array<i32>} : memref<2x2x3x3x64xf32, #tpu.memory_space<vmem>>, vector<1x1x2x2x64xf32>,
    %301 = vector.extract_strided_slice %295 {offsets = [0, 0, 0, 1, 0], sizes = [2, 1, 2, 1, 64], strides = [1, 1, 1, 1, 1]} : vector<2x2x2x2x64xf32> to vector<2x1x2x1x64xf32>
    %302 = vector.shape_cast %301 : vector<2x1x2x1x64xf32> to vector<2x2x64xf32>
    %c1_249 = arith.constant 1 : index
    %c0_250 = arith.constant 0 : index
    %c0_251 = arith.constant 0 : index
    %c1_252 = arith.constant 1 : index
    %c0_253 = arith.constant 0 : index
    %303 = vector.load %arg16[%c1_249, %c0_250, %c0_251, %c1_252, %c0_253] : memref<2x2x3x3x64xf32, #tpu.memory_space<vmem>>, vector<1x1x2x2x64xf32>
    %304 = vector.shape_cast %303 : vector<1x1x2x2x64xf32> to vector<2x2x64xf32>
    %305 = vector.shape_cast %302 : vector<2x2x64xf32> to vector<1x1x2x2x64xf32>
    tpu.vector_store %arg16[%c1_249, %c0_250, %c0_251, %c1_252, %c0_253], %305 {strides = array<i32>} : memref<2x2x3x3x64xf32, #tpu.memory_space<vmem>>, vector<1x1x2x2x64xf32>,
    %306 = vector.extract_strided_slice %295 {offsets = [0, 1, 0, 0, 0], sizes = [2, 1, 2, 1, 64], strides = [1, 1, 1, 1, 1]} : vector<2x2x2x2x64xf32> to vector<2x1x2x1x64xf32>
    %307 = vector.shape_cast %306 : vector<2x1x2x1x64xf32> to vector<2x2x64xf32>
    %c0_254 = arith.constant 0 : index
    %c1_255 = arith.constant 1 : index
    %c1_256 = arith.constant 1 : index
    %c0_257 = arith.constant 0 : index
    %c0_258 = arith.constant 0 : index
    %308 = vector.load %arg16[%c0_254, %c1_255, %c1_256, %c0_257, %c0_258] : memref<2x2x3x3x64xf32, #tpu.memory_space<vmem>>, vector<1x1x2x2x64xf32>
    %309 = vector.shape_cast %308 : vector<1x1x2x2x64xf32> to vector<2x2x64xf32>
    %310 = vector.shape_cast %307 : vector<2x2x64xf32> to vector<1x1x2x2x64xf32>
    tpu.vector_store %arg16[%c0_254, %c1_255, %c1_256, %c0_257, %c0_258], %310 {strides = array<i32>} : memref<2x2x3x3x64xf32, #tpu.memory_space<vmem>>, vector<1x1x2x2x64xf32>,
    %311 = vector.extract_strided_slice %295 {offsets = [0, 1, 0, 1, 0], sizes = [2, 1, 2, 1, 64], strides = [1, 1, 1, 1, 1]} : vector<2x2x2x2x64xf32> to vector<2x1x2x1x64xf32>
    %312 = vector.shape_cast %311 : vector<2x1x2x1x64xf32> to vector<2x2x64xf32>
    %c0_259 = arith.constant 0 : index
    %c0_260 = arith.constant 0 : index
    %c1_261 = arith.constant 1 : index
    %c1_262 = arith.constant 1 : index
    %c0_263 = arith.constant 0 : index
    %313 = vector.load %arg16[%c0_259, %c0_260, %c1_261, %c1_262, %c0_263] : memref<2x2x3x3x64xf32, #tpu.memory_space<vmem>>, vector<1x1x2x2x64xf32>
    %314 = vector.shape_cast %313 : vector<1x1x2x2x64xf32> to vector<2x2x64xf32>
    %315 = vector.shape_cast %312 : vector<2x2x64xf32> to vector<1x1x2x2x64xf32>
    tpu.vector_store %arg16[%c0_259, %c0_260, %c1_261, %c1_262, %c0_263], %315 {strides = array<i32>} : memref<2x2x3x3x64xf32, #tpu.memory_space<vmem>>, vector<1x1x2x2x64xf32>,
    %c0_264 = arith.constant 0 : index
    %c0_265 = arith.constant 0 : index
    %316 = vector.load %arg6[%c0_264, %c0_265] : memref<9x64xf32, #tpu.memory_space<vmem>>, vector<9x64xf32>
    %cst_266 = arith.constant 0.000000e+00 : f32
    %317 = vector.broadcast %cst_266 : f32 to vector<2x2x64xf32>
    %c0_267 = arith.constant 0 : index
    %c0_268 = arith.constant 0 : index
    %c0_269 = arith.constant 0 : index
    %c0_270 = arith.constant 0 : index
    %c0_271 = arith.constant 0 : index
    %318 = vector.load %arg16[%c0_267, %c0_268, %c0_269, %c0_270, %c0_271] : memref<2x2x3x3x64xf32, #tpu.memory_space<vmem>>, vector<1x1x2x2x64xf32>
    %319 = vector.shape_cast %318 : vector<1x1x2x2x64xf32> to vector<2x2x64xf32>
    %320 = vector.extract_strided_slice %316 {offsets = [0, 0], sizes = [1, 64], strides = [1, 1]} : vector<9x64xf32> to vector<1x64xf32>
    %321 = vector.shape_cast %320 : vector<1x64xf32> to vector<1x1x64xf32>
    %322 = vector.broadcast %321 : vector<1x1x64xf32> to vector<2x2x64xf32>
    %323 = arith.mulf %319, %322 : vector<2x2x64xf32>
    %324 = arith.addf %317, %323 : vector<2x2x64xf32>
    %c0_272 = arith.constant 0 : index
    %c1_273 = arith.constant 1 : index
    %c0_274 = arith.constant 0 : index
    %c0_275 = arith.constant 0 : index
    %c0_276 = arith.constant 0 : index
    %325 = vector.load %arg16[%c0_272, %c1_273, %c0_274, %c0_275, %c0_276] : memref<2x2x3x3x64xf32, #tpu.memory_space<vmem>>, vector<1x1x2x2x64xf32>
    %326 = vector.shape_cast %325 : vector<1x1x2x2x64xf32> to vector<2x2x64xf32>
    %327 = vector.extract_strided_slice %316 {offsets = [1, 0], sizes = [1, 64], strides = [1, 1]} : vector<9x64xf32> to vector<1x64xf32>
    %328 = vector.shape_cast %327 : vector<1x64xf32> to vector<1x1x64xf32>
    %329 = vector.broadcast %328 : vector<1x1x64xf32> to vector<2x2x64xf32>
    %330 = arith.mulf %326, %329 : vector<2x2x64xf32>
    %331 = arith.addf %324, %330 : vector<2x2x64xf32>
    %c0_277 = arith.constant 0 : index
    %c0_278 = arith.constant 0 : index
    %c0_279 = arith.constant 0 : index
    %c1_280 = arith.constant 1 : index
    %c0_281 = arith.constant 0 : index
    %332 = vector.load %arg16[%c0_277, %c0_278, %c0_279, %c1_280, %c0_281] : memref<2x2x3x3x64xf32, #tpu.memory_space<vmem>>, vector<1x1x2x2x64xf32>
    %333 = vector.shape_cast %332 : vector<1x1x2x2x64xf32> to vector<2x2x64xf32>
    %334 = vector.extract_strided_slice %316 {offsets = [2, 0], sizes = [1, 64], strides = [1, 1]} : vector<9x64xf32> to vector<1x64xf32>
    %335 = vector.shape_cast %334 : vector<1x64xf32> to vector<1x1x64xf32>
    %336 = vector.broadcast %335 : vector<1x1x64xf32> to vector<2x2x64xf32>
    %337 = arith.mulf %333, %336 : vector<2x2x64xf32>
    %338 = arith.addf %331, %337 : vector<2x2x64xf32>
    %c1_282 = arith.constant 1 : index
    %c0_283 = arith.constant 0 : index
    %c0_284 = arith.constant 0 : index
    %c0_285 = arith.constant 0 : index
    %c0_286 = arith.constant 0 : index
    %339 = vector.load %arg16[%c1_282, %c0_283, %c0_284, %c0_285, %c0_286] : memref<2x2x3x3x64xf32, #tpu.memory_space<vmem>>, vector<1x1x2x2x64xf32>
    %340 = vector.shape_cast %339 : vector<1x1x2x2x64xf32> to vector<2x2x64xf32>
    %341 = vector.extract_strided_slice %316 {offsets = [3, 0], sizes = [1, 64], strides = [1, 1]} : vector<9x64xf32> to vector<1x64xf32>
    %342 = vector.shape_cast %341 : vector<1x64xf32> to vector<1x1x64xf32>
    %343 = vector.broadcast %342 : vector<1x1x64xf32> to vector<2x2x64xf32>
    %344 = arith.mulf %340, %343 : vector<2x2x64xf32>
    %345 = arith.addf %338, %344 : vector<2x2x64xf32>
    %c1_287 = arith.constant 1 : index
    %c1_288 = arith.constant 1 : index
    %c0_289 = arith.constant 0 : index
    %c0_290 = arith.constant 0 : index
    %c0_291 = arith.constant 0 : index
    %346 = vector.load %arg16[%c1_287, %c1_288, %c0_289, %c0_290, %c0_291] : memref<2x2x3x3x64xf32, #tpu.memory_space<vmem>>, vector<1x1x2x2x64xf32>
    %347 = vector.shape_cast %346 : vector<1x1x2x2x64xf32> to vector<2x2x64xf32>
    %348 = vector.extract_strided_slice %316 {offsets = [4, 0], sizes = [1, 64], strides = [1, 1]} : vector<9x64xf32> to vector<1x64xf32>
    %349 = vector.shape_cast %348 : vector<1x64xf32> to vector<1x1x64xf32>
    %350 = vector.broadcast %349 : vector<1x1x64xf32> to vector<2x2x64xf32>
    %351 = arith.mulf %347, %350 : vector<2x2x64xf32>
    %352 = arith.addf %345, %351 : vector<2x2x64xf32>
    %c1_292 = arith.constant 1 : index
    %c0_293 = arith.constant 0 : index
    %c0_294 = arith.constant 0 : index
    %c1_295 = arith.constant 1 : index
    %c0_296 = arith.constant 0 : index
    %353 = vector.load %arg16[%c1_292, %c0_293, %c0_294, %c1_295, %c0_296] : memref<2x2x3x3x64xf32, #tpu.memory_space<vmem>>, vector<1x1x2x2x64xf32>
    %354 = vector.shape_cast %353 : vector<1x1x2x2x64xf32> to vector<2x2x64xf32>
    %355 = vector.extract_strided_slice %316 {offsets = [5, 0], sizes = [1, 64], strides = [1, 1]} : vector<9x64xf32> to vector<1x64xf32>
    %356 = vector.shape_cast %355 : vector<1x64xf32> to vector<1x1x64xf32>
    %357 = vector.broadcast %356 : vector<1x1x64xf32> to vector<2x2x64xf32>
    %358 = arith.mulf %354, %357 : vector<2x2x64xf32>
    %359 = arith.addf %352, %358 : vector<2x2x64xf32>
    %c0_297 = arith.constant 0 : index
    %c0_298 = arith.constant 0 : index
    %c1_299 = arith.constant 1 : index
    %c0_300 = arith.constant 0 : index
    %c0_301 = arith.constant 0 : index
    %360 = vector.load %arg16[%c0_297, %c0_298, %c1_299, %c0_300, %c0_301] : memref<2x2x3x3x64xf32, #tpu.memory_space<vmem>>, vector<1x1x2x2x64xf32>
    %361 = vector.shape_cast %360 : vector<1x1x2x2x64xf32> to vector<2x2x64xf32>
    %362 = vector.extract_strided_slice %316 {offsets = [6, 0], sizes = [1, 64], strides = [1, 1]} : vector<9x64xf32> to vector<1x64xf32>
    %363 = vector.shape_cast %362 : vector<1x64xf32> to vector<1x1x64xf32>
    %364 = vector.broadcast %363 : vector<1x1x64xf32> to vector<2x2x64xf32>
    %365 = arith.mulf %361, %364 : vector<2x2x64xf32>
    %366 = arith.addf %359, %365 : vector<2x2x64xf32>
    %c0_302 = arith.constant 0 : index
    %c1_303 = arith.constant 1 : index
    %c1_304 = arith.constant 1 : index
    %c0_305 = arith.constant 0 : index
    %c0_306 = arith.constant 0 : index
    %367 = vector.load %arg16[%c0_302, %c1_303, %c1_304, %c0_305, %c0_306] : memref<2x2x3x3x64xf32, #tpu.memory_space<vmem>>, vector<1x1x2x2x64xf32>
    %368 = vector.shape_cast %367 : vector<1x1x2x2x64xf32> to vector<2x2x64xf32>
    %369 = vector.extract_strided_slice %316 {offsets = [7, 0], sizes = [1, 64], strides = [1, 1]} : vector<9x64xf32> to vector<1x64xf32>
    %370 = vector.shape_cast %369 : vector<1x64xf32> to vector<1x1x64xf32>
    %371 = vector.broadcast %370 : vector<1x1x64xf32> to vector<2x2x64xf32>
    %372 = arith.mulf %368, %371 : vector<2x2x64xf32>
    %373 = arith.addf %366, %372 : vector<2x2x64xf32>
    %c0_307 = arith.constant 0 : index
    %c0_308 = arith.constant 0 : index
    %c1_309 = arith.constant 1 : index
    %c1_310 = arith.constant 1 : index
    %c0_311 = arith.constant 0 : index
    %374 = vector.load %arg16[%c0_307, %c0_308, %c1_309, %c1_310, %c0_311] : memref<2x2x3x3x64xf32, #tpu.memory_space<vmem>>, vector<1x1x2x2x64xf32>
    %375 = vector.shape_cast %374 : vector<1x1x2x2x64xf32> to vector<2x2x64xf32>
    %376 = vector.extract_strided_slice %316 {offsets = [8, 0], sizes = [1, 64], strides = [1, 1]} : vector<9x64xf32> to vector<1x64xf32>
    %377 = vector.shape_cast %376 : vector<1x64xf32> to vector<1x1x64xf32>
    %378 = vector.broadcast %377 : vector<1x1x64xf32> to vector<2x2x64xf32>
    %379 = arith.mulf %375, %378 : vector<2x2x64xf32>
    %380 = arith.addf %373, %379 : vector<2x2x64xf32>
    %cst_312 = arith.constant 0.000000e+00 : f32
    %cst_313 = arith.constant 6.000000e+00 : f32
    %381 = vector.broadcast %cst_312 : f32 to vector<2x2x64xf32>
    %382 = arith.maximumf %381, %380 : vector<2x2x64xf32>
    %383 = vector.broadcast %cst_313 : f32 to vector<2x2x64xf32>
    %384 = arith.minimumf %383, %382 : vector<2x2x64xf32>
    %385 = vector.shape_cast %384 : vector<2x2x64xf32> to vector<4x64xf32>
    %386 = arith.truncf %385 : vector<4x64xf32> to vector<4x64xbf16>
    %c0_314 = arith.constant 0 : index
    %c0_315 = arith.constant 0 : index
    %387 = vector.load %arg7[%c0_314, %c0_315] : memref<64x128xbf16, #tpu.memory_space<vmem>>, vector<64x128xbf16>
    %cst_316 = arith.constant dense<0.000000e+00> : vector<4x128xf32>
    %388 = tpu.matmul %386, %387, %cst_316 {dimension_numbers = #tpu.dot_dimension_numbers<[1], [0], [0], [1], [0, 0, 1, 1], [], []>} : vector<4x64xbf16>, vector<64x128xbf16>, vector<4x128xf32> -> vector<4x128xf32>
    %cst_317 = arith.constant 0.000000e+00 : f32
    %cst_318 = arith.constant 6.000000e+00 : f32
    %389 = vector.broadcast %cst_317 : f32 to vector<4x128xf32>
    %390 = arith.maximumf %389, %388 : vector<4x128xf32>
    %391 = vector.broadcast %cst_318 : f32 to vector<4x128xf32>
    %392 = arith.minimumf %391, %390 : vector<4x128xf32>
    %c0_319 = arith.constant 0 : index
    %c0_320 = arith.constant 0 : index
    %c0_321 = arith.constant 0 : index
    %393 = vector.load %arg12[%c0_319, %c0_320, %c0_321] : memref<1x4x128xf32, #tpu.memory_space<vmem>>, vector<1x4x128xf32>
    %394 = vector.shape_cast %393 : vector<1x4x128xf32> to vector<4x128xf32>
    %395 = vector.shape_cast %392 : vector<4x128xf32> to vector<1x4x128xf32>
    tpu.vector_store %arg12[%c0_319, %c0_320, %c0_321], %395 {strides = array<i32>} : memref<1x4x128xf32, #tpu.memory_space<vmem>>, vector<1x4x128xf32>,
    %396 = vector.shape_cast %392 : vector<4x128xf32> to vector<2x2x128xf32>
    %397 = vector.shape_cast %396 : vector<2x2x128xf32> to vector<1x2x1x2x128xf32>
    %398 = vector.extract_strided_slice %397 {offsets = [0, 0, 0, 0, 0], sizes = [1, 1, 1, 1, 128], strides = [1, 1, 1, 1, 1]} : vector<1x2x1x2x128xf32> to vector<1x1x1x1x128xf32>
    %399 = vector.shape_cast %398 : vector<1x1x1x1x128xf32> to vector<1x1x128xf32>
    %c1_322 = arith.constant 1 : index
    %c1_323 = arith.constant 1 : index
    %c0_324 = arith.constant 0 : index
    %c0_325 = arith.constant 0 : index
    %c0_326 = arith.constant 0 : index
    %400 = vector.load %arg17[%c1_322, %c1_323, %c0_324, %c0_325, %c0_326] : memref<2x2x2x2x128xf32, #tpu.memory_space<vmem>>, vector<1x1x1x1x128xf32>
    %401 = vector.shape_cast %400 : vector<1x1x1x1x128xf32> to vector<1x1x128xf32>
    %402 = vector.shape_cast %399 : vector<1x1x128xf32> to vector<1x1x1x1x128xf32>
    tpu.vector_store %arg17[%c1_322, %c1_323, %c0_324, %c0_325, %c0_326], %402 {strides = array<i32>} : memref<2x2x2x2x128xf32, #tpu.memory_space<vmem>>, vector<1x1x1x1x128xf32>,
    %403 = vector.extract_strided_slice %397 {offsets = [0, 0, 0, 1, 0], sizes = [1, 1, 1, 1, 128], strides = [1, 1, 1, 1, 1]} : vector<1x2x1x2x128xf32> to vector<1x1x1x1x128xf32>
    %404 = vector.shape_cast %403 : vector<1x1x1x1x128xf32> to vector<1x1x128xf32>
    %c1_327 = arith.constant 1 : index
    %c0_328 = arith.constant 0 : index
    %c0_329 = arith.constant 0 : index
    %c1_330 = arith.constant 1 : index
    %c0_331 = arith.constant 0 : index
    %405 = vector.load %arg17[%c1_327, %c0_328, %c0_329, %c1_330, %c0_331] : memref<2x2x2x2x128xf32, #tpu.memory_space<vmem>>, vector<1x1x1x1x128xf32>
    %406 = vector.shape_cast %405 : vector<1x1x1x1x128xf32> to vector<1x1x128xf32>
    %407 = vector.shape_cast %404 : vector<1x1x128xf32> to vector<1x1x1x1x128xf32>
    tpu.vector_store %arg17[%c1_327, %c0_328, %c0_329, %c1_330, %c0_331], %407 {strides = array<i32>} : memref<2x2x2x2x128xf32, #tpu.memory_space<vmem>>, vector<1x1x1x1x128xf32>,
    %408 = vector.extract_strided_slice %397 {offsets = [0, 1, 0, 0, 0], sizes = [1, 1, 1, 1, 128], strides = [1, 1, 1, 1, 1]} : vector<1x2x1x2x128xf32> to vector<1x1x1x1x128xf32>
    %409 = vector.shape_cast %408 : vector<1x1x1x1x128xf32> to vector<1x1x128xf32>
    %c0_332 = arith.constant 0 : index
    %c1_333 = arith.constant 1 : index
    %c1_334 = arith.constant 1 : index
    %c0_335 = arith.constant 0 : index
    %c0_336 = arith.constant 0 : index
    %410 = vector.load %arg17[%c0_332, %c1_333, %c1_334, %c0_335, %c0_336] : memref<2x2x2x2x128xf32, #tpu.memory_space<vmem>>, vector<1x1x1x1x128xf32>
    %411 = vector.shape_cast %410 : vector<1x1x1x1x128xf32> to vector<1x1x128xf32>
    %412 = vector.shape_cast %409 : vector<1x1x128xf32> to vector<1x1x1x1x128xf32>
    tpu.vector_store %arg17[%c0_332, %c1_333, %c1_334, %c0_335, %c0_336], %412 {strides = array<i32>} : memref<2x2x2x2x128xf32, #tpu.memory_space<vmem>>, vector<1x1x1x1x128xf32>,
    %413 = vector.extract_strided_slice %397 {offsets = [0, 1, 0, 1, 0], sizes = [1, 1, 1, 1, 128], strides = [1, 1, 1, 1, 1]} : vector<1x2x1x2x128xf32> to vector<1x1x1x1x128xf32>
    %414 = vector.shape_cast %413 : vector<1x1x1x1x128xf32> to vector<1x1x128xf32>
    %c0_337 = arith.constant 0 : index
    %c0_338 = arith.constant 0 : index
    %c1_339 = arith.constant 1 : index
    %c1_340 = arith.constant 1 : index
    %c0_341 = arith.constant 0 : index
    %415 = vector.load %arg17[%c0_337, %c0_338, %c1_339, %c1_340, %c0_341] : memref<2x2x2x2x128xf32, #tpu.memory_space<vmem>>, vector<1x1x1x1x128xf32>
    %416 = vector.shape_cast %415 : vector<1x1x1x1x128xf32> to vector<1x1x128xf32>
    %417 = vector.shape_cast %414 : vector<1x1x128xf32> to vector<1x1x1x1x128xf32>
    tpu.vector_store %arg17[%c0_337, %c0_338, %c1_339, %c1_340, %c0_341], %417 {strides = array<i32>} : memref<2x2x2x2x128xf32, #tpu.memory_space<vmem>>, vector<1x1x1x1x128xf32>,
    %c0_342 = arith.constant 0 : index
    %c0_343 = arith.constant 0 : index
    %418 = vector.load %arg8[%c0_342, %c0_343] : memref<9x128xf32, #tpu.memory_space<vmem>>, vector<9x128xf32>
    %cst_344 = arith.constant 0.000000e+00 : f32
    %419 = vector.broadcast %cst_344 : f32 to vector<1x1x128xf32>
    %c0_345 = arith.constant 0 : index
    %c0_346 = arith.constant 0 : index
    %c0_347 = arith.constant 0 : index
    %c0_348 = arith.constant 0 : index
    %c0_349 = arith.constant 0 : index
    %420 = vector.load %arg17[%c0_345, %c0_346, %c0_347, %c0_348, %c0_349] : memref<2x2x2x2x128xf32, #tpu.memory_space<vmem>>, vector<1x1x1x1x128xf32>
    %421 = vector.shape_cast %420 : vector<1x1x1x1x128xf32> to vector<1x1x128xf32>
    %422 = vector.extract_strided_slice %418 {offsets = [0, 0], sizes = [1, 128], strides = [1, 1]} : vector<9x128xf32> to vector<1x128xf32>
    %423 = vector.shape_cast %422 : vector<1x128xf32> to vector<1x1x128xf32>
    %424 = arith.mulf %421, %423 : vector<1x1x128xf32>
    %425 = arith.addf %419, %424 : vector<1x1x128xf32>
    %c0_350 = arith.constant 0 : index
    %c1_351 = arith.constant 1 : index
    %c0_352 = arith.constant 0 : index
    %c0_353 = arith.constant 0 : index
    %c0_354 = arith.constant 0 : index
    %426 = vector.load %arg17[%c0_350, %c1_351, %c0_352, %c0_353, %c0_354] : memref<2x2x2x2x128xf32, #tpu.memory_space<vmem>>, vector<1x1x1x1x128xf32>
    %427 = vector.shape_cast %426 : vector<1x1x1x1x128xf32> to vector<1x1x128xf32>
    %428 = vector.extract_strided_slice %418 {offsets = [1, 0], sizes = [1, 128], strides = [1, 1]} : vector<9x128xf32> to vector<1x128xf32>
    %429 = vector.shape_cast %428 : vector<1x128xf32> to vector<1x1x128xf32>
    %430 = arith.mulf %427, %429 : vector<1x1x128xf32>
    %431 = arith.addf %425, %430 : vector<1x1x128xf32>
    %c0_355 = arith.constant 0 : index
    %c0_356 = arith.constant 0 : index
    %c0_357 = arith.constant 0 : index
    %c1_358 = arith.constant 1 : index
    %c0_359 = arith.constant 0 : index
    %432 = vector.load %arg17[%c0_355, %c0_356, %c0_357, %c1_358, %c0_359] : memref<2x2x2x2x128xf32, #tpu.memory_space<vmem>>, vector<1x1x1x1x128xf32>
    %433 = vector.shape_cast %432 : vector<1x1x1x1x128xf32> to vector<1x1x128xf32>
    %434 = vector.extract_strided_slice %418 {offsets = [2, 0], sizes = [1, 128], strides = [1, 1]} : vector<9x128xf32> to vector<1x128xf32>
    %435 = vector.shape_cast %434 : vector<1x128xf32> to vector<1x1x128xf32>
    %436 = arith.mulf %433, %435 : vector<1x1x128xf32>
    %437 = arith.addf %431, %436 : vector<1x1x128xf32>
    %c1_360 = arith.constant 1 : index
    %c0_361 = arith.constant 0 : index
    %c0_362 = arith.constant 0 : index
    %c0_363 = arith.constant 0 : index
    %c0_364 = arith.constant 0 : index
    %438 = vector.load %arg17[%c1_360, %c0_361, %c0_362, %c0_363, %c0_364] : memref<2x2x2x2x128xf32, #tpu.memory_space<vmem>>, vector<1x1x1x1x128xf32>
    %439 = vector.shape_cast %438 : vector<1x1x1x1x128xf32> to vector<1x1x128xf32>
    %440 = vector.extract_strided_slice %418 {offsets = [3, 0], sizes = [1, 128], strides = [1, 1]} : vector<9x128xf32> to vector<1x128xf32>
    %441 = vector.shape_cast %440 : vector<1x128xf32> to vector<1x1x128xf32>
    %442 = arith.mulf %439, %441 : vector<1x1x128xf32>
    %443 = arith.addf %437, %442 : vector<1x1x128xf32>
    %c1_365 = arith.constant 1 : index
    %c1_366 = arith.constant 1 : index
    %c0_367 = arith.constant 0 : index
    %c0_368 = arith.constant 0 : index
    %c0_369 = arith.constant 0 : index
    %444 = vector.load %arg17[%c1_365, %c1_366, %c0_367, %c0_368, %c0_369] : memref<2x2x2x2x128xf32, #tpu.memory_space<vmem>>, vector<1x1x1x1x128xf32>
    %445 = vector.shape_cast %444 : vector<1x1x1x1x128xf32> to vector<1x1x128xf32>
    %446 = vector.extract_strided_slice %418 {offsets = [4, 0], sizes = [1, 128], strides = [1, 1]} : vector<9x128xf32> to vector<1x128xf32>
    %447 = vector.shape_cast %446 : vector<1x128xf32> to vector<1x1x128xf32>
    %448 = arith.mulf %445, %447 : vector<1x1x128xf32>
    %449 = arith.addf %443, %448 : vector<1x1x128xf32>
    %c1_370 = arith.constant 1 : index
    %c0_371 = arith.constant 0 : index
    %c0_372 = arith.constant 0 : index
    %c1_373 = arith.constant 1 : index
    %c0_374 = arith.constant 0 : index
    %450 = vector.load %arg17[%c1_370, %c0_371, %c0_372, %c1_373, %c0_374] : memref<2x2x2x2x128xf32, #tpu.memory_space<vmem>>, vector<1x1x1x1x128xf32>
    %451 = vector.shape_cast %450 : vector<1x1x1x1x128xf32> to vector<1x1x128xf32>
    %452 = vector.extract_strided_slice %418 {offsets = [5, 0], sizes = [1, 128], strides = [1, 1]} : vector<9x128xf32> to vector<1x128xf32>
    %453 = vector.shape_cast %452 : vector<1x128xf32> to vector<1x1x128xf32>
    %454 = arith.mulf %451, %453 : vector<1x1x128xf32>
    %455 = arith.addf %449, %454 : vector<1x1x128xf32>
    %c0_375 = arith.constant 0 : index
    %c0_376 = arith.constant 0 : index
    %c1_377 = arith.constant 1 : index
    %c0_378 = arith.constant 0 : index
    %c0_379 = arith.constant 0 : index
    %456 = vector.load %arg17[%c0_375, %c0_376, %c1_377, %c0_378, %c0_379] : memref<2x2x2x2x128xf32, #tpu.memory_space<vmem>>, vector<1x1x1x1x128xf32>
    %457 = vector.shape_cast %456 : vector<1x1x1x1x128xf32> to vector<1x1x128xf32>
    %458 = vector.extract_strided_slice %418 {offsets = [6, 0], sizes = [1, 128], strides = [1, 1]} : vector<9x128xf32> to vector<1x128xf32>
    %459 = vector.shape_cast %458 : vector<1x128xf32> to vector<1x1x128xf32>
    %460 = arith.mulf %457, %459 : vector<1x1x128xf32>
    %461 = arith.addf %455, %460 : vector<1x1x128xf32>
    %c0_380 = arith.constant 0 : index
    %c1_381 = arith.constant 1 : index
    %c1_382 = arith.constant 1 : index
    %c0_383 = arith.constant 0 : index
    %c0_384 = arith.constant 0 : index
    %462 = vector.load %arg17[%c0_380, %c1_381, %c1_382, %c0_383, %c0_384] : memref<2x2x2x2x128xf32, #tpu.memory_space<vmem>>, vector<1x1x1x1x128xf32>
    %463 = vector.shape_cast %462 : vector<1x1x1x1x128xf32> to vector<1x1x128xf32>
    %464 = vector.extract_strided_slice %418 {offsets = [7, 0], sizes = [1, 128], strides = [1, 1]} : vector<9x128xf32> to vector<1x128xf32>
    %465 = vector.shape_cast %464 : vector<1x128xf32> to vector<1x1x128xf32>
    %466 = arith.mulf %463, %465 : vector<1x1x128xf32>
    %467 = arith.addf %461, %466 : vector<1x1x128xf32>
    %c0_385 = arith.constant 0 : index
    %c0_386 = arith.constant 0 : index
    %c1_387 = arith.constant 1 : index
    %c1_388 = arith.constant 1 : index
    %c0_389 = arith.constant 0 : index
    %468 = vector.load %arg17[%c0_385, %c0_386, %c1_387, %c1_388, %c0_389] : memref<2x2x2x2x128xf32, #tpu.memory_space<vmem>>, vector<1x1x1x1x128xf32>
    %469 = vector.shape_cast %468 : vector<1x1x1x1x128xf32> to vector<1x1x128xf32>
    %470 = vector.extract_strided_slice %418 {offsets = [8, 0], sizes = [1, 128], strides = [1, 1]} : vector<9x128xf32> to vector<1x128xf32>
    %471 = vector.shape_cast %470 : vector<1x128xf32> to vector<1x1x128xf32>
    %472 = arith.mulf %469, %471 : vector<1x1x128xf32>
    %473 = arith.addf %467, %472 : vector<1x1x128xf32>
    %cst_390 = arith.constant 0.000000e+00 : f32
    %cst_391 = arith.constant 6.000000e+00 : f32
    %474 = vector.broadcast %cst_390 : f32 to vector<1x1x128xf32>
    %475 = arith.maximumf %474, %473 : vector<1x1x128xf32>
    %476 = vector.broadcast %cst_391 : f32 to vector<1x1x128xf32>
    %477 = arith.minimumf %476, %475 : vector<1x1x128xf32>
    %478 = vector.shape_cast %477 : vector<1x1x128xf32> to vector<1x128xf32>
    %479 = arith.truncf %478 : vector<1x128xf32> to vector<1x128xbf16>
    %c0_392 = arith.constant 0 : index
    %c0_393 = arith.constant 0 : index
    %480 = vector.load %arg9[%c0_392, %c0_393] : memref<128x256xbf16, #tpu.memory_space<vmem>>, vector<128x256xbf16>
    %cst_394 = arith.constant dense<0.000000e+00> : vector<1x256xf32>
    %481 = tpu.matmul %479, %480, %cst_394 {dimension_numbers = #tpu.dot_dimension_numbers<[1], [0], [0], [1], [0, 0, 1, 1], [], []>} : vector<1x128xbf16>, vector<128x256xbf16>, vector<1x256xf32> -> vector<1x256xf32>
    %cst_395 = arith.constant 0.000000e+00 : f32
    %cst_396 = arith.constant 6.000000e+00 : f32
    %482 = vector.broadcast %cst_395 : f32 to vector<1x256xf32>
    %483 = arith.maximumf %482, %481 : vector<1x256xf32>
    %484 = vector.broadcast %cst_396 : f32 to vector<1x256xf32>
    %485 = arith.minimumf %484, %483 : vector<1x256xf32>
    %c0_397 = arith.constant 0 : index
    %c0_398 = arith.constant 0 : index
    %c0_399 = arith.constant 0 : index
    %486 = vector.load %arg13[%c0_397, %c0_398, %c0_399] : memref<1x1x256xf32, #tpu.memory_space<vmem>>, vector<1x1x256xf32>
    %487 = vector.shape_cast %486 : vector<1x1x256xf32> to vector<1x256xf32>
    %488 = vector.shape_cast %485 : vector<1x256xf32> to vector<1x1x256xf32>
    tpu.vector_store %arg13[%c0_397, %c0_398, %c0_399], %488 {strides = array<i32>} : memref<1x1x256xf32, #tpu.memory_space<vmem>>, vector<1x1x256xf32>,
    return
  }
  func.func @transform_0(%arg0: i32) -> (i32, i32, i32, i32) {
    %c0_i32 = arith.constant 0 : i32
    %c0_i32_0 = arith.constant 0 : i32
    %c0_i32_1 = arith.constant 0 : i32
    %c0_i32_2 = arith.constant 0 : i32
    return %arg0, %c0_i32, %c0_i32_0, %c0_i32_1 : i32, i32, i32, i32
  }
  func.func @transform_1(%arg0: i32) -> (i32, i32) {
    %c0_i32 = arith.constant 0 : i32
    %c0_i32_0 = arith.constant 0 : i32
    %c0_i32_1 = arith.constant 0 : i32
    return %c0_i32, %c0_i32_0 : i32, i32
  }
  func.func @transform_2(%arg0: i32) -> (i32, i32) {
    %c0_i32 = arith.constant 0 : i32
    %c0_i32_0 = arith.constant 0 : i32
    %c0_i32_1 = arith.constant 0 : i32
    return %c0_i32, %c0_i32_0 : i32, i32
  }
  func.func @transform_3(%arg0: i32) -> (i32, i32) {
    %c0_i32 = arith.constant 0 : i32
    %c0_i32_0 = arith.constant 0 : i32
    %c0_i32_1 = arith.constant 0 : i32
    return %c0_i32, %c0_i32_0 : i32, i32
  }
  func.func @transform_4(%arg0: i32) -> (i32, i32) {
    %c0_i32 = arith.constant 0 : i32
    %c0_i32_0 = arith.constant 0 : i32
    %c0_i32_1 = arith.constant 0 : i32
    return %c0_i32, %c0_i32_0 : i32, i32
  }
  func.func @transform_5(%arg0: i32) -> (i32, i32) {
    %c0_i32 = arith.constant 0 : i32
    %c0_i32_0 = arith.constant 0 : i32
    %c0_i32_1 = arith.constant 0 : i32
    return %c0_i32, %c0_i32_0 : i32, i32
  }
  func.func @transform_6(%arg0: i32) -> (i32, i32) {
    %c0_i32 = arith.constant 0 : i32
    %c0_i32_0 = arith.constant 0 : i32
    %c0_i32_1 = arith.constant 0 : i32
    return %c0_i32, %c0_i32_0 : i32, i32
  }
  func.func @transform_7(%arg0: i32) -> (i32, i32) {
    %c0_i32 = arith.constant 0 : i32
    %c0_i32_0 = arith.constant 0 : i32
    %c0_i32_1 = arith.constant 0 : i32
    return %c0_i32, %c0_i32_0 : i32, i32
  }
  func.func @transform_8(%arg0: i32) -> (i32, i32) {
    %c0_i32 = arith.constant 0 : i32
    %c0_i32_0 = arith.constant 0 : i32
    %c0_i32_1 = arith.constant 0 : i32
    return %c0_i32, %c0_i32_0 : i32, i32
  }
  func.func @transform_9(%arg0: i32) -> (i32, i32, i32) {
    %c0_i32 = arith.constant 0 : i32
    %c0_i32_0 = arith.constant 0 : i32
    %c0_i32_1 = arith.constant 0 : i32
    return %arg0, %c0_i32, %c0_i32_0 : i32, i32, i32
  }
  func.func @transform_10(%arg0: i32) -> (i32, i32, i32) {
    %c0_i32 = arith.constant 0 : i32
    %c0_i32_0 = arith.constant 0 : i32
    %c0_i32_1 = arith.constant 0 : i32
    return %arg0, %c0_i32, %c0_i32_0 : i32, i32, i32
  }
  func.func @transform_11(%arg0: i32) -> (i32, i32, i32) {
    %c0_i32 = arith.constant 0 : i32
    %c0_i32_0 = arith.constant 0 : i32
    %c0_i32_1 = arith.constant 0 : i32
    return %arg0, %c0_i32, %c0_i32_0 : i32, i32, i32
  }
  func.func @transform_12(%arg0: i32) -> (i32, i32, i32) {
    %c0_i32 = arith.constant 0 : i32
    %c0_i32_0 = arith.constant 0 : i32
    %c0_i32_1 = arith.constant 0 : i32
    return %arg0, %c0_i32, %c0_i32_0 : i32, i32, i32
  }
}

</mosaic_0001>

<bundles_post_ra>
// kernel: tpu_custom_call.1
= control target key start
LH: loop header
LB: loop body
LE: loop exit
PB: predicated region body
PF: predicated region fallthrough
CT: control target
= control target key end

     0   :  { %s7572_s0 = inlined_call_operand.vmem [shape: f32[2,16,16,3], index: 0, kind: input, shape index: {}]   ;;  %s7573_s1 = inlined_call_operand.vmem [shape: f32[9,3], index: 1, kind: input, shape index: {}]   ;;  %s7574_s2 = inlined_call_operand.vmem [shape: f32[3,32], index: 2, kind: input, shape index: {}]   ;;  %s7575_s3 = inlined_call_operand.vmem [shape: f32[9,32], index: 3, kind: input, shape index: {}]   ;;  %s7576_s4 = inlined_call_operand.vmem [shape: bf16[32,64], index: 4, kind: input, shape index: {}]   ;;  %s7577_s5 = inlined_call_operand.vmem [shape: f32[9,64], index: 5, kind: input, shape index: {}]   ;;  %s7578_s6 = inlined_call_operand.vmem [shape: bf16[64,128], index: 6, kind: input, shape index: {}]   ;;  %s7579_s7 = inlined_call_operand.vmem [shape: f32[9,128], index: 7, kind: input, shape index: {}]   ;;  %s7580_s8 = inlined_call_operand.vmem [shape: bf16[128,256], index: 8, kind: input, shape index: {}]   ;;  %s7581_s9 = inlined_call_operand.hbm [shape: f32[2,16,128], index: 9, kind: output, shape index: {0}]   ;;  %s7582_s10 = inlined_call_operand.hbm [shape: f32[2,8,128], index: 10, kind: output, shape index: {1}]   ;;  %s7583_s11 = inlined_call_operand.hbm [shape: f32[2,4,128], index: 11, kind: output, shape index: {2}]   ;;  %s7584_s12 = inlined_call_operand.hbm [shape: f32[2,1,256], index: 12, kind: output, shape index: {3}]  }
   0x1   :  { %7611 = sst [smem:[#allocation25_spill]] %s7572_s0 }
   0x2   :  { %7612 = sst [smem:[#allocation26_spill]] %s7573_s1 }
   0x3   :  { %7613 = sst [smem:[#allocation27_spill]] %s7574_s2 }
   0x4   :  { %7614 = sst [smem:[#allocation28_spill]] %s7575_s3 }
   0x5   :  { %7615 = sst [smem:[#allocation29_spill]] %s7576_s4 }
   0x6   :  { %7616 = sst [smem:[#allocation30_spill]] %s7577_s5 }
   0x7   :  { %7617 = sst [smem:[#allocation31_spill]] %s7578_s6 }
   0x8   :  { %7618 = sst [smem:[#allocation32_spill]] %s7579_s7 }
   0x9   :  { %18 = vsyncpa [#allocation7], 0 }
   0xa   :  { %20 = vsyncpa [#allocation7 + $0x1], 0 }
   0xb   :  { %21 = vsyncpa [#allocation9], 0 }
   0xc   :  { %23 = vsyncpa [#allocation9 + $0x1], 0 }
   0xd   :  { %24 = vsyncpa [#allocation12], 0 }
   0xe   :  { %26 = vsyncpa [#allocation12 + $0x1], 0  ;;  %s5189_s21 = smov 0   ;;  %s5191_s22 = smov 0  }
   0xf   :  { %s5193_s23 = smov 0   ;;  %s5195_s24 = smov 0  }
  0x10 LB: > { %s5210_s25 = sadd.s32 4294967295, %s5106_s24   ;;  %s7609_s26 = sadd.s32 4294967294, %s5106_s24   ;;  %s5106_s24 = sphi %s5195_s24, %s7674_s24   ;;  %s5102_s23 = sphi %s5193_s23, %s7673_s23   ;;  %s5098_s22 = sphi %s5191_s22, %s7672_s22   ;;  %s5094_s21 = sphi %s5189_s21, %s7671_s21  }
  0x11   : > { %s5214_s27 = sadd.s32 1, %s5106_s24   ;;  %s233_s28 = sadd.s32 1, %s5102_s23 }
  0x12   : > { %s230_s29 = ssub.s32 %s5106_s24, %s5214_s27  ;;  %p243_p0 = scmp.ne.s32.totalorder %s5102_s23, %s5098_s22 }
  0x13   : > { %p231_p1 = scmp.eq.s32.totalorder %s230_s29, 0  ;;  %p244_p2 = scmp.eq.s32.totalorder %s5210_s25, 1 }
  0x14   : > { %p249_p3 = scmp.ne.s32.totalorder %s5098_s22, %s5094_s21  ;;  %p250_p4 = scmp.eq.s32.totalorder %s7609_s26, 1 }
  0x15   : > { %s5227_s30 = scalar_select %p231_p1, %s5102_s23, %s233_s28  }
  0x16   : > { %p5229_p5 = por %p244_p2, %p243_p0  ;;  %p5233_p6 = por %p250_p4, %p249_p3 }
  0x17   : > { %p4727_p7 = scmp.ge.s32.totalorder %s5106_s24, 1  ;;  %p378_p8 = scmp.lt.s32.totalorder %s5106_s24, 3 }
  0x19   : > { %p379_p9 = pnand %p4727_p7, %p378_p8 }
  0x1b   : > { %382 = sbr.rel (%p379_p9) target bundleno = 1188 (0x4a4), region = 56 }
  0x22   : > { %p435_p10 = scmp.lt.s32.totalorder %s5210_s25, 1  ;;  %vm441_vm0 = vcmask 23552   ;;  %v7588_v0 = vmov 1   ;;  %v7590_v1 = vmov 0   ;;  %v7586_v2 = vmov 0.0   ;;  %s7622_s1 = sld [smem:[#allocation26_spill]] }
  0x23   : > { %4871 = vset.pattern.permute.xlu0 %v7588_v0  ;;  %4870 = vset.pattern.permute.xlu1 %v7590_v1  ;;  %442 = vst.msk [vmem:[#allocation2] sm:$0xff] %vm441_vm0, %v7586_v2  ;;  %vm443_vm1 = vcmask 16384   ;;  %446 = vst.msk [vmem:[#allocation2 + $0x90] sm:$0xff] %vm441_vm0, %v7586_v2  ;;  %v7585_v3 = vlaneseq  ;;  %v5111_v4 = vmov 1983009808   ;;  %vm1367_vm2 = vcmask 1041409  }
  0x24   : > { %495 = vst [vmem:[#allocation5] sm:$0x3] %v7586_v2  ;;  %497 = vst [vmem:[#allocation5 + $0x4] sm:$0x3] %v7586_v2  ;;  %s5253_s15 = scalar_select %p435_p10, %s5210_s25, 1  ;;  %v569_v5 = vunpack.c.l.s4 %v5111_v4  ;;  %4784 = vmatprep.subr.bf16.mxu1 %v7586_v2  ;;  %4464 = vmatprep.mubr.bf16.mxu0 %v7590_v1  ;;  %vm1369_vm3 = vcmask 1042434  }
  0x25   : > { %499 = vst [vmem:[#allocation5 + $0x2] sm:$0x1] %v7586_v2  ;;  %501 = vst [vmem:[#allocation5 + $0x8] sm:$0x1] %v7586_v2  ;;  %v5295_v6 = vshrl.u32 %v7585_v3, 7  ;;  %s7623_s0 = sld [smem:[#allocation25_spill]] }
  0x26   : > { %444 = vst.msk [vmem:[#allocation2 + $0x8] sm:$0x1] %vm443_vm1, %v7586_v2  ;;  %448 = vst.msk [vmem:[#allocation2] sm:$0x1] %vm443_vm1, %v7586_v2  ;;  %s4773_s16 = sshll.u32 %s5253_s15, 8  ;;  %v570_v7 = vunpack.c.0.s8 %v569_v5  ;;  %vm1371_vm4 = vcmask 1043459  }
  0x27   : > { %449 = vst.msk [vmem:[#allocation2 + $0x10] sm:$0x1] %vm443_vm1, %v7586_v2  ;;  %458 = vst.msk [vmem:[#allocation2 + $0x120] sm:$0x1] %vm443_vm1, %v7586_v2  ;;  %v5309_v9 = vsub.s32 0, %v5295_v6  ;;  %v5312_v10 = vsub.s32 1, %v5295_v6 }
  0x28   : > { %450 = vst.msk [vmem:[#allocation2 + $0x20] sm:$0x1] %vm443_vm1, %v7586_v2  ;;  %451 = vst.msk [vmem:[#allocation2 + $0x30] sm:$0x1] %vm443_vm1, %v7586_v2  ;;  %v5301_v8 = vld [vmem:[%s7622_s1] sm:$0xff]  ;;  %v5315_v11 = vsub.s32 2, %v5295_v6  ;;  %v5324_v16 = vsub.s32 %v570_v7, %v5295_v6 }
  0x29   : > { %452 = vst.msk [vmem:[#allocation2 + $0x40] sm:$0x1] %vm443_vm1, %v7586_v2  ;;  %453 = vst.msk [vmem:[#allocation2 + $0x50] sm:$0x1] %vm443_vm1, %v7586_v2  ;;  %v5318_v12 = vsub.s32 3, %v5295_v6  ;;  %v5327_v17 = vsub.s32 4, %v5295_v6  ;;  %v5338_v24 = vrot.slane %v5301_v8, %v5309_v9 }
  0x2a   : > { %454 = vst.msk [vmem:[#allocation2 + $0x60] sm:$0x1] %vm443_vm1, %v7586_v2  ;;  %455 = vst.msk [vmem:[#allocation2 + $0x70] sm:$0x1] %vm443_vm1, %v7586_v2  ;;  %v5330_v18 = vsub.s32 5, %v5295_v6  ;;  %v5333_v19 = vsub.s32 6, %v5295_v6 }
  0x2b   : > { %456 = vst.msk [vmem:[#allocation2 + $0x80] sm:$0x1] %vm443_vm1, %v7586_v2  ;;  %459 = vst.msk [vmem:[#allocation2 + $0x130] sm:$0x1] %vm443_vm1, %v7586_v2  ;;  %s5306_s28 = scalar_lea.vmem %s7623_s0, %s4773_s16  ;;  %vm1373_vm5 = vcmask 1044484   ;;  %vm1375_vm6 = vcmask 1045509  }
  0x2c   : > { %460 = vst.msk [vmem:[#allocation2 + $0x140] sm:$0x1] %vm443_vm1, %v7586_v2  ;;  %461 = vst.msk [vmem:[#allocation2 + $0x150] sm:$0x1] %vm443_vm1, %v7586_v2  ;;  %v503_v13 = vld [vmem:[%s5306_s28] sm:$0xff]  ;;  %v504_v14 = vld [vmem:[%s5306_s28 + $0x8] sm:$0xff] }
  0x2d   : > { %462 = vst.msk [vmem:[#allocation2 + $0x160] sm:$0x1] %vm443_vm1, %v7586_v2  ;;  %463 = vst.msk [vmem:[#allocation2 + $0x170] sm:$0x1] %vm443_vm1, %v7586_v2  ;;  %v505_v15 = vld [vmem:[%s5306_s28 + $0x10] sm:$0xff]  ;;  %v506_v20 = vld [vmem:[%s5306_s28 + $0x18] sm:$0xff]  ;;  %v567_v21 = vcombine.high %v503_v13, %v503_v13  ;;  %v584_v22 = vcombine.high %v504_v14, %v504_v14  ;;  %v574_v25 = vrot.slane %v503_v13, %v5324_v16 }
  0x2e   : > { %464 = vst.msk [vmem:[#allocation2 + $0x180] sm:$0x1] %vm443_vm1, %v7586_v2  ;;  %465 = vst.msk [vmem:[#allocation2 + $0x190] sm:$0x1] %vm443_vm1, %v7586_v2  ;;  %v601_v23 = vcombine.high %v505_v15, %v505_v15  ;;  %v591_v26 = vrot.slane %v504_v14, %v5324_v16  ;;  %v5343_v27 = vrot.slane %v505_v15, %v5324_v16  ;;  %vm1377_vm7 = vcmask 1046534   ;;  %s7638_s2 = sld [smem:[#allocation27_spill]] }
  0x2f   : > { %498 = vst [vmem:[#allocation5] sm:$0x1] %v7586_v2  ;;  %7621 = vst [vmem:[#allocation16_spill] sm:$0xff] %v5295_v6  ;;  %v618_v28 = vcombine.high %v506_v20, %v506_v20  ;;  %v581_v29 = vrot.slane %v567_v21, %v5324_v16  ;;  %v598_v30 = vrot.slane %v584_v22, %v5324_v16  ;;  %vm1379_vm8 = vcmask 1047559   ;;  %s7642_s4 = sld [smem:[#allocation29_spill]]  ;;  %s7643_s3 = sld [smem:[#allocation28_spill]] }
  0x30   : > { %7624 = vst [vmem:[#allocation17_spill] sm:$0xff] %v5315_v11  ;;  %7625 = vst [vmem:[#allocation18_spill] sm:$0xff] %v5318_v12  ;;  %v5348_v31 = vrot.slane %v601_v23, %v5324_v16  ;;  %v5351_v32 = vrot.slane %v506_v20, %v5324_v16  ;;  %v582_v33 = vcombine.high %v574_v25, %v574_v25  ;;  %vm1767_vm9 = vcmask 23553   ;;  %v2452_v23 = vld [vmem:[#allocation2] sm:$0xff]  ;;  %s5114_s20 = smov 32   ;;  %s7610_s29 = smov 96  }
  0x31   : > { %7626 = vst [vmem:[#allocation19_spill] sm:$0xff] %v5327_v17  ;;  %7627 = vst [vmem:[#allocation20_spill] sm:$0xff] %v5330_v18  ;;  %v599_v34 = vcombine.high %v591_v26, %v591_v26  ;;  %v5355_v35 = vcombine.high %v5343_v27, %v5343_v27  ;;  %v5358_v36 = vrot.slane %v618_v28, %v5324_v16  ;;  %vm467_vm10 = vcmask 258048   ;;  %s7235_s15 = sand.u32 1, %s5098_s22   ;;  %s7663_s6 = sld [smem:[#allocation31_spill]] }
  0x32   : > { %7628 = vst [vmem:[#allocation21_spill] sm:$0xff] %v5333_v19  ;;  %v583_v37 = vcombine.high %v581_v29, %v581_v29  ;;  %v600_v38 = vcombine.high %v598_v30, %v598_v30  ;;  %v5362_v39 = vcombine.high %v5348_v31, %v5348_v31  ;;  %v5366_v40 = vcombine.high %v5351_v32, %v5351_v32  ;;  %s4728_s16 = sshll.u32 %s7235_s15, 4  ;;  %s7664_s5 = sld [smem:[#allocation30_spill]] }
  0x33   : > { %v5370_v41 = vcombine.high %v5358_v36, %v5358_v36  ;;  %v1114_v42 = vrot.slane %v574_v25, %v5309_v9  ;;  %v1118_v43 = vrot.slane %v582_v33, %v5309_v9  ;;  %v1122_v44 = vrot.slane %v581_v29, %v5309_v9  ;;  %s7243_s17 = scalar_lea.vmem [#allocation6], %s4728_s16  ;;  %s7667_s7 = sld [smem:[#allocation32_spill]] }
  0x34   : > { %v1126_v45 = vrot.slane %v583_v37, %v5309_v9  ;;  %v1130_v46 = vrot.slane %v591_v26, %v5309_v9  ;;  %v1134_v47 = vrot.slane %v599_v34, %v5309_v9  ;;  %v1138_v48 = vrot.slane %v598_v30, %v5309_v9  ;;  %s4767_s26 = sshll.u32 %s5210_s25, 7  ;;  %s4774_s0 = sshll.u32 %s5210_s25, 8 }
  0x35   : > { %v1142_v49 = vrot.slane %v600_v38, %v5309_v9  ;;  %v1368_v50 = vsel %vm1367_vm2, %v1118_v43, %v1114_v42  ;;  %v1450_v51 = vrot.slane %v574_v25, %v5312_v10  ;;  %v1454_v52 = vrot.slane %v582_v33, %v5312_v10  ;;  %s7432_s18 = scalar_lea.hbm %s7582_s10, %s4767_s26 }
  0x36   : > { %v1370_v53 = vsel %vm1369_vm3, %v1122_v44, %v1368_v50  ;;  %v1458_v54 = vrot.slane %v581_v29, %v5312_v10  ;;  %v1462_v55 = vrot.slane %v583_v37, %v5312_v10  ;;  %v1466_v56 = vrot.slane %v591_v26, %v5312_v10  ;;  %v2508_v50 = vld [vmem:[#allocation2 + $0x1] sm:$0xff] }
  0x37   : > { %v1372_v57 = vsel %vm1371_vm4, %v1126_v45, %v1370_v53  ;;  %v1470_v58 = vrot.slane %v599_v34, %v5312_v10  ;;  %v1474_v59 = vrot.slane %v598_v30, %v5312_v10  ;;  %v1478_v60 = vrot.slane %v600_v38, %v5312_v10 }
  0x38   : > { %v1374_v61 = vsel %vm1373_vm5, %v1130_v46, %v1372_v57  ;;  %v1703_v62 = vsel %vm1369_vm3, %v1454_v52, %v1450_v51  ;;  %v1787_v63 = vrot.slane %v5343_v27, %v5309_v9  ;;  %v1791_v4 = vrot.slane %v5355_v35, %v5309_v9 }
  0x39   : > { %v1376_v5 = vsel %vm1375_vm6, %v1134_v47, %v1374_v61  ;;  %v1704_v7 = vsel %vm1371_vm4, %v1458_v54, %v1703_v62  ;;  %1769 = vst.msk [vmem:[#allocation2 + $0x128] sm:$0x1] %vm443_vm1, %v1478_v60  ;;  %v1795_v13 = vrot.slane %v5348_v31, %v5309_v9  ;;  %v1799_v14 = vrot.slane %v5362_v39, %v5309_v9  ;;  %v522_v60 = vld [vmem:[%s5306_s28 + $0x98] sm:$0xff] }
  0x3a   : > { %v1378_v15 = vsel %vm1377_vm7, %v1138_v48, %v1376_v5  ;;  %v1705_v20 = vsel %vm1373_vm5, %v1462_v55, %v1704_v7  ;;  %v1803_v21 = vrot.slane %v5351_v32, %v5309_v9  ;;  %v1807_v22 = vrot.slane %v5366_v40, %v5309_v9  ;;  %v521_v55 = vld [vmem:[%s5306_s28 + $0x90] sm:$0xff] }
  0x3b   : > { %v1380_v25 = vsel %vm1379_vm8, %v1142_v49, %v1378_v15  ;;  %v1706_v26 = vsel %vm1375_vm6, %v1466_v56, %v1705_v20  ;;  %v1811_v28 = vrot.slane %v5358_v36, %v5309_v9  ;;  %v1815_v29 = vrot.slane %v5370_v41, %v5309_v9  ;;  %v2480_v49 = vld [vmem:[#allocation2 + $0x90] sm:$0xff]  ;;  %v523_v15 = vld [vmem:[%s5306_s28 + $0xa0] sm:$0xff] }
  0x3c   : > { %1439 = vst.msk [vmem:[#allocation2 + $0x1b0] sm:$0xff] %vm441_vm0, %v1380_v25  ;;  %v1707_v30 = vsel %vm1377_vm7, %v1470_v58, %v1706_v26  ;;  %v2040_v33 = vsel %vm1367_vm2, %v1791_v4, %v1787_v63  ;;  %v2116_v34 = vrot.slane %v5343_v27, %v5312_v10  ;;  %v2120_v37 = vrot.slane %v5355_v35, %v5312_v10  ;;  %v524_v25 = vld [vmem:[%s5306_s28 + $0xa8] sm:$0xff] }
  0x3d   : > { %v1708_v38 = vsel %vm1379_vm8, %v1474_v59, %v1707_v30  ;;  %v2041_v42 = vsel %vm1369_vm3, %v1795_v13, %v2040_v33  ;;  %v2124_v43 = vrot.slane %v5348_v31, %v5312_v10  ;;  %v2128_v44 = vrot.slane %v5362_v39, %v5312_v10 }
  0x3e   : > { %1768 = vst.msk [vmem:[#allocation2 + $0x120] sm:$0xfe] %vm1767_vm9, %v1708_v38  ;;  %v2042_v45 = vsel %vm1371_vm4, %v1799_v14, %v2041_v42  ;;  %v2132_v27 = vrot.slane %v5351_v32, %v5312_v10  ;;  %v2136_v35 = vrot.slane %v5366_v40, %v5312_v10  ;;  %v2140_v46 = vrot.slane %v5358_v36, %v5312_v10 }
  0x3f   : > { %v2043_v47 = vsel %vm1373_vm5, %v1803_v21, %v2042_v45  ;;  %v2144_v31 = vrot.slane %v5370_v41, %v5312_v10  ;;  %v2369_v39 = vsel %vm1369_vm3, %v2120_v37, %v2116_v34  ;;  %v2464_v48 = vmul.f32 %v5338_v24, %v2452_v23  ;;  %v525_v37 = vld [vmem:[%s5306_s28 + $0xb0] sm:$0xff] }
  0x40   : > { %v2044_v32 = vsel %vm1375_vm6, %v1807_v22, %v2043_v47  ;;  %v2370_v40 = vsel %vm1371_vm4, %v2124_v43, %v2369_v39  ;;  %v5446_v36 = vrot.slane %v5301_v8, %v5312_v10  ;;  %v5450_v51 = vrot.slane %v5301_v8, %v5315_v11  ;;  %v526_v47 = vld [vmem:[%s5306_s28 + $0xb8] sm:$0xff] }
  0x41   : > { %v2045_v41 = vsel %vm1377_vm7, %v1811_v28, %v2044_v32  ;;  %v2371_v52 = vsel %vm1373_vm5, %v2128_v44, %v2370_v40  ;;  %2435 = vst.msk [vmem:[#allocation2 + $0x18] sm:$0x1] %vm443_vm1, %v2144_v31  ;;  %v5457_v53 = vrot.slane %v5301_v8, %v5318_v12  ;;  %v5461_v54 = vrot.slane %v5301_v8, %v5327_v17 }
  0x42   : > { %v2046_v56 = vsel %vm1379_vm8, %v1815_v29, %v2045_v41  ;;  %v2372_v57 = vsel %vm1375_vm6, %v2132_v27, %v2371_v52  ;;  %v2492_v58 = vmul.f32 %v5446_v36, %v2480_v49  ;;  %v2520_v59 = vmul.f32 %v5450_v51, %v2508_v50  ;;  %v5531_v50 = vld [vmem:[%s7622_s1 + $0x8] ss:$0 sm:$0xff] }
  0x43   : > { %2105 = vst.msk [vmem:[#allocation2 + $0xa0] sm:$0xff] %vm441_vm0, %v2046_v56  ;;  %v2373_v61 = vsel %vm1377_vm7, %v2136_v35, %v2372_v57  ;;  %v2564_v62 = vld [vmem:[#allocation2 + $0x1b0] sm:$0xff]  ;;  %v5473_v63 = vrot.slane %v5301_v8, %v5330_v18  ;;  %v5477_v4 = vrot.slane %v5301_v8, %v5333_v19  ;;  %v5480_v5 = vsub.s32 7, %v5295_v6 }
  0x44   : > { %v2374_v7 = vsel %vm1379_vm8, %v2140_v46, %v2373_v61  ;;  %v2500_v13 = vadd.f32 %v2492_v58, %v2464_v48  ;;  %v2576_v14 = vmul.f32 %v5461_v54, %v2564_v62  ;;  %v873_v20 = vcombine.high %v521_v55, %v521_v55 }
  0x45   : > { %7629 = vst [vmem:[#allocation22_spill] sm:$0xff] %v5480_v5  ;;  %2434 = vst.msk [vmem:[#allocation2 + $0x10] sm:$0xfe] %vm1767_vm9, %v2374_v7  ;;  %v2536_v21 = vld [vmem:[#allocation2 + $0x120] sm:$0xff]  ;;  %v5488_v23 = vrot.slane %v5301_v8, %v5480_v5  ;;  %v5492_v26 = vrot.slane %v521_v55, %v5324_v16  ;;  %v890_v28 = vcombine.high %v522_v60, %v522_v60  ;;  %vm471_vm11 = vcmask 253952  }
  0x46   : > { %v2592_v22 = vld [vmem:[#allocation2 + $0x121] sm:$0xff]  ;;  %v5495_v29 = vrot.slane %v522_v60, %v5324_v16  ;;  %v2528_v30 = vadd.f32 %v2520_v59, %v2500_v13  ;;  %v2548_v33 = vmul.f32 %v5457_v53, %v2536_v21  ;;  %v5501_v38 = vrot.slane %v873_v20, %v5324_v16 }
  0x47   : > { %v2604_v34 = vmul.f32 %v5473_v63, %v2592_v22  ;;  %v5505_v8 = vcombine.high %v5492_v26, %v5492_v26  ;;  %v5508_v42 = vrot.slane %v890_v28, %v5324_v16  ;;  %v907_v44 = vcombine.high %v523_v15, %v523_v15 }
  0x48   : > { %v5512_v43 = vcombine.high %v5495_v29, %v5495_v29  ;;  %v2556_v45 = vadd.f32 %v2548_v33, %v2528_v30  ;;  %v5516_v27 = vcombine.high %v5501_v38, %v5501_v38  ;;  %v914_v35 = vrot.slane %v523_v15, %v5324_v16 }
  0x49   : > { %v924_v46 = vcombine.high %v524_v25, %v524_v25  ;;  %v5522_v31 = vcombine.high %v5508_v42, %v5508_v42  ;;  %v921_v39 = vrot.slane %v907_v44, %v5324_v16  ;;  %v5526_v48 = vrot.slane %v524_v25, %v5324_v16 }
  0x4a   : > { %v941_v49 = vcombine.high %v525_v37, %v525_v37  ;;  %v2584_v32 = vadd.f32 %v2576_v14, %v2556_v45  ;;  %v5533_v40 = vld [vmem:[#allocation2 + $0xa0] sm:$0xff]  ;;  %v922_v41 = vcombine.high %v914_v35, %v914_v35  ;;  %v5539_v55 = vrot.slane %v525_v37, %v5324_v16 }
  0x4b   : > { %v5536_v52 = vrot.slane %v924_v46, %v5324_v16  ;;  %v2660_v56 = vmul.f32 %v5488_v23, %v5533_v40  ;;  %v923_v57 = vcombine.high %v921_v39, %v921_v39  ;;  %v939_v58 = vcombine.high %v5526_v48, %v5526_v48 }
  0x4c   : > { %v5546_v59 = vrot.slane %v941_v49, %v5324_v16  ;;  %v2612_v60 = vadd.f32 %v2604_v34, %v2584_v32  ;;  %v5548_v61 = vld [vmem:[#allocation2 + $0x10] sm:$0xff]  ;;  %v5556_v13 = vcombine.high %v5539_v55, %v5539_v55  ;;  %v958_v14 = vcombine.high %v526_v47, %v526_v47 }
  0x4d   : > { %v5550_v62 = vld [vmem:[#allocation2 + $0x11] sm:$0xff]  ;;  %v940_v7 = vcombine.high %v5536_v52, %v5536_v52  ;;  %v2632_v15 = vmul.f32 %v5477_v4, %v5548_v61  ;;  %v5567_v22 = vrot.slane %v526_v47, %v5324_v16  ;;  %v1274_v28 = vrot.slane %v914_v35, %v5309_v9 }
  0x4e   : > { %v2688_v20 = vmul.f32 %v5531_v50, %v5550_v62  ;;  %v5564_v21 = vcombine.high %v5546_v59, %v5546_v59  ;;  %v5570_v25 = vrot.slane %v958_v14, %v5324_v16  ;;  %v1278_v30 = vrot.slane %v922_v41, %v5309_v9 }
  0x4f   : > { %v1282_v33 = vrot.slane %v921_v39, %v5309_v9  ;;  %v2640_v34 = vadd.f32 %v2632_v15, %v2612_v60  ;;  %v5577_v37 = vcombine.high %v5567_v22, %v5567_v22  ;;  %v1286_v44 = vrot.slane %v923_v57, %v5309_v9 }
  0x50   : > { %v1290_v45 = vrot.slane %v5526_v48, %v5309_v9  ;;  %v5584_v46 = vcombine.high %v5570_v25, %v5570_v25  ;;  %v1294_v47 = vrot.slane %v939_v58, %v5309_v9  ;;  %v1298_v49 = vrot.slane %v5536_v52, %v5309_v9 }
  0x51   : > { %v1302_v32 = vrot.slane %v940_v7, %v5309_v9  ;;  %v2668_v60 = vadd.f32 %v2660_v56, %v2640_v34  ;;  %v1409_v14 = vsel %vm1367_vm2, %v1278_v30, %v1274_v28  ;;  %v1610_v15 = vrot.slane %v914_v35, %v5312_v10 }
  0x52   : > { %v1614_v3 = vrot.slane %v922_v41, %v5312_v10  ;;  %v1410_v2 = vsel %vm1369_vm3, %v1282_v33, %v1409_v14  ;;  %v1618_v0 = vrot.slane %v921_v39, %v5312_v10  ;;  %v1622_v1 = vrot.slane %v923_v57, %v5312_v10 }
  0x53   : > { %v1626_v6 = vrot.slane %v5526_v48, %v5312_v10  ;;  %v2696_v5 = vadd.f32 %v2688_v20, %v2668_v60  ;;  %v1411_v19 = vsel %vm1371_vm4, %v1286_v44, %v1410_v2  ;;  %v1630_v56 = vrot.slane %v939_v58, %v5312_v10 }
  0x54   : > { %v1634_v28 = vrot.slane %v5536_v52, %v5312_v10  ;;  %v1412_v35 = vsel %vm1373_vm5, %v1290_v45, %v1411_v19  ;;  %v1638_v41 = vrot.slane %v940_v7, %v5312_v10  ;;  %v1733_v30 = vsel %vm1369_vm3, %v1614_v3, %v1610_v15 }
  0x55   : > { %v1915_v39 = vrot.slane %v5492_v26, %v5309_v9  ;;  %v2704_v57 = vmax.f32 %v2696_v5, 0.0  ;;  %v1413_v48 = vsel %vm1375_vm6, %v1294_v47, %v1412_v35  ;;  %v1734_v20 = vsel %vm1371_vm4, %v1618_v0, %v1733_v30 }
  0x56   : > { %v1919_v2 = vrot.slane %v5505_v8, %v5309_v9  ;;  %v1414_v58 = vsel %vm1377_vm7, %v1298_v49, %v1413_v48  ;;  %v1735_v52 = vsel %vm1373_vm5, %v1622_v1, %v1734_v20  ;;  %1779 = vst.msk [vmem:[#allocation2 + $0x178] sm:$0x1] %vm443_vm1, %v1638_v41  ;;  %v1923_v3 = vrot.slane %v5501_v38, %v5309_v9 }
  0x57   : > { %v1927_v19 = vrot.slane %v5516_v27, %v5309_v9  ;;  %v2712_v5 = vmin.f32 %v2704_v57, 6.0  ;;  %v1415_v7 = vsel %vm1379_vm8, %v1302_v32, %v1414_v58  ;;  %v1736_v0 = vsel %vm1375_vm6, %v1626_v6, %v1735_v52 }
  0x58   : > { %v1931_v33 = vrot.slane %v5495_v29, %v5309_v9  ;;  %1444 = vst.msk [vmem:[#allocation2 + $0x200] sm:$0xff] %vm441_vm0, %v1415_v7  ;;  %v1737_v1 = vsel %vm1377_vm7, %v1630_v56, %v1736_v0  ;;  %v1935_v34 = vrot.slane %v5512_v43, %v5309_v9  ;;  %v1939_v44 = vrot.slane %v5508_v42, %v5309_v9 }
  0x59   : > { %v1943_v45 = vrot.slane %v5522_v31, %v5309_v9  ;;  %2774 = vperm.xlu0 %4871, %v2712_v5   ;;  %2723 = vperm.xlu1 %4870, %v2712_v5   ;;  %v1738_v6 = vsel %vm1379_vm8, %v1634_v28, %v1737_v1  ;;  %v1947_v47 = vrot.slane %v5539_v55, %v5309_v9  ;;  %v7597_v58 = vmov 2  }
  0x5a   : > { %v1951_v49 = vrot.slane %v5556_v13, %v5309_v9  ;;  %1778 = vst.msk [vmem:[#allocation2 + $0x170] sm:$0xfe] %vm1767_vm9, %v1738_v6  ;;  %v1955_v32 = vrot.slane %v5546_v59, %v5309_v9  ;;  %v1959_v60 = vrot.slane %v5564_v21, %v5309_v9  ;;  %v1963_v14 = vrot.slane %v5567_v22, %v5309_v9 }
  0x5b   : > { %v1967_v15 = vrot.slane %v5577_v37, %v5309_v9  ;;  %v1971_v56 = vrot.slane %v5570_v25, %v5309_v9  ;;  %v1975_v28 = vrot.slane %v5584_v46, %v5309_v9  ;;  %v2068_v35 = vsel %vm1367_vm2, %v1919_v2, %v1915_v39 }
  0x5c   : > { %v2075_v41 = vsel %vm1367_vm2, %v1951_v49, %v1947_v47  ;;  %v2069_v30 = vsel %vm1369_vm3, %v1923_v3, %v2068_v35  ;;  %v2244_v48 = vrot.slane %v5492_v26, %v5312_v10  ;;  %v2248_v20 = vrot.slane %v5505_v8, %v5312_v10 }
  0x5d   : > { %v2076_v57 = vsel %vm1369_vm3, %v1955_v32, %v2075_v41  ;;  %4872 = vset.pattern.permute.xlu1 %v7597_v58  ;;  %v2070_v52 = vsel %vm1371_vm4, %v1927_v19, %v2069_v30  ;;  %v2252_v39 = vrot.slane %v5501_v38, %v5312_v10  ;;  %v2256_v2 = vrot.slane %v5516_v27, %v5312_v10 }
  0x5e   : > { %v2077_v7 = vsel %vm1371_vm4, %v1959_v60, %v2076_v57  ;;  %2826 = vperm.xlu1 %4872, %v2712_v5   ;;  %v2071_v3 = vsel %vm1373_vm5, %v1931_v33, %v2070_v52  ;;  %v2260_v8 = vrot.slane %v5495_v29, %v5312_v10  ;;  %v2264_v0 = vrot.slane %v5512_v43, %v5312_v10  ;;  %v508_v60 = vld [vmem:[%s5306_s28 + $0x28] sm:$0xff]  ;;  %v509_v52 = vld [vmem:[%s5306_s28 + $0x30] sm:$0xff] }
  0x5f   : > { %v2078_v26 = vsel %vm1373_vm5, %v1963_v14, %v2077_v7  ;;  %v2072_v19 = vsel %vm1375_vm6, %v1935_v34, %v2071_v3  ;;  %v2268_v38 = vrot.slane %v5508_v42, %v5312_v10  ;;  %v2272_v27 = vrot.slane %v5522_v31, %v5312_v10  ;;  %v2569_v6 = vld [vmem:[#allocation2 + $0x200] sm:$0xff]  ;;  %v510_v7 = vld [vmem:[%s5306_s28 + $0x38] sm:$0xff] }
  0x60   : > { %v2079_v1 = vsel %vm1375_vm6, %v1967_v15, %v2078_v26  ;;  %v7630_v5 = vmov 0   ;;  %v2073_v33 = vsel %vm1377_vm7, %v1939_v44, %v2072_v19  ;;  %v2276_v43 = vrot.slane %v5539_v55, %v5312_v10  ;;  %v507_v55 = vld [vmem:[%s5306_s28 + $0x20] sm:$0xff] }
  0x61   : > { %4873 = vset.pattern.permute.xlu0 %v7630_v5  ;;  %v2080_v29 = vsel %vm1377_vm7, %v1971_v56, %v2079_v1  ;;  %v2280_v34 = vrot.slane %v5556_v13, %v5312_v10  ;;  %v2074_v47 = vsel %vm1379_vm8, %v1943_v45, %v2073_v33  ;;  %v2284_v31 = vrot.slane %v5546_v59, %v5312_v10  ;;  %v2541_v49 = vld [vmem:[#allocation2 + $0x170] sm:$0xff] }
  0x62   : > { %v2081_v42 = vsel %vm1379_vm8, %v1975_v28, %v2080_v29  ;;  %v2288_v44 = vrot.slane %v5564_v21, %v5312_v10  ;;  %2443 = vst.msk [vmem:[#allocation2 + $0x58] sm:$0x1] %vm443_vm1, %v2272_v27  ;;  %v2597_v32 = vld [vmem:[#allocation2 + $0x171] sm:$0xff]  ;;  %4874 = vset.pattern.permute.xlu1 %v7630_v5  ;;  %v2292_v13 = vrot.slane %v5567_v22, %v5312_v10  ;;  %vm3461_vm12 = vcmask 257024  }
  0x63   : > { %2109 = vst.msk [vmem:[#allocation2 + $0xe0] sm:$0xff] %vm441_vm0, %v2074_v47  ;;  %2110 = vst.msk [vmem:[#allocation2 + $0xf0] sm:$0xff] %vm441_vm0, %v2081_v42  ;;  %v2296_v59 = vrot.slane %v5577_v37, %v5312_v10  ;;  %v2300_v21 = vrot.slane %v5570_v25, %v5312_v10  ;;  %v2304_v45 = vrot.slane %v5584_v46, %v5312_v10  ;;  %vm3546_vm13 = vcmask 258049  }
  0x64   : > { %v2393_v14 = vsel %vm1369_vm3, %v2248_v20, %v2244_v48  ;;  %v2399_v15 = vsel %vm1369_vm3, %v2280_v34, %v2276_v43  ;;  %v5705_v56 = vmul.f32 %v5457_v53, %v2541_v49  ;;  %v5708_v22 = vmul.f32 %v5461_v54, %v2569_v6 }
  0x65   : > { %v2394_v37 = vsel %vm1371_vm4, %v2252_v39, %v2393_v14  ;;  %v2400_v25 = vsel %vm1371_vm4, %v2284_v31, %v2399_v15  ;;  %2445 = vst.msk [vmem:[#allocation2 + $0x68] sm:$0x1] %vm443_vm1, %v2304_v45  ;;  %v5714_v46 = vmul.f32 %v5473_v63, %v2597_v32  ;;  %v635_v28 = vcombine.high %v507_v55, %v507_v55 }
  0x66   : > { %v2395_v35 = vsel %vm1373_vm5, %v2256_v2, %v2394_v37  ;;  %v2401_v41 = vsel %vm1373_vm5, %v2288_v44, %v2400_v25  ;;  %v5719_v30 = vrot.slane %v507_v55, %v5324_v16  ;;  %v652_v57 = vcombine.high %v508_v60, %v508_v60 }
  0x67   : > { %v2396_v48 = vsel %vm1375_vm6, %v2260_v8, %v2395_v35  ;;  %v2402_v20 = vsel %vm1375_vm6, %v2292_v13, %v2401_v41  ;;  %v5726_v39 = vrot.slane %v635_v28, %v5324_v16  ;;  %v5729_v3 = vrot.slane %v508_v60, %v5324_v16 }
  0x68   : > { %v2397_v2 = vsel %vm1377_vm7, %v2264_v0, %v2396_v48  ;;  %v2403_v26 = vsel %vm1377_vm7, %v2296_v59, %v2402_v20  ;;  %v650_v19 = vcombine.high %v5719_v30, %v5719_v30  ;;  %v5736_v1 = vrot.slane %v652_v57, %v5324_v16 }
  0x69   : > { %v2398_v8 = vsel %vm1379_vm8, %v2268_v38, %v2397_v2  ;;  %v2404_v27 = vsel %vm1379_vm8, %v2300_v21, %v2403_v26  ;;  %v651_v33 = vcombine.high %v5726_v39, %v5726_v39  ;;  %v5744_v29 = vcombine.high %v5729_v3, %v5729_v3 }
  0x6a   : > { %2442 = vst.msk [vmem:[#allocation2 + $0x50] sm:$0xfe] %vm1767_vm9, %v2398_v8  ;;  %2444 = vst.msk [vmem:[#allocation2 + $0x60] sm:$0xfe] %vm1767_vm9, %v2404_v27  ;;  %v5748_v0 = vld [vmem:[#allocation2 + $0xe0] sm:$0xff]  ;;  %v2653_v43 = vld [vmem:[#allocation2 + $0xf0] sm:$0xff]  ;;  %v668_v34 = vcombine.high %v5736_v1, %v5736_v1  ;;  %v669_v38 = vcombine.high %v509_v52, %v509_v52  ;;  %v5753_v6 = vrot.slane %v509_v52, %v5324_v16 }
  0x6b   : > { %7631 = vst [vmem:[#allocation23_spill] sm:$0xff] %v5748_v0  ;;  %v686_v47 = vcombine.high %v510_v7, %v510_v7  ;;  %v2497_v42 = vmul.f32 %v5446_v36, %v5748_v0  ;;  %v5758_v31 = vmul.f32 %v5488_v23, %v2653_v43  ;;  %v5761_v44 = vrot.slane %v510_v7, %v5324_v16 }
  0x6c   : > { %v1146_v49 = vrot.slane %v5719_v30, %v5309_v9  ;;  %v5766_v32 = vrot.slane %v669_v38, %v5324_v16  ;;  %v5770_v55 = vcombine.high %v5753_v6, %v5753_v6  ;;  %v1150_v59 = vrot.slane %v650_v19, %v5309_v9 }
  0x6d   : > { %v5773_v13 = vrot.slane %v686_v47, %v5324_v16  ;;  %v5778_v21 = vcombine.high %v5761_v44, %v5761_v44  ;;  %v1154_v45 = vrot.slane %v5726_v39, %v5309_v9  ;;  %v1158_v60 = vrot.slane %v651_v33, %v5309_v9 }
  0x6e   : > { %v1162_v14 = vrot.slane %v5729_v3, %v5309_v9  ;;  %v5787_v15 = vcombine.high %v5766_v32, %v5766_v32  ;;  %v1166_v25 = vrot.slane %v5744_v29, %v5309_v9  ;;  %v1170_v28 = vrot.slane %v5736_v1, %v5309_v9 }
  0x6f   : > { %v5791_v37 = vcombine.high %v5773_v13, %v5773_v13  ;;  %v1174_v35 = vrot.slane %v668_v34, %v5309_v9  ;;  %v1381_v41 = vsel %vm1367_vm2, %v1150_v59, %v1146_v49  ;;  %v1482_v57 = vrot.slane %v5719_v30, %v5312_v10 }
  0x70   : > { %v1486_v48 = vrot.slane %v650_v19, %v5312_v10  ;;  %v1382_v20 = vsel %vm1369_vm3, %v1154_v45, %v1381_v41  ;;  %v1490_v52 = vrot.slane %v5726_v39, %v5312_v10  ;;  %v1494_v7 = vrot.slane %v651_v33, %v5312_v10 }
  0x71   : > { %v1498_v2 = vrot.slane %v5729_v3, %v5312_v10  ;;  %v5808_v26 = vld [vmem:[#allocation2 + $0x50] sm:$0xff]  ;;  %v2625_v27 = vld [vmem:[#allocation2 + $0x60] sm:$0xff]  ;;  %v1383_v43 = vsel %vm1371_vm4, %v1158_v60, %v1382_v20  ;;  %v1502_v30 = vrot.slane %v5744_v29, %v5312_v10  ;;  %v1506_v19 = vrot.slane %v5736_v1, %v5312_v10 }
  0x72   : > { %v5810_v8 = vld [vmem:[#allocation2 + $0x51] sm:$0xff]  ;;  %v1510_v39 = vrot.slane %v668_v34, %v5312_v10  ;;  %v2469_v33 = vmul.f32 %v5338_v24, %v5808_v26  ;;  %v2637_v38 = vmul.f32 %v5477_v4, %v2625_v27  ;;  %v2681_v47 = vld [vmem:[#allocation2 + $0x61] sm:$0xff]  ;;  %v1384_v49 = vsel %vm1373_vm5, %v1162_v14, %v1383_v43 }
  0x73   : > { %7632 = vst [vmem:[#allocation24_spill] sm:$0xff] %v5810_v8  ;;  %v2525_v3 = vmul.f32 %v5450_v51, %v5810_v8  ;;  %v5825_v59 = vmul.f32 %v5531_v50, %v2681_v47  ;;  %v1385_v29 = vsel %vm1375_vm6, %v1166_v25, %v1384_v49  ;;  %v1709_v1 = vsel %vm1369_vm3, %v1486_v48, %v1482_v57 }
  0x74   : > { %1771 = vst.msk [vmem:[#allocation2 + $0x138] sm:$0x1] %vm443_vm1, %v1510_v39  ;;  %v1819_v34 = vrot.slane %v5753_v6, %v5309_v9  ;;  %v2505_v45 = vadd.f32 %v2497_v42, %v2469_v33  ;;  %v1386_v60 = vsel %vm1377_vm7, %v1170_v28, %v1385_v29  ;;  %v1710_v41 = vsel %vm1371_vm4, %v1490_v52, %v1709_v1 }
  0x75   : > { %v1823_v14 = vrot.slane %v5770_v55, %v5309_v9  ;;  %v1387_v20 = vsel %vm1379_vm8, %v1174_v35, %v1386_v60  ;;  %v1711_v27 = vsel %vm1373_vm5, %v1494_v7, %v1710_v41  ;;  %v1827_v25 = vrot.slane %v5766_v32, %v5309_v9  ;;  %v513_v60 = vld [vmem:[%s5306_s28 + $0x50] sm:$0xff] }
  0x76   : > { %v1831_v57 = vrot.slane %v5787_v15, %v5309_v9  ;;  %v2533_v48 = vadd.f32 %v2525_v3, %v2505_v45  ;;  %1440 = vst.msk [vmem:[#allocation2 + $0x1c0] sm:$0xff] %vm441_vm0, %v1387_v20  ;;  %v1712_v42 = vsel %vm1375_vm6, %v1498_v2, %v1711_v27  ;;  %v1835_v28 = vrot.slane %v5761_v44, %v5309_v9 }
  0x77   : > { %v1839_v52 = vrot.slane %v5778_v21, %v5309_v9  ;;  %v1713_v35 = vsel %vm1377_vm7, %v1502_v30, %v1712_v42  ;;  %v1843_v7 = vrot.slane %v5773_v13, %v5309_v9  ;;  %v1847_v43 = vrot.slane %v5791_v37, %v5309_v9 }
  0x78   : > { %v2047_v39 = vsel %vm1367_vm2, %v1823_v14, %v1819_v34  ;;  %v2561_v33 = vadd.f32 %v5705_v56, %v2533_v48  ;;  %v1714_v2 = vsel %vm1379_vm8, %v1506_v19, %v1713_v35  ;;  %v2148_v47 = vrot.slane %v5753_v6, %v5312_v10  ;;  %v514_v14 = vld [vmem:[%s5306_s28 + $0x58] sm:$0xff] }
  0x79   : > { %v2048_v3 = vsel %vm1369_vm3, %v1827_v25, %v2047_v39  ;;  %1770 = vst.msk [vmem:[#allocation2 + $0x130] sm:$0xfe] %vm1767_vm9, %v1714_v2  ;;  %v2152_v49 = vrot.slane %v5770_v55, %v5312_v10  ;;  %v2156_v29 = vrot.slane %v5766_v32, %v5312_v10  ;;  %v2160_v56 = vrot.slane %v5787_v15, %v5312_v10  ;;  %v516_v39 = vld [vmem:[%s5306_s28 + $0x68] sm:$0xff] }
  0x7a   : > { %v2049_v30 = vsel %vm1371_vm4, %v1831_v57, %v2048_v3  ;;  %v2589_v19 = vadd.f32 %v5708_v22, %v2561_v33  ;;  %v2164_v6 = vrot.slane %v5761_v44, %v5312_v10  ;;  %v2168_v34 = vrot.slane %v5778_v21, %v5312_v10 }
  0x7b   : > { %v2050_v1 = vsel %vm1373_vm5, %v1835_v28, %v2049_v30  ;;  %v2172_v55 = vrot.slane %v5773_v13, %v5312_v10  ;;  %v2176_v32 = vrot.slane %v5791_v37, %v5312_v10  ;;  %v2375_v15 = vsel %vm1369_vm3, %v2152_v49, %v2148_v47  ;;  %v517_v49 = vld [vmem:[%s5306_s28 + $0x70] sm:$0xff] }
  0x7c   : > { %v2051_v45 = vsel %vm1375_vm6, %v1839_v52, %v2050_v1  ;;  %v2617_v22 = vadd.f32 %v5714_v46, %v2589_v19  ;;  %v2376_v44 = vsel %vm1371_vm4, %v2156_v29, %v2375_v15  ;;  %v2465_v21 = vmul.f32 %v5548_v61, %v5338_v24  ;;  %v515_v52 = vld [vmem:[%s5306_s28 + $0x60] sm:$0xff] }
  0x7d   : > { %v2052_v41 = vsel %vm1377_vm7, %v1843_v7, %v2051_v45  ;;  %v2377_v13 = vsel %vm1373_vm5, %v2160_v56, %v2376_v44  ;;  %2437 = vst.msk [vmem:[#allocation2 + $0x28] sm:$0x1] %vm443_vm1, %v2176_v32  ;;  %v2493_v37 = vmul.f32 %v5533_v40, %v5446_v36  ;;  %v2521_v46 = vmul.f32 %v5550_v62, %v5450_v51  ;;  %v2565_v27 = vld [vmem:[#allocation2 + $0x1c0] sm:$0xff]  ;;  %v518_v44 = vld [vmem:[%s5306_s28 + $0x78] sm:$0xff] }
  0x7e   : > { %v2053_v20 = vsel %vm1379_vm8, %v1847_v43, %v2052_v41  ;;  %v2645_v25 = vadd.f32 %v2637_v38, %v2617_v22  ;;  %v2378_v61 = vsel %vm1375_vm6, %v2164_v6, %v2377_v13  ;;  %v2577_v57 = vmul.f32 %v5461_v54, %v2565_v27 }
  0x7f   : > { %2106 = vst.msk [vmem:[#allocation2 + $0xb0] sm:$0xff] %vm441_vm0, %v2053_v20  ;;  %v737_v48 = vcombine.high %v513_v60, %v513_v60  ;;  %v2379_v42 = vsel %vm1377_vm7, %v2168_v34, %v2378_v61  ;;  %v2501_v28 = vadd.f32 %v2493_v37, %v2465_v21  ;;  %v5899_v40 = vrot.slane %v513_v60, %v5324_v16 }
  0x80   : > { %v754_v35 = vcombine.high %v514_v14, %v514_v14  ;;  %v2673_v62 = vadd.f32 %v5758_v31, %v2645_v25  ;;  %v2380_v38 = vsel %vm1379_vm8, %v2172_v55, %v2379_v42  ;;  %v2537_v7 = vld [vmem:[#allocation2 + $0x130] sm:$0xff]  ;;  %v5908_v2 = vrot.slane %v514_v14, %v5324_v16 }
  0x81   : > { %v2593_v43 = vld [vmem:[#allocation2 + $0x131] sm:$0xff]  ;;  %v5905_v33 = vrot.slane %v737_v48, %v5324_v16  ;;  %2436 = vst.msk [vmem:[#allocation2 + $0x20] sm:$0xfe] %vm1767_vm9, %v2380_v38  ;;  %v2529_v3 = vadd.f32 %v2521_v46, %v2501_v28  ;;  %v2549_v47 = vmul.f32 %v5457_v53, %v2537_v7  ;;  %v5916_v31 = vcombine.high %v5899_v40, %v5899_v40 }
  0x82   : > { %v2605_v30 = vmul.f32 %v5473_v63, %v2593_v43  ;;  %v2701_v29 = vadd.f32 %v5825_v59, %v2673_v62  ;;  %v5924_v19 = vrot.slane %v754_v35, %v5324_v16  ;;  %v5928_v1 = vcombine.high %v5908_v2, %v5908_v2 }
  0x83   : > { %v5921_v56 = vcombine.high %v5905_v33, %v5905_v33  ;;  %v2557_v6 = vadd.f32 %v2549_v47, %v2529_v3  ;;  %v771_v34 = vcombine.high %v515_v52, %v515_v52  ;;  %v778_v45 = vrot.slane %v515_v52, %v5324_v16 }
  0x84   : > { %v788_v55 = vcombine.high %v516_v39, %v516_v39  ;;  %v2709_v32 = vmax.f32 %v2701_v29, 0.0  ;;  %v5933_v59 = vcombine.high %v5924_v19, %v5924_v19  ;;  %v5936_v15 = vrot.slane %v516_v39, %v5324_v16 }
  0x85   : > { %v805_v60 = vcombine.high %v517_v49, %v517_v49  ;;  %v2585_v22 = vadd.f32 %v2577_v57, %v2557_v6  ;;  %v785_v21 = vrot.slane %v771_v34, %v5324_v16  ;;  %v786_v14 = vcombine.high %v778_v45, %v778_v45 }
  0x86   : > { %v5938_v41 = vld [vmem:[#allocation2 + $0xb0] sm:$0xff]  ;;  %v5943_v20 = vrot.slane %v788_v55, %v5324_v16  ;;  %v5945_v13 = vmin.f32 %v2709_v32, 6.0  ;;  %v803_v46 = vcombine.high %v5936_v15, %v5936_v15  ;;  %v5952_v27 = vrot.slane %v517_v49, %v5324_v16 }
  0x87   : > { %v2661_v37 = vmul.f32 %v5488_v23, %v5938_v41  ;;  %v2613_v25 = vadd.f32 %v2605_v30, %v2585_v22  ;;  %v787_v61 = vcombine.high %v785_v21, %v785_v21  ;;  %v5957_v48 = vrot.slane %v805_v60, %v5324_v16 }
  0x88   : > { %v804_v57 = vcombine.high %v5943_v20, %v5943_v20  ;;  %2748 = vperm.xlu1 %4874, %v5945_v13   ;;  %v5960_v42 = vld [vmem:[#allocation2 + $0x20] sm:$0xff]  ;;  %v5966_v52 = vcombine.high %v5952_v27, %v5952_v27  ;;  %v822_v35 = vcombine.high %v518_v44, %v518_v44  ;;  %v5969_v62 = vrot.slane %v518_v44, %v5324_v16 }
  0x89   : > { %v5962_v28 = vld [vmem:[#allocation2 + $0x21] sm:$0xff]  ;;  %v1210_v38 = vrot.slane %v778_v45, %v5309_v9  ;;  %v2633_v7 = vmul.f32 %v5477_v4, %v5960_v42  ;;  %v5978_v39 = vcombine.high %v5957_v48, %v5957_v48  ;;  %v1214_v3 = vrot.slane %v786_v14, %v5309_v9 }
  0x8a   : > { %v2689_v43 = vmul.f32 %v5531_v50, %v5962_v28  ;;  %v5982_v47 = vrot.slane %v822_v35, %v5324_v16  ;;  %v5986_v30 = vcombine.high %v5969_v62, %v5969_v62  ;;  %v1218_v49 = vrot.slane %v785_v21, %v5309_v9 }
  0x8b   : > { %v1222_v29 = vrot.slane %v787_v61, %v5309_v9  ;;  %v2641_v6 = vadd.f32 %v2633_v7, %v2613_v25  ;;  %v1226_v34 = vrot.slane %v5936_v15, %v5309_v9  ;;  %v1230_v55 = vrot.slane %v803_v46, %v5309_v9 }
  0x8c   : > { %v1234_v32 = vrot.slane %v5943_v20, %v5309_v9  ;;  %v7633_v60 = vmov 1   ;;  %v5998_v22 = vcombine.high %v5982_v47, %v5982_v47  ;;  %v1238_v44 = vrot.slane %v804_v57, %v5309_v9 }
  0x8d   : > { %4875 = vset.pattern.permute.xlu1 %v7633_v60  ;;  %v1395_v35 = vsel %vm1367_vm2, %v1214_v3, %v1210_v38  ;;  %v1546_v25 = vrot.slane %v778_v45, %v5312_v10  ;;  %v2669_v7 = vadd.f32 %v2661_v37, %v2641_v6  ;;  %v1550_v18 = vrot.slane %v786_v14, %v5312_v10 }
  0x8e   : > { %v1396_v58 = vsel %vm1369_vm3, %v1218_v49, %v1395_v35  ;;  %v1554_v17 = vrot.slane %v785_v21, %v5312_v10  ;;  %v1558_v11 = vrot.slane %v787_v61, %v5312_v10  ;;  %v1562_v60 = vrot.slane %v5936_v15, %v5312_v10 }
  0x8f   : > { %v1397_v12 = vsel %vm1371_vm4, %v1222_v29, %v1396_v58  ;;  %v1566_v8 = vrot.slane %v803_v46, %v5312_v10  ;;  %v2697_v0 = vadd.f32 %v2689_v43, %v2669_v7  ;;  %v1570_v45 = vrot.slane %v5943_v20, %v5312_v10 }
  0x90   : > { %v1398_v38 = vsel %vm1373_vm5, %v1226_v34, %v1397_v12  ;;  %v1574_v37 = vrot.slane %v804_v57, %v5312_v10  ;;  %v1721_v21 = vsel %vm1369_vm3, %v1550_v18, %v1546_v25  ;;  %v1851_v58 = vrot.slane %v5899_v40, %v5309_v9 }
  0x91   : > { %v1399_v14 = vsel %vm1375_vm6, %v1230_v55, %v1398_v38  ;;  %v1855_v15 = vrot.slane %v5916_v31, %v5309_v9  ;;  %v2705_v61 = vmax.f32 %v2697_v0, 0.0  ;;  %v1722_v12 = vsel %vm1371_vm4, %v1554_v17, %v1721_v21 }
  0x92   : > { %v1400_v46 = vsel %vm1377_vm7, %v1234_v32, %v1399_v14  ;;  %1775 = vst.msk [vmem:[#allocation2 + $0x158] sm:$0x1] %vm443_vm1, %v1574_v37  ;;  %v1859_v20 = vrot.slane %v5905_v33, %v5309_v9  ;;  %v1723_v18 = vsel %vm1373_vm5, %v1558_v11, %v1722_v12  ;;  %v1863_v43 = vrot.slane %v5921_v56, %v5309_v9 }
  0x93   : > { %v1401_v57 = vsel %vm1379_vm8, %v1238_v44, %v1400_v46  ;;  %v1867_v3 = vrot.slane %v5908_v2, %v5309_v9  ;;  %v2713_v0 = vmin.f32 %v2705_v61, 6.0  ;;  %v1724_v17 = vsel %vm1375_vm6, %v1562_v60, %v1723_v18 }
  0x94   : > { %1442 = vst.msk [vmem:[#allocation2 + $0x1e0] sm:$0xff] %vm441_vm0, %v1401_v57  ;;  %v1871_v49 = vrot.slane %v5928_v1, %v5309_v9  ;;  %v1875_v29 = vrot.slane %v5924_v19, %v5309_v9  ;;  %v1725_v6 = vsel %vm1377_vm7, %v1566_v8, %v1724_v17  ;;  %v1879_v11 = vrot.slane %v5933_v59, %v5309_v9 }
  0x95   : > { %v1883_v34 = vrot.slane %v5952_v27, %v5309_v9  ;;  %v1887_v55 = vrot.slane %v5966_v52, %v5309_v9  ;;  %2728 = vperm.xlu0 %4873, %v2713_v0   ;;  %2778 = vperm.xlu1 %4875, %v2713_v0   ;;  %v1726_v32 = vsel %vm1379_vm8, %v1570_v45, %v1725_v6  ;;  %vm5113_vm14 = vmmov 0  }
  0x96   : > { %v1891_v60 = vrot.slane %v5957_v48, %v5309_v9  ;;  %v1895_v44 = vrot.slane %v5978_v39, %v5309_v9  ;;  %1774 = vst.msk [vmem:[#allocation2 + $0x150] sm:$0xfe] %vm1767_vm9, %v1726_v32  ;;  %v1899_v8 = vrot.slane %v5969_v62, %v5309_v9  ;;  %v1903_v35 = vrot.slane %v5986_v30, %v5309_v9  ;;  %v511_v32 = vld [vmem:[%s5306_s28 + $0x40] sm:$0xff] }
  0x97   : > { %v1907_v25 = vrot.slane %v5982_v47, %v5309_v9  ;;  %v1911_v7 = vrot.slane %v5998_v22, %v5309_v9  ;;  %v2054_v38 = vsel %vm1367_vm2, %v1855_v15, %v1851_v58  ;;  %v2061_v45 = vsel %vm1367_vm2, %v1887_v55, %v1883_v34 }
  0x98   : > { %v2180_v37 = vrot.slane %v5899_v40, %v5312_v10  ;;  %v2184_v14 = vrot.slane %v5916_v31, %v5312_v10  ;;  %v2055_v21 = vsel %vm1369_vm3, %v1859_v20, %v2054_v38  ;;  %v2062_v61 = vsel %vm1369_vm3, %v1891_v60, %v2061_v45 }
  0x99   : > { %v2188_v46 = vrot.slane %v5905_v33, %v5312_v10  ;;  %v2192_v12 = vrot.slane %v5921_v56, %v5312_v10  ;;  %v2056_v58 = vsel %vm1371_vm4, %v1863_v43, %v2055_v21  ;;  %v2063_v15 = vsel %vm1371_vm4, %v1895_v44, %v2062_v61  ;;  %2794 = vperm.xlu1 %4875, %v5945_v13  }
  0x9a   : > { %v2196_v40 = vrot.slane %v5908_v2, %v5312_v10  ;;  %v2200_v31 = vrot.slane %v5928_v1, %v5312_v10  ;;  %v2057_v20 = vsel %vm1373_vm5, %v1867_v3, %v2056_v58  ;;  %v2064_v57 = vsel %vm1373_vm5, %v1899_v8, %v2063_v15 }
  0x9b   : > { %v2204_v33 = vrot.slane %v5924_v19, %v5312_v10  ;;  %v2208_v56 = vrot.slane %v5933_v59, %v5312_v10  ;;  %v2058_v18 = vsel %vm1375_vm6, %v1871_v49, %v2057_v20  ;;  %v2065_v43 = vsel %vm1375_vm6, %v1903_v35, %v2064_v57  ;;  %v2567_v49 = vld [vmem:[#allocation2 + $0x1e0] sm:$0xff] }
  0x9c   : > { %v2212_v2 = vrot.slane %v5952_v27, %v5312_v10  ;;  %v2216_v1 = vrot.slane %v5966_v52, %v5312_v10  ;;  %v2059_v3 = vsel %vm1377_vm7, %v1875_v29, %v2058_v18  ;;  %v2066_v17 = vsel %vm1377_vm7, %v1907_v25, %v2065_v43 }
  0x9d   : > { %v2220_v19 = vrot.slane %v5957_v48, %v5312_v10  ;;  %v2224_v59 = vrot.slane %v5978_v39, %v5312_v10  ;;  %2439 = vst.msk [vmem:[#allocation2 + $0x38] sm:$0x1] %vm443_vm1, %v2208_v56  ;;  %v2060_v6 = vsel %vm1379_vm8, %v1879_v11, %v2059_v3  ;;  %v2067_v27 = vsel %vm1379_vm8, %v1911_v7, %v2066_v17  ;;  %v2539_v34 = vld [vmem:[#allocation2 + $0x150] sm:$0xff] }
  0x9e   : > { %v2228_v52 = vrot.slane %v5969_v62, %v5312_v10  ;;  %v2232_v29 = vrot.slane %v5986_v30, %v5312_v10  ;;  %v2595_v55 = vld [vmem:[#allocation2 + $0x151] sm:$0xff]  ;;  %v7634_v48 = vmov 2   ;;  %2107 = vst.msk [vmem:[#allocation2 + $0xc0] sm:$0xff] %vm441_vm0, %v2060_v6  ;;  %2108 = vst.msk [vmem:[#allocation2 + $0xd0] sm:$0xff] %vm441_vm0, %v2067_v27  ;;  %v2236_v39 = vrot.slane %v5982_v47, %v5312_v10  ;;  %v512_v30 = vld [vmem:[%s5306_s28 + $0x48] sm:$0xff] }
  0x9f   : > { %4877 = vset.pattern.permute.xlu1 %v7634_v48  ;;  %v2240_v11 = vrot.slane %v5998_v22, %v5312_v10  ;;  %v2381_v62 = vsel %vm1369_vm3, %v2184_v14, %v2180_v37  ;;  %v2387_v60 = vsel %vm1369_vm3, %v2216_v1, %v2212_v2  ;;  %v6117_v35 = vmul.f32 %v5457_v53, %v2539_v34 }
  0xa0   : > { %2830 = vperm.xlu1 %4877, %v2713_v0   ;;  %v2382_v44 = vsel %vm1371_vm4, %v2188_v46, %v2381_v62  ;;  %v2388_v8 = vsel %vm1371_vm4, %v2220_v19, %v2387_v60  ;;  %v6120_v25 = vmul.f32 %v5461_v54, %v2567_v49  ;;  %v6126_v7 = vmul.f32 %v5473_v63, %v2595_v55 }
  0xa1   : > { %v2383_v47 = vsel %vm1373_vm5, %v2192_v12, %v2382_v44  ;;  %v2389_v22 = vsel %vm1373_vm5, %v2224_v59, %v2388_v8  ;;  %2441 = vst.msk [vmem:[#allocation2 + $0x48] sm:$0x1] %vm443_vm1, %v2240_v11  ;;  %v703_v0 = vcombine.high %v511_v32, %v511_v32  ;;  %v710_v37 = vrot.slane %v511_v32, %v5324_v16 }
  0xa2   : > { %v2384_v38 = vsel %vm1375_vm6, %v2196_v40, %v2383_v47  ;;  %v2390_v45 = vsel %vm1375_vm6, %v2228_v52, %v2389_v22  ;;  %v720_v14 = vcombine.high %v512_v30, %v512_v30  ;;  %v727_v12 = vrot.slane %v512_v30, %v5324_v16 }
  0xa3   : > { %v2385_v21 = vsel %vm1377_vm7, %v2200_v31, %v2384_v38  ;;  %v2391_v61 = vsel %vm1377_vm7, %v2232_v29, %v2390_v45  ;;  %v717_v46 = vrot.slane %v703_v0, %v5324_v16  ;;  %v718_v40 = vcombine.high %v710_v37, %v710_v37 }
  0xa4   : > { %2846 = vperm.xlu1 %4877, %v5945_v13   ;;  %v2386_v58 = vsel %vm1379_vm8, %v2204_v33, %v2385_v21  ;;  %v2392_v15 = vsel %vm1379_vm8, %v2236_v39, %v2391_v61  ;;  %v6139_v20 = vrot.slane %v720_v14, %v5324_v16  ;;  %v735_v57 = vcombine.high %v727_v12, %v727_v12 }
  0xa5   : > { %2438 = vst.msk [vmem:[#allocation2 + $0x30] sm:$0xfe] %vm1767_vm9, %v2386_v58  ;;  %2440 = vst.msk [vmem:[#allocation2 + $0x40] sm:$0xfe] %vm1767_vm9, %v2392_v15  ;;  %v719_v31 = vcombine.high %v717_v46, %v717_v46  ;;  %v1178_v13 = vrot.slane %v710_v37, %v5309_v9  ;;  %v1186_v56 = vrot.slane %v717_v46, %v5309_v9  ;;  %v2483_v18 = vld [vmem:[#allocation2 + $0xc0] sm:$0xff]  ;;  %v6145_v43 = vld [vmem:[#allocation2 + $0xd0] sm:$0xff] }
  0xa6   : > { %v736_v33 = vcombine.high %v6139_v20, %v6139_v20  ;;  %v1182_v2 = vrot.slane %v718_v40, %v5309_v9  ;;  %v1194_v1 = vrot.slane %v727_v12, %v5309_v9  ;;  %v1202_v3 = vrot.slane %v6139_v20, %v5309_v9  ;;  %v519_v15 = vld [vmem:[%s5306_s28 + $0x80] sm:$0xff] }
  0xa7   : > { %v2495_v17 = vmul.f32 %v5446_v36, %v2483_v18  ;;  %v6156_v19 = vmul.f32 %v5488_v23, %v6145_v43  ;;  %v1190_v59 = vrot.slane %v719_v31, %v5309_v9  ;;  %v1198_v49 = vrot.slane %v735_v57, %v5309_v9 }
  0xa8   : > { %4880 = vset.pattern.permute.xlu1 %v7630_v5  ;;  %v1206_v6 = vrot.slane %v736_v33, %v5309_v9  ;;  %v1388_v27 = vsel %vm1367_vm2, %v1182_v2, %v1178_v13  ;;  %v1514_v52 = vrot.slane %v710_v37, %v5312_v10  ;;  %v1518_v29 = vrot.slane %v718_v40, %v5312_v10 }
  0xa9   : > { %v1389_v34 = vsel %vm1369_vm3, %v1186_v56, %v1388_v27  ;;  %v1522_v55 = vrot.slane %v717_v46, %v5312_v10  ;;  %v1526_v32 = vrot.slane %v719_v31, %v5312_v10  ;;  %v1530_v39 = vrot.slane %v727_v12, %v5312_v10 }
  0xaa   : > { %v1390_v11 = vsel %vm1371_vm4, %v1190_v59, %v1389_v34  ;;  %v1534_v62 = vrot.slane %v735_v57, %v5312_v10  ;;  %v1538_v60 = vrot.slane %v6139_v20, %v5312_v10  ;;  %v1542_v30 = vrot.slane %v736_v33, %v5312_v10  ;;  %v520_v57 = vld [vmem:[%s5306_s28 + $0x88] sm:$0xff] }
  0xab   : > { %v1391_v44 = vsel %vm1373_vm5, %v1194_v1, %v1390_v11  ;;  %v1715_v8 = vsel %vm1369_vm3, %v1518_v29, %v1514_v52  ;;  %v2466_v47 = vmul.f32 %v5960_v42, %v5338_v24  ;;  %v2494_v22 = vmul.f32 %v5938_v41, %v5446_v36 }
  0xac   : > { %v2455_v0 = vld [vmem:[#allocation2 + $0x30] sm:$0xff]  ;;  %v6180_v45 = vld [vmem:[#allocation2 + $0x40] sm:$0xff]  ;;  %v1392_v37 = vsel %vm1375_vm6, %v1198_v49, %v1391_v44  ;;  %v1716_v14 = vsel %vm1371_vm4, %v1522_v55, %v1715_v8  ;;  %1773 = vst.msk [vmem:[#allocation2 + $0x148] sm:$0x1] %vm443_vm1, %v1542_v30  ;;  %v2522_v21 = vmul.f32 %v5962_v28, %v5450_v51  ;;  %v6188_v61 = vmul.f32 %v5488_v23, %v2483_v18 }
  0xad   : > { %v2511_v38 = vld [vmem:[#allocation2 + $0x31] sm:$0xff]  ;;  %v2467_v42 = vmul.f32 %v5338_v24, %v2455_v0  ;;  %v2635_v46 = vmul.f32 %v5477_v4, %v6180_v45  ;;  %v6194_v12 = vld [vmem:[#allocation2 + $0x41] sm:$0xff]  ;;  %v1393_v58 = vsel %vm1377_vm7, %v1202_v3, %v1392_v37  ;;  %v1717_v20 = vsel %vm1373_vm5, %v1526_v32, %v1716_v14 }
  0xae   : > { %v2523_v41 = vmul.f32 %v5450_v51, %v2511_v38  ;;  %v6200_v40 = vmul.f32 %v5531_v50, %v6194_v12  ;;  %v1394_v28 = vsel %vm1379_vm8, %v1206_v6, %v1393_v58  ;;  %v2502_v31 = vadd.f32 %v2494_v22, %v2466_v47 }
  0xaf   : > { %v2503_v13 = vadd.f32 %v2495_v17, %v2467_v42  ;;  %1441 = vst.msk [vmem:[#allocation2 + $0x1d0] sm:$0xff] %vm441_vm0, %v1394_v28  ;;  %v1718_v56 = vsel %vm1375_vm6, %v1530_v39, %v1717_v20  ;;  %v6208_v18 = vmul.f32 %v5477_v4, %v2455_v0  ;;  %v6211_v33 = vmul.f32 %v5531_v50, %v2511_v38 }
  0xb0   : > { %v1719_v2 = vsel %vm1377_vm7, %v1534_v62, %v1718_v56  ;;  %v2530_v1 = vadd.f32 %v2522_v21, %v2502_v31  ;;  %v839_v3 = vcombine.high %v519_v15, %v519_v15  ;;  %v846_v59 = vrot.slane %v519_v15, %v5324_v16 }
  0xb1   : > { %v2531_v49 = vadd.f32 %v2523_v41, %v2503_v13  ;;  %v1720_v6 = vsel %vm1379_vm8, %v1538_v60, %v1719_v2  ;;  %v856_v17 = vcombine.high %v520_v57, %v520_v57  ;;  %v863_v27 = vrot.slane %v520_v57, %v5324_v16 }
  0xb2   : > { %1772 = vst.msk [vmem:[#allocation2 + $0x140] sm:$0xfe] %vm1767_vm9, %v1720_v6  ;;  %v853_v52 = vrot.slane %v839_v3, %v5324_v16  ;;  %v854_v29 = vcombine.high %v846_v59, %v846_v59  ;;  %v1242_v50 = vrot.slane %v846_v59, %v5309_v9  ;;  %v1578_v34 = vrot.slane %v846_v59, %v5312_v10 }
  0xb3   : > { %v2559_v55 = vadd.f32 %v6117_v35, %v2531_v49  ;;  %v870_v32 = vrot.slane %v856_v17, %v5324_v16  ;;  %v871_v39 = vcombine.high %v863_v27, %v863_v27  ;;  %v1258_v11 = vrot.slane %v863_v27, %v5309_v9 }
  0xb4   : > { %v855_v62 = vcombine.high %v853_v52, %v853_v52  ;;  %v1246_v60 = vrot.slane %v854_v29, %v5309_v9  ;;  %v1250_v30 = vrot.slane %v853_v52, %v5309_v9  ;;  %v1582_v44 = vrot.slane %v854_v29, %v5312_v10 }
  0xb5   : > { %v2587_v8 = vadd.f32 %v6120_v25, %v2559_v55  ;;  %v872_v47 = vcombine.high %v870_v32, %v870_v32  ;;  %v1262_v22 = vrot.slane %v871_v39, %v5309_v9  ;;  %v1266_v0 = vrot.slane %v870_v32, %v5309_v9 }
  0xb6   : > { %v2566_v35 = vld [vmem:[#allocation2 + $0x1d0] sm:$0xff]  ;;  %v1254_v38 = vrot.slane %v855_v62, %v5309_v9  ;;  %v1402_v37 = vsel %vm1367_vm2, %v1246_v60, %v1242_v50  ;;  %v1586_v14 = vrot.slane %v853_v52, %v5312_v10  ;;  %v1590_v21 = vrot.slane %v855_v62, %v5312_v10 }
  0xb7   : > { %v2615_v42 = vadd.f32 %v6126_v7, %v2587_v8  ;;  %v2578_v41 = vmul.f32 %v5461_v54, %v2566_v35  ;;  %v1270_v25 = vrot.slane %v872_v47, %v5309_v9  ;;  %v1403_v58 = vsel %vm1369_vm3, %v1250_v30, %v1402_v37  ;;  %v529_v8 = vld [vmem:[%s5306_s28 + $0xd0] sm:$0xff] }
  0xb8   : > { %v1404_v15 = vsel %vm1371_vm4, %v1254_v38, %v1403_v58  ;;  %v1594_v28 = vrot.slane %v863_v27, %v5312_v10  ;;  %v1598_v20 = vrot.slane %v871_v39, %v5312_v10  ;;  %v1602_v31 = vrot.slane %v870_v32, %v5312_v10  ;;  %v527_v39 = vld [vmem:[%s5306_s28 + $0xc0] sm:$0xff] }
  0xb9   : > { %v2643_v57 = vadd.f32 %v2635_v46, %v2615_v42  ;;  %v2538_v13 = vld [vmem:[#allocation2 + $0x140] sm:$0xff]  ;;  %v1405_v2 = vsel %vm1373_vm5, %v1258_v11, %v1404_v15  ;;  %v1606_v7 = vrot.slane %v872_v47, %v5312_v10  ;;  %v1727_v3 = vsel %vm1369_vm3, %v1582_v44, %v1578_v34  ;;  %v7635_v44 = vld [vmem:[#allocation23_spill] sm:$0xff] }
  0xba   : > { %v2594_v56 = vld [vmem:[#allocation2 + $0x141] sm:$0xff]  ;;  %v2550_v59 = vmul.f32 %v5457_v53, %v2538_v13  ;;  %v1406_v6 = vsel %vm1375_vm6, %v1262_v22, %v1405_v2  ;;  %v1728_v17 = vsel %vm1371_vm4, %v1586_v14, %v1727_v3  ;;  %v2468_v29 = vmul.f32 %v6180_v45, %v5338_v24  ;;  %v530_v14 = vld [vmem:[%s5306_s28 + $0xd8] sm:$0xff] }
  0xbb   : > { %v2606_v49 = vmul.f32 %v5473_v63, %v2594_v56  ;;  %v2671_v46 = vadd.f32 %v6156_v19, %v2643_v57  ;;  %v1407_v27 = vsel %vm1377_vm7, %v1266_v0, %v1406_v6  ;;  %v1729_v52 = vsel %vm1373_vm5, %v1590_v21, %v1728_v17  ;;  %1777 = vst.msk [vmem:[#allocation2 + $0x168] sm:$0x1] %vm443_vm1, %v1606_v7 }
  0xbc   : > { %v2558_v50 = vadd.f32 %v2550_v59, %v2530_v1  ;;  %v1408_v34 = vsel %vm1379_vm8, %v1270_v25, %v1407_v27  ;;  %v1730_v55 = vsel %vm1375_vm6, %v1594_v28, %v1729_v52  ;;  %v2496_v32 = vmul.f32 %v6145_v43, %v5446_v36  ;;  %v528_v1 = vld [vmem:[%s5306_s28 + $0xc8] sm:$0xff] }
  0xbd   : > { %v2699_v19 = vadd.f32 %v6200_v40, %v2671_v46  ;;  %1443 = vst.msk [vmem:[#allocation2 + $0x1f0] sm:$0xff] %vm441_vm0, %v1408_v34  ;;  %v1731_v11 = vsel %vm1377_vm7, %v1598_v20, %v1730_v55  ;;  %v2524_v62 = vmul.f32 %v6194_v12, %v5450_v51  ;;  %v6267_v45 = vmul.f32 %v5477_v4, %v5808_v26  ;;  %v6280_v12 = vld [vmem:[%s7622_s1 + $0x8] ss:$0 sm:$0xff]  ;;  %v7636_v26 = vld [vmem:[#allocation24_spill] sm:$0xff]  ;;  %s4529_s1 = sshll.u32 %s7243_s17, 4  ;;  %s7425_s1 = int_to_ptr.vmem [resolvable:$true] %s4529_s1 }
  0xbe   : > { %v2586_v60 = vadd.f32 %v2578_v41, %v2558_v50  ;;  %v1732_v30 = vsel %vm1379_vm8, %v1602_v31, %v1731_v11  ;;  %v2504_v43 = vadd.f32 %v2496_v32, %v2468_v29  ;;  %v6273_v40 = vmul.f32 %v5488_v23, %v7635_v44 }
  0xbf   : > { %v2707_v47 = vmax.f32 %v2699_v19, 0.0  ;;  %1776 = vst.msk [vmem:[#allocation2 + $0x160] sm:$0xfe] %vm1767_vm9, %v1732_v30  ;;  %v6284_v22 = vmul.f32 %v6280_v12, %v7636_v26  ;;  %v975_v0 = vcombine.high %v527_v39, %v527_v39  ;;  %v982_v35 = vrot.slane %v527_v39, %v5324_v16 }
  0xc0   : > { %v2614_v38 = vadd.f32 %v2606_v49, %v2586_v60  ;;  %v2532_v37 = vadd.f32 %v2524_v62, %v2504_v43  ;;  %v992_v21 = vcombine.high %v528_v1, %v528_v1  ;;  %v6289_v42 = vrot.slane %v528_v1, %v5324_v16 }
  0xc1   : > { %v2715_v41 = vmin.f32 %v2707_v47, 6.0  ;;  %v989_v25 = vrot.slane %v975_v0, %v5324_v16  ;;  %v990_v58 = vcombine.high %v982_v35, %v982_v35  ;;  %v1009_v15 = vcombine.high %v529_v8, %v529_v8 }
  0xc2   : > { %v2642_v28 = vadd.f32 %v6208_v18, %v2614_v38  ;;  %v6294_v20 = vrot.slane %v992_v21, %v5324_v16  ;;  %v6298_v31 = vcombine.high %v6289_v42, %v6289_v42  ;;  %v6301_v57 = vrot.slane %v529_v8, %v5324_v16 }
  0xc3   : > { %2738 = vperm.xlu0 %4873, %v2715_v41   ;;  %v991_v13 = vcombine.high %v989_v25, %v989_v25  ;;  %v6304_v56 = vrot.slane %v1009_v15, %v5324_v16  ;;  %v1026_v2 = vcombine.high %v530_v14, %v530_v14  ;;  %v6307_v7 = vrot.slane %v530_v14, %v5324_v16 }
  0xc4   : > { %v2670_v18 = vadd.f32 %v6188_v61, %v2642_v28  ;;  %v2568_v3 = vld [vmem:[#allocation2 + $0x1f0] sm:$0xff]  ;;  %v1008_v59 = vcombine.high %v6294_v20, %v6294_v20  ;;  %v6314_v49 = vcombine.high %v6301_v57, %v6301_v57  ;;  %v1306_v6 = vrot.slane %v982_v35, %v5309_v9 }
  0xc5   : > { %v2580_v17 = vmul.f32 %v5461_v54, %v2568_v3  ;;  %v6320_v46 = vcombine.high %v6304_v56, %v6304_v56  ;;  %v6323_v27 = vrot.slane %v1026_v2, %v5324_v16  ;;  %v6327_v61 = vcombine.high %v6307_v7, %v6307_v7 }
  0xc6   : > { %v2698_v52 = vadd.f32 %v6211_v33, %v2670_v18  ;;  %v2540_v29 = vld [vmem:[#allocation2 + $0x160] sm:$0xff]  ;;  %v1310_v34 = vrot.slane %v990_v58, %v5309_v9  ;;  %v1314_v55 = vrot.slane %v989_v25, %v5309_v9  ;;  %v1318_v32 = vrot.slane %v991_v13, %v5309_v9 }
  0xc7   : > { %v2596_v50 = vld [vmem:[#allocation2 + $0x161] sm:$0xff]  ;;  %v7637_v39 = vmov 1   ;;  %v2552_v19 = vmul.f32 %v5457_v53, %v2540_v29  ;;  %v6338_v62 = vcombine.high %v6323_v27, %v6323_v27  ;;  %v1322_v33 = vrot.slane %v6289_v42, %v5309_v9 }
  0xc8   : > { %4876 = vset.pattern.permute.xlu0 %v7637_v39  ;;  %v2608_v11 = vmul.f32 %v5473_v63, %v2596_v50  ;;  %v2706_v1 = vmax.f32 %v2698_v52, 0.0  ;;  %v1326_v60 = vrot.slane %v6298_v31, %v5309_v9  ;;  %v1330_v30 = vrot.slane %v6294_v20, %v5309_v9 }
  0xc9   : > { %2786 = vperm.xlu0 %4876, %v2715_v41   ;;  %v1334_v43 = vrot.slane %v1008_v59, %v5309_v9  ;;  %v2560_v44 = vadd.f32 %v2552_v19, %v2532_v37  ;;  %v1416_v8 = vsel %vm1367_vm2, %v1310_v34, %v1306_v6  ;;  %v1642_v47 = vrot.slane %v982_v35, %v5312_v10 }
  0xca   : > { %v1646_v26 = vrot.slane %v990_v58, %v5312_v10  ;;  %v6350_v0 = vmin.f32 %v2706_v1, 6.0  ;;  %v1417_v38 = vsel %vm1369_vm3, %v1314_v55, %v1416_v8  ;;  %v1650_v14 = vrot.slane %v989_v25, %v5312_v10 }
  0xcb   : > { %v1654_v21 = vrot.slane %v991_v13, %v5312_v10  ;;  %v2588_v15 = vadd.f32 %v2580_v17, %v2560_v44  ;;  %v1418_v28 = vsel %vm1371_vm4, %v1318_v32, %v1417_v38  ;;  %v1658_v37 = vrot.slane %v6289_v42, %v5312_v10  ;;  %v2458_v44 = vld [vmem:[#allocation2 + $0x60] sm:$0xff] }
  0xcc   : > { %v1662_v2 = vrot.slane %v6298_v31, %v5312_v10  ;;  %v1419_v35 = vsel %vm1373_vm5, %v1322_v33, %v1418_v28  ;;  %v1666_v58 = vrot.slane %v6294_v20, %v5312_v10  ;;  %v1670_v25 = vrot.slane %v1008_v59, %v5312_v10 }
  0xcd   : > { %4878 = vset.pattern.permute.xlu0 %v7634_v48  ;;  %v1739_v13 = vsel %vm1369_vm3, %v1646_v26, %v1642_v47  ;;  %v2616_v18 = vadd.f32 %v2608_v11, %v2588_v15  ;;  %v1420_v3 = vsel %vm1375_vm6, %v1326_v60, %v1419_v35  ;;  %v1979_v31 = vrot.slane %v6301_v57, %v5309_v9  ;;  %v531_v15 = vld [vmem:[%s5306_s28 + $0xe0] sm:$0xff]  ;;  %v532_v35 = vld [vmem:[%s5306_s28 + $0xe8] sm:$0xff] }
  0xce   : > { %2838 = vperm.xlu0 %4878, %v2715_v41   ;;  %v1740_v42 = vsel %vm1371_vm4, %v1650_v14, %v1739_v13  ;;  %v1421_v6 = vsel %vm1377_vm7, %v1330_v30, %v1420_v3  ;;  %1781 = vst.msk [vmem:[#allocation2 + $0x188] sm:$0x1] %vm443_vm1, %v1670_v25  ;;  %v1983_v20 = vrot.slane %v6314_v49, %v5309_v9  ;;  %v2486_v14 = vld [vmem:[#allocation2 + $0xf0] sm:$0xff]  ;;  %vm3241_vm15 = vcmask 261120  }
  0xcf   : > { %v1741_v17 = vsel %vm1373_vm5, %v1654_v21, %v1740_v42  ;;  %v1987_v41 = vrot.slane %v6304_v56, %v5309_v9  ;;  %v2644_v59 = vadd.f32 %v6267_v45, %v2616_v18  ;;  %v1422_v52 = vsel %vm1379_vm8, %v1334_v43, %v1421_v6  ;;  %v2514_v21 = vld [vmem:[#allocation2 + $0x61] sm:$0xff] }
  0xd0   : > { %v1742_v29 = vsel %vm1375_vm6, %v1658_v37, %v1741_v17  ;;  %v1991_v50 = vrot.slane %v6320_v46, %v5309_v9  ;;  %1445 = vst.msk [vmem:[#allocation2 + $0x210] sm:$0xff] %vm441_vm0, %v1422_v52  ;;  %v1995_v55 = vrot.slane %v6307_v7, %v5309_v9  ;;  %v1999_v32 = vrot.slane %v6327_v61, %v5309_v9  ;;  %v533_v17 = vld [vmem:[%s5306_s28 + $0xf0] sm:$0xff] }
  0xd1   : > { %v1743_v34 = vsel %vm1377_vm7, %v1662_v2, %v1742_v29  ;;  %v2003_v45 = vrot.slane %v6323_v27, %v5309_v9  ;;  %v2672_v19 = vadd.f32 %v6273_v40, %v2644_v59  ;;  %v2007_v33 = vrot.slane %v6338_v62, %v5309_v9  ;;  %v534_v29 = vld [vmem:[%s5306_s28 + $0xf8] sm:$0xff]  ;;  %s5115_s28 = smov 64  }
  0xd2   : > { %4879 = vset.pattern.permute.xlu0 %v7630_v5  ;;  %v1744_v11 = vsel %vm1379_vm8, %v1666_v58, %v1743_v34  ;;  %v2082_v1 = vsel %vm1367_vm2, %v1983_v20, %v1979_v31  ;;  %v2308_v30 = vrot.slane %v6301_v57, %v5312_v10  ;;  %v2312_v40 = vrot.slane %v6314_v49, %v5312_v10 }
  0xd3   : > { %2733 = vperm.xlu0 %4879, %v6350_v0   ;;  %1780 = vst.msk [vmem:[#allocation2 + $0x180] sm:$0xfe] %vm1767_vm9, %v1744_v11  ;;  %v2083_v60 = vsel %vm1369_vm3, %v1987_v41, %v2082_v1  ;;  %v2316_v43 = vrot.slane %v6304_v56, %v5312_v10  ;;  %v2700_v8 = vadd.f32 %v6284_v22, %v2672_v19 }
  0xd4   : > { %v2084_v47 = vsel %vm1371_vm4, %v1991_v50, %v2083_v60  ;;  %v2320_v26 = vrot.slane %v6320_v46, %v5312_v10  ;;  %v2324_v38 = vrot.slane %v6307_v7, %v5312_v10  ;;  %v2328_v49 = vrot.slane %v6327_v61, %v5312_v10 }
  0xd5   : > { %v2085_v57 = vsel %vm1373_vm5, %v1995_v55, %v2084_v47  ;;  %v2332_v56 = vrot.slane %v6323_v27, %v5312_v10  ;;  %v2336_v22 = vrot.slane %v6338_v62, %v5312_v10  ;;  %v2708_v28 = vmax.f32 %v2700_v8, 0.0 }
  0xd6   : > { %v2086_v46 = vsel %vm1375_vm6, %v1999_v32, %v2085_v57  ;;  %v2405_v7 = vsel %vm1369_vm3, %v2312_v40, %v2308_v30  ;;  %v2470_v37 = vmul.f32 %v5338_v24, %v2458_v44  ;;  %v2498_v27 = vmul.f32 %v5446_v36, %v2486_v14 }
  0xd7   : > { %4882 = vset.pattern.permute.xlu0 %v7637_v39  ;;  %v2087_v2 = vsel %vm1377_vm7, %v2003_v45, %v2086_v46  ;;  %v2406_v61 = vsel %vm1371_vm4, %v2316_v43, %v2405_v7  ;;  %2447 = vst.msk [vmem:[#allocation2 + $0x78] sm:$0x1] %vm443_vm1, %v2336_v22  ;;  %v2526_v62 = vmul.f32 %v5450_v51, %v2514_v21  ;;  %v6429_v58 = vmin.f32 %v2708_v28, 6.0  ;;  %v2570_v18 = vld [vmem:[#allocation2 + $0x210] sm:$0xff] }
  0xd8   : > { %v2088_v25 = vsel %vm1379_vm8, %v2007_v33, %v2087_v2  ;;  %v2407_v13 = vsel %vm1373_vm5, %v2320_v26, %v2406_v61  ;;  %v1043_v3 = vcombine.high %v531_v15, %v531_v15  ;;  %v2506_v31 = vadd.f32 %v2498_v27, %v2470_v37 }
  0xd9   : > { %2111 = vst.msk [vmem:[#allocation2 + $0x100] sm:$0xff] %vm441_vm0, %v2088_v25  ;;  %v2408_v42 = vsel %vm1375_vm6, %v2324_v38, %v2407_v13  ;;  %v2582_v6 = vmul.f32 %v5461_v54, %v2570_v18  ;;  %v1050_v20 = vrot.slane %v531_v15, %v5324_v16  ;;  %2743 = vperm.xlu1 %4880, %v6429_v58  }
  0xda   : > { %v2409_v41 = vsel %vm1377_vm7, %v2328_v49, %v2408_v42  ;;  %v2542_v59 = vld [vmem:[#allocation2 + $0x180] sm:$0xff]  ;;  %v1057_v50 = vrot.slane %v1043_v3, %v5324_v16  ;;  %v1060_v34 = vcombine.high %v532_v35, %v532_v35  ;;  %v6443_v55 = vrot.slane %v532_v35, %v5324_v16 }
  0xdb   : > { %v2598_v52 = vld [vmem:[#allocation2 + $0x181] sm:$0xff]  ;;  %v2410_v32 = vsel %vm1379_vm8, %v2332_v56, %v2409_v41  ;;  %v2534_v45 = vadd.f32 %v2526_v62, %v2506_v31  ;;  %v2554_v19 = vmul.f32 %v5457_v53, %v2542_v59  ;;  %v1058_v33 = vcombine.high %v1050_v20, %v1050_v20 }
  0xdc   : > { %v2610_v11 = vmul.f32 %v5473_v63, %v2598_v52  ;;  %2446 = vst.msk [vmem:[#allocation2 + $0x70] sm:$0xfe] %vm1767_vm9, %v2410_v32  ;;  %v1059_v1 = vcombine.high %v1057_v50, %v1057_v50  ;;  %v6450_v60 = vrot.slane %v1060_v34, %v5324_v16  ;;  %v1075_v30 = vcombine.high %v6443_v55, %v6443_v55 }
  0xdd   : > { %v2562_v40 = vadd.f32 %v2554_v19, %v2534_v45  ;;  %v1077_v43 = vcombine.high %v533_v17, %v533_v17  ;;  %v6455_v44 = vrot.slane %v533_v17, %v5324_v16  ;;  %v1094_v8 = vcombine.high %v534_v29, %v534_v29 }
  0xde   : > { %v1076_v47 = vcombine.high %v6450_v60, %v6450_v60  ;;  %v6460_v26 = vrot.slane %v534_v29, %v5324_v16  ;;  %v1338_v38 = vrot.slane %v1050_v20, %v5309_v9  ;;  %v1342_v14 = vrot.slane %v1058_v33, %v5309_v9 }
  0xdf   : > { %v2590_v21 = vadd.f32 %v2582_v6, %v2562_v40  ;;  %v6465_v57 = vrot.slane %v1077_v43, %v5324_v16  ;;  %v6469_v49 = vcombine.high %v6455_v44, %v6455_v44  ;;  %v6472_v56 = vrot.slane %v1094_v8, %v5324_v16 }
  0xe0   : > { %v6474_v22 = vld [vmem:[#allocation2 + $0x100] sm:$0xff]  ;;  %v6478_v15 = vcombine.high %v6460_v26, %v6460_v26  ;;  %v1346_v28 = vrot.slane %v1057_v50, %v5309_v9  ;;  %v1350_v46 = vrot.slane %v1059_v1, %v5309_v9  ;;  %v1354_v7 = vrot.slane %v6443_v55, %v5309_v9 }
  0xe1   : > { %v2618_v37 = vadd.f32 %v2610_v11, %v2590_v21  ;;  %v2666_v2 = vmul.f32 %v5488_v23, %v6474_v22  ;;  %v6488_v61 = vcombine.high %v6465_v57, %v6465_v57  ;;  %v6492_v27 = vcombine.high %v6472_v56, %v6472_v56 }
  0xe2   : > { %v1358_v62 = vrot.slane %v1075_v30, %v5309_v9  ;;  %v1362_v35 = vrot.slane %v6450_v60, %v5309_v9  ;;  %v1366_v25 = vrot.slane %v1076_v47, %v5309_v9  ;;  %v1423_v13 = vsel %vm1367_vm2, %v1342_v14, %v1338_v38 }
  0xe3   : > { %v2626_v18 = vld [vmem:[#allocation2 + $0x70] sm:$0xff]  ;;  %v1424_v42 = vsel %vm1369_vm3, %v1346_v28, %v1423_v13  ;;  %v1674_v31 = vrot.slane %v1050_v20, %v5312_v10  ;;  %v1678_v6 = vrot.slane %v1058_v33, %v5312_v10  ;;  %v1682_v17 = vrot.slane %v1057_v50, %v5312_v10 }
  0xe4   : > { %v6499_v3 = vld [vmem:[#allocation2 + $0x71] sm:$0xff]  ;;  %v2638_v41 = vmul.f32 %v5477_v4, %v2626_v18  ;;  %v1425_v52 = vsel %vm1371_vm4, %v1350_v46, %v1424_v42  ;;  %v1686_v29 = vrot.slane %v1059_v1, %v5312_v10  ;;  %v1690_v32 = vrot.slane %v6443_v55, %v5312_v10 }
  0xe5   : > { %v2694_v59 = vmul.f32 %v6280_v12, %v6499_v3  ;;  %v1426_v34 = vsel %vm1373_vm5, %v1354_v7, %v1425_v52  ;;  %v1694_v20 = vrot.slane %v1075_v30, %v5312_v10  ;;  %v1698_v45 = vrot.slane %v6450_v60, %v5312_v10 }
  0xe6   : > { %v2646_v50 = vadd.f32 %v2638_v41, %v2618_v37  ;;  %v1427_v19 = vsel %vm1375_vm6, %v1358_v62, %v1426_v34  ;;  %v1702_v11 = vrot.slane %v1076_v47, %v5312_v10  ;;  %v1745_v33 = vsel %vm1369_vm3, %v1678_v6, %v1674_v31  ;;  %v2724_v41 = vpop.permute.xlu1 %2723 }
  0xe7   : > { %v1428_v40 = vsel %vm1377_vm7, %v1362_v35, %v1427_v19  ;;  %v1746_v1 = vsel %vm1371_vm4, %v1682_v17, %v1745_v33  ;;  %v2011_v43 = vrot.slane %v6455_v44, %v5309_v9  ;;  %v2015_v55 = vrot.slane %v6469_v49, %v5309_v9  ;;  %v2775_v19 = vpop.permute.xlu0 %2774 }
  0xe8   : > { %v2674_v30 = vadd.f32 %v2666_v2, %v2646_v50  ;;  %v1429_v60 = vsel %vm1379_vm8, %v1366_v25, %v1428_v40  ;;  %v1747_v8 = vsel %vm1373_vm5, %v1686_v29, %v1746_v1  ;;  %1783 = vst.msk [vmem:[#allocation2 + $0x198] sm:$0x1] %vm443_vm1, %v1702_v11  ;;  %v2019_v47 = vrot.slane %v6465_v57, %v5309_v9  ;;  %v7639_v1 = vld [vmem:[#allocation17_spill] sm:$0xff] }
  0xe9   : > { %1446 = vst.msk [vmem:[#allocation2 + $0x220] sm:$0xff] %vm441_vm0, %v1429_v60  ;;  %v1748_v38 = vsel %vm1375_vm6, %v1690_v32, %v1747_v8  ;;  %v2023_v14 = vrot.slane %v6488_v61, %v5309_v9  ;;  %v2027_v21 = vrot.slane %v6460_v26, %v5309_v9  ;;  %v2031_v28 = vrot.slane %v6478_v15, %v5309_v9 }
  0xea   : > { %v2702_v46 = vadd.f32 %v2694_v59, %v2674_v30  ;;  %v1749_v7 = vsel %vm1377_vm7, %v1694_v20, %v1748_v38  ;;  %v2035_v37 = vrot.slane %v6472_v56, %v5309_v9  ;;  %v2039_v2 = vrot.slane %v6492_v27, %v5309_v9 }
  0xeb   : > { %v1750_v62 = vsel %vm1379_vm8, %v1698_v45, %v1749_v7  ;;  %v2089_v35 = vsel %vm1367_vm2, %v2015_v55, %v2011_v43  ;;  %v2340_v25 = vrot.slane %v6455_v44, %v5312_v10  ;;  %v2344_v13 = vrot.slane %v6469_v49, %v5312_v10 }
  0xec   : > { %v2710_v42 = vmax.f32 %v2702_v46, 0.0  ;;  %1782 = vst.msk [vmem:[#allocation2 + $0x190] sm:$0xfe] %vm1767_vm9, %v1750_v62  ;;  %v2090_v31 = vsel %vm1369_vm3, %v2019_v47, %v2089_v35  ;;  %v2348_v6 = vrot.slane %v6465_v57, %v5312_v10  ;;  %v2352_v17 = vrot.slane %v6488_v61, %v5312_v10 }
  0xed   : > { %v2091_v59 = vsel %vm1371_vm4, %v2023_v14, %v2090_v31  ;;  %v2356_v44 = vrot.slane %v6460_v26, %v5312_v10  ;;  %v2360_v49 = vrot.slane %v6478_v15, %v5312_v10  ;;  %v2364_v52 = vrot.slane %v6472_v56, %v5312_v10  ;;  %v2720_v56 = vld [vmem:[%s7638_s2] sm:$0x7]  ;;  %s4730_s2 = sshll.u32 %s7235_s15, 2 }
  0xee   : > { %v6562_v29 = vmin.f32 %v2710_v42, 6.0  ;;  %v2092_v34 = vsel %vm1373_vm5, %v2027_v21, %v2091_v59  ;;  %v2368_v57 = vrot.slane %v6492_v27, %v5312_v10  ;;  %v2411_v61 = vsel %vm1369_vm3, %v2344_v13, %v2340_v25 }
  0xef   : > { %v2093_v32 = vsel %vm1375_vm6, %v2031_v28, %v2092_v34  ;;  %v2412_v20 = vsel %vm1371_vm4, %v2348_v6, %v2411_v61  ;;  %v2471_v26 = vmul.f32 %v2626_v18, %v5338_v24  ;;  %v2499_v15 = vmul.f32 %v6474_v22, %v5446_v36 }
  0xf0   : > { %2798 = vperm.xlu0 %4882, %v6562_v29   ;;  %2753 = vperm.xlu1 %4880, %v6562_v29   ;;  %v2094_v27 = vsel %vm1377_vm7, %v2035_v37, %v2093_v32  ;;  %v2413_v45 = vsel %vm1373_vm5, %v2352_v17, %v2412_v20  ;;  %2449 = vst.msk [vmem:[#allocation2 + $0x88] sm:$0x1] %vm443_vm1, %v2368_v57  ;;  %v2571_v50 = vld [vmem:[#allocation2 + $0x220] sm:$0xff]  ;;  %v7640_v14 = vmov 0.0   ;;  %vm3247_vm1 = vcmask 785408  }
  0xf1   : > { %v2527_v24 = vmul.f32 %v6499_v3, %v5450_v51  ;;  %v2095_v18 = vsel %vm1379_vm8, %v2039_v2, %v2094_v27  ;;  %v2414_v36 = vsel %vm1375_vm6, %v2356_v44, %v2413_v45  ;;  %v2507_v22 = vadd.f32 %v2499_v15, %v2471_v26  ;;  %v2827_v51 = vpop.permute.xlu1 %2826  ;;  %468 = vst.msk [vmem:[#allocation3] sm:$0x1f] %vm467_vm10, %v7640_v14  ;;  %v7641_v44 = vld [vmem:[#allocation18_spill] sm:$0xff] }
  0xf2   : > { %2112 = vst.msk [vmem:[#allocation2 + $0x110] sm:$0xff] %vm441_vm0, %v2095_v18  ;;  %v2415_v11 = vsel %vm1377_vm7, %v2360_v49, %v2414_v36  ;;  %v6588_v33 = vrot.slane %v2720_v56, %v5312_v10  ;;  %v6591_v40 = vrot.slane %v2720_v56, %v5309_v9  ;;  %v6594_v43 = vrot.slane %v2720_v56, %v7639_v1 }
  0xf3   : > { %v2416_v3 = vsel %vm1379_vm8, %v2364_v52, %v2415_v11  ;;  %v2535_v55 = vadd.f32 %v2527_v24, %v2507_v22  ;;  %v2543_v30 = vld [vmem:[#allocation2 + $0x190] sm:$0xff]  ;;  %v2583_v47 = vmul.f32 %v5461_v54, %v2571_v50  ;;  %470 = vst.msk [vmem:[#allocation3 + $0x28] sm:$0x1f] %vm467_vm10, %v7640_v14  ;;  %4788 = vmatprep.mubr.msk.bf16.mxu1 %vm5113_vm14, %v7640_v14  ;;  %vm3244_vm0 = vcmask 523264  }
  0xf4   : > { %v2599_v60 = vld [vmem:[#allocation2 + $0x191] sm:$0xff]  ;;  %4881 = vset.pattern.permute.xlu1 %v7637_v39  ;;  %4883 = vset.pattern.permute.xlu0 %v7634_v48  ;;  %2448 = vst.msk [vmem:[#allocation2 + $0x80] sm:$0xfe] %vm1767_vm9, %v2416_v3  ;;  %v2555_v8 = vmul.f32 %v5457_v53, %v2543_v30  ;;  %v2809_v38 = vmul.f32 %v6588_v33, %v2775_v19  ;;  %vm483_vm9 = vcmask 518144   ;;  %vm487_vm10 = vcmask 516096  }
  0xf5   : > { %473 = vst.msk [vmem:[#allocation3 + $0x8] sm:$0x1] %vm471_vm11, %v7640_v14  ;;  %474 = vst.msk [vmem:[#allocation3 + $0x10] sm:$0x1] %vm471_vm11, %v7640_v14  ;;  %2782 = vperm.xlu1 %4881, %v6350_v0   ;;  %2834 = vperm.xlu0 %4883, %v6350_v0   ;;  %v2765_v53 = vmul.f32 %v6591_v40, %v2724_v41  ;;  %v2861_v54 = vmul.f32 %v6594_v43, %v2827_v51 }
  0xf6   : > { %475 = vst.msk [vmem:[#allocation3 + $0x18] sm:$0x1] %vm471_vm11, %v7640_v14  ;;  %476 = vst.msk [vmem:[#allocation3 + $0x20] sm:$0x1] %vm471_vm11, %v7640_v14  ;;  %v2563_v21 = vadd.f32 %v2555_v8, %v2535_v55  ;;  %v2611_v28 = vmul.f32 %v5473_v63, %v2599_v60 }
  0xf7   : > { %478 = vst.msk [vmem:[#allocation3 + $0x50] sm:$0x1] %vm471_vm11, %v7640_v14  ;;  %479 = vst.msk [vmem:[#allocation3 + $0x58] sm:$0x1] %vm471_vm11, %v7640_v14  ;;  %v2817_v46 = vadd.f32 %v2809_v38, %v2765_v53 }
  0xf8   : > { %480 = vst.msk [vmem:[#allocation3 + $0x60] sm:$0x1] %vm471_vm11, %v7640_v14  ;;  %481 = vst.msk [vmem:[#allocation3 + $0x68] sm:$0x1] %vm471_vm11, %v7640_v14  ;;  %v2591_v7 = vadd.f32 %v2583_v47, %v2563_v21 }
  0xf9   : > { %472 = vst.msk [vmem:[#allocation3] sm:$0x1] %vm471_vm11, %v7640_v14  ;;  %2790 = vperm.xlu1 %4881, %v6429_v58   ;;  %4885 = vset.pattern.permute.xlu0 %v7630_v5  ;;  %v2655_v37 = vld [vmem:[#allocation2 + $0x110] sm:$0xff]  ;;  %v2869_v2 = vadd.f32 %v2861_v54, %v2817_v46  ;;  %vm4072_vm11 = vcmask 517120  }
  0xfa   : > { %v2619_v62 = vadd.f32 %v2611_v28, %v2591_v7  ;;  %v2667_v42 = vmul.f32 %v5488_v23, %v2655_v37  ;;  %484 = vst.msk [vmem:[#allocation4] sm:$0x7] %vm483_vm9, %v7640_v14  ;;  %486 = vst.msk [vmem:[#allocation4 + $0xc] sm:$0x7] %vm483_vm9, %v7640_v14 }
  0xfb   : > { %v2627_v0 = vld [vmem:[#allocation2 + $0x80] sm:$0xff]  ;;  %v2877_v25 = vmax.f32 %v2869_v2, 0.0  ;;  %489 = vst.msk [vmem:[#allocation4 + $0x4] sm:$0x1] %vm487_vm10, %v7640_v14  ;;  %490 = vst.msk [vmem:[#allocation4 + $0x8] sm:$0x1] %vm487_vm10, %v7640_v14 }
  0xfc   : > { %v2683_v35 = vld [vmem:[#allocation2 + $0x81] sm:$0xff]  ;;  %v2639_v13 = vmul.f32 %v5477_v4, %v2627_v0  ;;  %492 = vst.msk [vmem:[#allocation4 + $0x18] sm:$0x1] %vm487_vm10, %v7640_v14  ;;  %493 = vst.msk [vmem:[#allocation4 + $0x1c] sm:$0x1] %vm487_vm10, %v7640_v14 }
  0xfd   : > { %4884 = vset.pattern.permute.xlu1 %v7634_v48  ;;  %v2885_v31 = vmin.f32 %v2877_v25, 6.0  ;;  %v2695_v6 = vmul.f32 %v6280_v12, %v2683_v35  ;;  %488 = vst.msk [vmem:[#allocation4] sm:$0x1] %vm487_vm10, %v7640_v14 }
  0xfe   : > { %2842 = vperm.xlu1 %4884, %v6429_v58   ;;  %v2647_v63 = vadd.f32 %v2639_v13, %v2619_v62 }
  0xff   : > { %v2901_v5 = vcombine.high %v2885_v31, %v2885_v31  ;;  %v3258_v17 = vrot.slane %v2885_v31, %v5324_v16  ;;  %v2992_v59 = vrot.slane %v2885_v31, %v5312_v10  ;;  %v3076_v4 = vrot.slane %v2885_v31, %v7639_v1 }
 0x100   : > { %v2675_v41 = vadd.f32 %v2667_v42, %v2647_v63  ;;  %v3160_v23 = vrot.slane %v2885_v31, %v7641_v44  ;;  %v2912_v55 = vrot.slane %v2885_v31, %v5309_v9  ;;  %v4921_v63 = vld [vmem:[%s7642_s4] sm:$0xff]  }
 0x101   : > { %v3265_v49 = vrot.slane %v2901_v5, %v5324_v16  ;;  %v3266_v52 = vcombine.high %v3258_v17, %v3258_v17  ;;  %v3383_v58 = vrot.slane %v3258_v17, %v5309_v9  ;;  %v3469_v34 = vrot.slane %v3258_v17, %v5312_v10  ;;  %4785 = vmatpush3.bf16.msra.mxu1 %v4921_v63 }
 0x102   : > { %2850 = vperm.xlu1 %4884, %v6562_v29   ;;  %v2703_v12 = vadd.f32 %v2695_v6, %v2675_v41  ;;  %v2996_v57 = vrot.slane %v2901_v5, %v5312_v10  ;;  %v3080_v61 = vrot.slane %v2901_v5, %v7639_v1  ;;  %v3164_v32 = vrot.slane %v2901_v5, %v7641_v44 }
 0x103   : > { %v3267_v20 = vcombine.high %v3265_v49, %v3265_v49  ;;  %v3387_v26 = vrot.slane %v3266_v52, %v5309_v9  ;;  %v3391_v15 = vrot.slane %v3265_v49, %v5309_v9  ;;  %v3473_v56 = vrot.slane %v3266_v52, %v5312_v10  ;;  %4786 = vmatprep.subr.bf16.mxu1 %v7640_v14 }
 0x104   : > { %v2711_v27 = vmax.f32 %v2703_v12, 0.0  ;;  %v3477_v45 = vrot.slane %v3265_v49, %v5312_v10  ;;  %v3053_v24 = vsel %vm1367_vm2, %v2996_v57, %v2992_v59  ;;  %v6652_v29 = vsel %vm1367_vm2, %v3080_v61, %v3076_v4  ;;  %v4922_v4 = vld [vmem:[%s7642_s4 + $0x8] sm:$0xff]  }
 0x105   : > { %v3395_v18 = vrot.slane %v3267_v20, %v5309_v9  ;;  %v3444_v36 = vsel %vm1367_vm2, %v3387_v26, %v3383_v58  ;;  %v3481_v22 = vrot.slane %v3267_v20, %v5312_v10  ;;  %v3530_v50 = vsel %vm1369_vm3, %v3473_v56, %v3469_v34  ;;  %4787 = vmatpush3.bf16.msra.mxu1 %v4922_v4 }
 0x106   : > { %4886 = vset.pattern.permute.xlu1 %v7637_v39  ;;  %v2719_v19 = vmin.f32 %v2711_v27, 6.0  ;;  %v3445_v11 = vsel %vm1369_vm3, %v3391_v15, %v3444_v36  ;;  %v3531_v51 = vsel %vm1371_vm4, %v3477_v45, %v3530_v50  ;;  %v6662_v3 = vsel %vm1367_vm2, %v3164_v32, %v3160_v23  ;;  %4792 = vmatprep.subr.bf16.mxu1 %v7640_v14 }
 0x107   : > { %v3446_v30 = vsel %vm1371_vm4, %v3395_v18, %v3445_v11  ;;  %v3532_v60 = vsel %vm1373_vm5, %v3481_v22, %v3531_v51  ;;  %v2916_v8 = vrot.slane %v2901_v5, %v5309_v9  ;;  %v2749_v47 = vpop.permute.xlu1 %2748 }
 0x108   : > { %2758 = vperm.xlu0 %4885, %v2719_v19   ;;  %2802 = vperm.xlu1 %4886, %v2719_v19   ;;  %3462 = vst.msk [vmem:[#allocation3 + $0x78] sm:$0xf] %vm3461_vm12, %v3446_v30  ;;  %v2770_v62 = vmul.f32 %v6591_v40, %v2749_v47 }
 0x109   : > { %3547 = vst.msk [vmem:[#allocation3 + $0x50] sm:$0x1e] %vm3546_vm13, %v3532_v60  ;;  %v6671_v39 = vsel %vm1367_vm2, %v2916_v8, %v2912_v55 }
 0x10c   : > { %4887 = vset.pattern.permute.xlu1 %v7634_v48  ;;  %4888 = vset.pattern.permute.xlu0 %v7634_v48 }
 0x10d   : > { %2854 = vperm.xlu1 %4887, %v2719_v19  }
 0x114   : > { %v2779_v38 = vpop.permute.xlu1 %2778  ;;  %v2729_v53 = vpop.permute.xlu0 %2728 }
 0x115   : > { %v2766_v21 = vmul.f32 %v6591_v40, %v2729_v53  ;;  %v2810_v28 = vmul.f32 %v6588_v33, %v2779_v38 }
 0x117   : > { %v2818_v7 = vadd.f32 %v2810_v28, %v2766_v21 }
 0x118   : > { %v2795_v54 = vpop.permute.xlu1 %2794 }
 0x119   : > { %v2814_v37 = vmul.f32 %v6588_v33, %v2795_v54 }
 0x11b   : > { %v2822_v48 = vadd.f32 %v2814_v37, %v2770_v62 }
 0x11f   : > { %v2831_v46 = vpop.permute.xlu1 %2830 }
 0x120   : > { %v2862_v2 = vmul.f32 %v6594_v43, %v2831_v46 }
 0x122   : > { %v2870_v0 = vadd.f32 %v2862_v2, %v2818_v7 }
 0x123   : > { %v2847_v35 = vpop.permute.xlu1 %2846 }
 0x124   : > { %v2878_v25 = vmax.f32 %v2870_v0, 0.0  ;;  %v2866_v13 = vmul.f32 %v6594_v43, %v2847_v35 }
 0x126   : > { %v6681_v42 = vmin.f32 %v2878_v25, 6.0  ;;  %v2874_v31 = vadd.f32 %v2866_v13, %v2822_v48 }
 0x128   : > { %v6688_v6 = vcombine.high %v6681_v42, %v6681_v42  ;;  %v3274_v5 = vrot.slane %v6681_v42, %v5324_v16  ;;  %v2882_v17 = vmax.f32 %v2874_v31, 0.0  ;;  %v3000_v41 = vrot.slane %v6681_v42, %v5312_v10 }
 0x129   : > { %v3084_v59 = vrot.slane %v6681_v42, %v7639_v1  ;;  %v3168_v7 = vrot.slane %v6681_v42, %v7641_v44  ;;  %v2920_v37 = vrot.slane %v6681_v42, %v5309_v9 }
 0x12a   : > { %v3281_v23 = vrot.slane %v6688_v6, %v5324_v16  ;;  %v3282_v49 = vcombine.high %v3274_v5, %v3274_v5  ;;  %v3554_v52 = vrot.slane %v3274_v5, %v5309_v9  ;;  %v3639_v58 = vrot.slane %v3274_v5, %v5312_v10 }
 0x12b   : > { %v6706_v34 = vmin.f32 %v2882_v17, 6.0  ;;  %v3004_v12 = vrot.slane %v6688_v6, %v5312_v10  ;;  %v3054_v57 = vsel %vm1369_vm3, %v3000_v41, %v3053_v24  ;;  %v3088_v61 = vrot.slane %v6688_v6, %v7639_v1 }
 0x12c   : > { %v3283_v32 = vcombine.high %v3281_v23, %v3281_v23  ;;  %v3558_v20 = vrot.slane %v3282_v49, %v5309_v9  ;;  %v3562_v26 = vrot.slane %v3281_v23, %v5309_v9  ;;  %v3643_v15 = vrot.slane %v3282_v49, %v5312_v10 }
 0x12d   : > { %v3647_v56 = vrot.slane %v3281_v23, %v5312_v10  ;;  %v6719_v27 = vcombine.high %v6706_v34, %v6706_v34  ;;  %v3338_v45 = vrot.slane %v6706_v34, %v5324_v16  ;;  %v6724_v24 = vsel %vm1371_vm4, %v3004_v12, %v3054_v57 }
 0x12e   : > { %v3566_v18 = vrot.slane %v3283_v32, %v5309_v9  ;;  %v3615_v36 = vsel %vm1367_vm2, %v3558_v20, %v3554_v52  ;;  %v3651_v22 = vrot.slane %v3283_v32, %v5312_v10  ;;  %v3700_v50 = vsel %vm1369_vm3, %v3643_v15, %v3639_v58  ;;  %v3721_v20 = vld [vmem:[%s7643_s3] sm:$0xff] }
 0x12f   : > { %v3616_v19 = vsel %vm1369_vm3, %v3562_v26, %v3615_v36  ;;  %v3701_v11 = vsel %vm1371_vm4, %v3647_v56, %v3700_v50  ;;  %v3345_v51 = vrot.slane %v6719_v27, %v5324_v16  ;;  %v3346_v55 = vcombine.high %v3338_v45, %v3338_v45 }
 0x130   : > { %v3617_v30 = vsel %vm1371_vm4, %v3566_v18, %v3616_v19  ;;  %v3702_v60 = vsel %vm1373_vm5, %v3651_v22, %v3701_v11  ;;  %v3586_v8 = vrot.slane %v3338_v45, %v5309_v9  ;;  %v3671_v47 = vrot.slane %v3338_v45, %v5312_v10 }
 0x131   : > { %3632 = vst.msk [vmem:[#allocation3 + $0x30] sm:$0xf] %vm3461_vm12, %v3617_v30  ;;  %v3347_v38 = vcombine.high %v3345_v51, %v3345_v51  ;;  %v3590_v53 = vrot.slane %v3346_v55, %v5309_v9  ;;  %v3594_v54 = vrot.slane %v3345_v51, %v5309_v9  ;;  %v3675_v21 = vrot.slane %v3346_v55, %v5312_v10  ;;  %v3723_v55 = vld [vmem:[#allocation3] sm:$0xf]  ;;  %v3739_v30 = vld [vmem:[#allocation3 + $0x28] sm:$0xf] }
 0x132   : > { %3717 = vst.msk [vmem:[#allocation3 + $0x8] sm:$0x1e] %vm3546_vm13, %v3702_v60  ;;  %v3679_v28 = vrot.slane %v3345_v51, %v5312_v10  ;;  %v3138_v46 = vsel %vm1369_vm3, %v3084_v59, %v6652_v29  ;;  %v3172_v42 = vrot.slane %v6688_v6, %v7641_v44  ;;  %v3222_v63 = vsel %vm1369_vm3, %v3168_v7, %v6662_v3 }
 0x133   : > { %v3598_v2 = vrot.slane %v3347_v38, %v5309_v9  ;;  %v3621_v62 = vsel %vm1367_vm2, %v3590_v53, %v3586_v8  ;;  %v3683_v0 = vrot.slane %v3347_v38, %v5312_v10  ;;  %v3706_v35 = vsel %vm1369_vm3, %v3675_v21, %v3671_v47 }
 0x134   : > { %v3622_v48 = vsel %vm1369_vm3, %v3594_v54, %v3621_v62  ;;  %v3707_v25 = vsel %vm1371_vm4, %v3679_v28, %v3706_v35  ;;  %v6758_v29 = vsel %vm1371_vm4, %v3088_v61, %v3138_v46  ;;  %v2924_v5 = vrot.slane %v6688_v6, %v5309_v9 }
 0x135   : > { %v3623_v13 = vsel %vm1371_vm4, %v3598_v2, %v3622_v48  ;;  %v3708_v31 = vsel %vm1373_vm5, %v3683_v0, %v3707_v25  ;;  %v2974_v17 = vsel %vm1369_vm3, %v2920_v37, %v6671_v39  ;;  %v6773_v41 = vsel %vm1371_vm4, %v3172_v42, %v3222_v63  ;;  %v3755_v2 = vld [vmem:[#allocation3 + $0x1] sm:$0xf]  ;;  %v3771_v48 = vld [vmem:[#allocation3 + $0x50] sm:$0xf] }
 0x136   : > { %3634 = vst.msk [vmem:[#allocation3 + $0x40] sm:$0xf] %vm3461_vm12, %v3623_v13  ;;  %v6776_v59 = vsel %vm1371_vm4, %v2924_v5, %v2974_v17  ;;  %v6799_v22 = vrot.slane %v3721_v20, %v5309_v9  ;;  %v6802_v50 = vrot.slane %v3721_v20, %v5312_v10  ;;  %v6815_v46 = vrot.slane %v3721_v20, %v7639_v1  ;;  %v3787_v5 = vld [vmem:[#allocation3 + $0x78] sm:$0xf] }
 0x137   : > { %3719 = vst.msk [vmem:[#allocation3 + $0x18] sm:$0x1e] %vm3546_vm13, %v3708_v31  ;;  %v6823_v35 = vrot.slane %v3721_v20, %v7641_v44  ;;  %v7644_v31 = vld [vmem:[#allocation19_spill] sm:$0xff] }
 0x138   : > { %v3731_v21 = vmul.f32 %v6799_v22, %v3723_v55  ;;  %v3747_v28 = vmul.f32 %v6802_v50, %v3739_v30  ;;  %v3763_v0 = vmul.f32 %v6815_v46, %v3755_v2  ;;  %v6827_v42 = vrot.slane %v3721_v20, %v7644_v31 }
 0x139   : > { %v3779_v13 = vmul.f32 %v6823_v35, %v3771_v48 }
 0x13a   : > { %v3751_v62 = vadd.f32 %v3747_v28, %v3731_v21  ;;  %v3835_v28 = vld [vmem:[#allocation3 + $0x30] sm:$0xf] }
 0x13c   : > { %v3767_v25 = vadd.f32 %v3763_v0, %v3751_v62 }
 0x142   : > { %v2739_v4 = vpop.permute.xlu0 %2738 }
 0x143   : > { %v2768_v23 = vmul.f32 %v6591_v40, %v2739_v4  ;;  %v3783_v4 = vadd.f32 %v3779_v13, %v3767_v25  ;;  %v3851_v25 = vld [vmem:[#allocation3 + $0x9] sm:$0xf] }
 0x148   : > { %v2787_v49 = vpop.permute.xlu0 %2786 }
 0x149   : > { %v2812_v52 = vmul.f32 %v6588_v33, %v2787_v49  ;;  %v3740_v49 = vld [vmem:[#allocation3 + $0x30] sm:$0xf] }
 0x14b   : > { %v2820_v58 = vadd.f32 %v2812_v52, %v2768_v23  ;;  %v3724_v23 = vld [vmem:[#allocation3 + $0x8] sm:$0xf]  ;;  %v3795_v52 = vmul.f32 %v6827_v42, %v3787_v5 }
 0x14d   : > { %v2839_v3 = vpop.permute.xlu0 %2838 }
 0x14e   : > { %v2864_v12 = vmul.f32 %v6594_v43, %v2839_v3 }
 0x150   : > { %v2872_v6 = vadd.f32 %v2864_v12, %v2820_v58  ;;  %v7645_v58 = vld [vmem:[#allocation20_spill] sm:$0xff]  ;;  %v7646_v12 = vld [vmem:[#allocation21_spill] sm:$0xff] }
 0x151   : > { %v6833_v3 = vrot.slane %v3721_v20, %v7645_v58 }
 0x152   : > { %v2880_v57 = vmax.f32 %v2872_v6, 0.0  ;;  %v2734_v17 = vpop.permute.xlu0 %2733  ;;  %v6836_v6 = vrot.slane %v3721_v20, %v7646_v12 }
 0x154   : > { %v6781_v61 = vmin.f32 %v2880_v57, 6.0  ;;  %v3803_v57 = vld [vmem:[#allocation3 + $0x51] sm:$0xf] }
 0x156   : > { %v3306_v39 = vrot.slane %v6781_v61, %v5324_v16  ;;  %v6787_v32 = vcombine.high %v6781_v61, %v6781_v61 }
 0x158   : > { %v3314_v26 = vcombine.high %v3306_v39, %v3306_v39  ;;  %v3570_v15 = vrot.slane %v3306_v39, %v5309_v9  ;;  %v3655_v56 = vrot.slane %v3306_v39, %v5312_v10  ;;  %v3313_v45 = vrot.slane %v6787_v32, %v5324_v16  ;;  %v6829_v63 = vpop.permute.xlu1 %2743  ;;  %v3819_v39 = vld [vmem:[#allocation3 + $0x8] sm:$0xf] }
 0x15a   : > { %v3574_v18 = vrot.slane %v3314_v26, %v5309_v9  ;;  %v3659_v36 = vrot.slane %v3314_v26, %v5312_v10  ;;  %v3315_v19 = vcombine.high %v3313_v45, %v3313_v45  ;;  %v3578_v11 = vrot.slane %v3313_v45, %v5309_v9 }
 0x15b   : > { %v3663_v51 = vrot.slane %v3313_v45, %v5312_v10  ;;  %v3799_v26 = vadd.f32 %v3795_v52, %v3783_v4  ;;  %v3732_v45 = vmul.f32 %v6799_v22, %v3724_v23  ;;  %v3758_v23 = vld [vmem:[#allocation3 + $0x19] sm:$0xf] }
 0x15c   : > { %v3618_v60 = vsel %vm1367_vm2, %v3574_v18, %v3570_v15  ;;  %v3703_v8 = vsel %vm1369_vm3, %v3659_v36, %v3655_v56  ;;  %v3582_v47 = vrot.slane %v3315_v19, %v5309_v9  ;;  %v3667_v53 = vrot.slane %v3315_v19, %v5312_v10  ;;  %v3726_v56 = vld [vmem:[#allocation3 + $0x18] sm:$0xf]  ;;  %v3742_v18 = vld [vmem:[#allocation3 + $0x40] sm:$0xf] }
 0x15d   : > { %v3619_v38 = vsel %vm1369_vm3, %v3578_v11, %v3618_v60  ;;  %v3704_v54 = vsel %vm1371_vm4, %v3663_v51, %v3703_v8  ;;  %v3748_v36 = vmul.f32 %v6802_v50, %v3740_v49  ;;  %v3811_v11 = vmul.f32 %v6833_v3, %v3803_v57  ;;  %v3756_v60 = vld [vmem:[#allocation3 + $0x9] sm:$0xf] }
 0x15e   : > { %v3620_v7 = vsel %vm1371_vm4, %v3582_v47, %v3619_v38  ;;  %v3705_v37 = vsel %vm1373_vm5, %v3667_v53, %v3704_v54  ;;  %v3827_v51 = vmul.f32 %v6836_v6, %v3819_v39  ;;  %v3734_v55 = vmul.f32 %v6799_v22, %v3726_v56  ;;  %v7647_v47 = vld [vmem:[#allocation22_spill] sm:$0xff]  ;;  %v3821_v39 = vld [vmem:[#allocation3 + $0x18] sm:$0xf] }
 0x15f   : > { %3633 = vst.msk [vmem:[#allocation3 + $0x38] sm:$0xf] %vm3461_vm12, %v3620_v7  ;;  %v3750_v30 = vmul.f32 %v6802_v50, %v3742_v18  ;;  %v3815_v8 = vadd.f32 %v3811_v11, %v3799_v26  ;;  %v6847_v38 = vrot.slane %v3721_v20, %v7647_v47  ;;  %v2767_v53 = vmul.f32 %v6591_v40, %v2734_v17  ;;  %v6861_v20 = vld [vmem:[%s7643_s3 + $0x8] ss:$0 sm:$0xff]  ;;  %v3837_v26 = vld [vmem:[#allocation3 + $0x40] sm:$0xf] }
 0x160   : > { %3718 = vst.msk [vmem:[#allocation3 + $0x10] sm:$0x1e] %vm3546_vm13, %v3705_v37  ;;  %v3752_v21 = vadd.f32 %v3748_v36, %v3732_v45  ;;  %v3764_v49 = vmul.f32 %v6815_v46, %v3756_v60  ;;  %v3853_v45 = vld [vmem:[#allocation3 + $0x19] sm:$0xf]  ;;  %v6876_v60 = vmul.f32 %v6861_v20, %v3851_v25  ;;  %s7418_s3 = scalar_lea.vmem [#allocation10], %s4730_s2 }
 0x161   : > { %v3831_v48 = vadd.f32 %v3827_v51, %v3815_v8  ;;  %v3754_v57 = vadd.f32 %v3750_v30, %v3734_v55  ;;  %v3843_v56 = vmul.f32 %v6847_v38, %v3835_v28  ;;  %v6892_v25 = vmul.f32 %v6861_v20, %v3853_v45 }
 0x162   : > { %v6873_v51 = vadd.f32 %v3764_v49, %v3752_v21  ;;  %v6889_v21 = vmul.f32 %v6847_v38, %v3837_v26 }
 0x166   : > { %v3741_v4 = vld [vmem:[#allocation3 + $0x38] sm:$0xf] }
 0x167   : > { %v3725_v17 = vld [vmem:[#allocation3 + $0x10] sm:$0xf]  ;;  %v3749_v28 = vmul.f32 %v6802_v50, %v3741_v4  ;;  %v3836_v45 = vld [vmem:[#allocation3 + $0x38] sm:$0xf] }
 0x168   : > { %v3733_v8 = vmul.f32 %v6799_v22, %v3725_v17  ;;  %v3757_v36 = vld [vmem:[#allocation3 + $0x11] sm:$0xf]  ;;  %v3016_v22 = vrot.slane %v6781_v61, %v5312_v10 }
 0x16f   : > { %v6838_v15 = vpop.permute.xlu1 %2753  ;;  %v2799_v19 = vpop.permute.xlu0 %2798 }
 0x170   : > { %v2771_v26 = vmul.f32 %v6591_v40, %v6838_v15 }
 0x174   : > { %v2783_v7 = vpop.permute.xlu1 %2782  ;;  %v2835_v37 = vpop.permute.xlu0 %2834 }
 0x175   : > { %v2811_v13 = vmul.f32 %v6588_v33, %v2783_v7  ;;  %v2863_v5 = vmul.f32 %v6594_v43, %v2835_v37  ;;  %v3766_v7 = vmul.f32 %v6815_v46, %v3758_v23  ;;  %v6883_v37 = vadd.f32 %v3843_v56, %v3831_v48  ;;  %v3820_v23 = vld [vmem:[#allocation3 + $0x10] sm:$0xf] }
 0x176   : > { %v3753_v56 = vadd.f32 %v3749_v28, %v3733_v8  ;;  %v6921_v15 = vmul.f32 %v6836_v6, %v3820_v23 }
 0x177   : > { %v2819_v11 = vadd.f32 %v2811_v13, %v2767_v53  ;;  %v6886_v53 = vmul.f32 %v6836_v6, %v3821_v39  ;;  %v6899_v48 = vadd.f32 %v3766_v7, %v3754_v57  ;;  %v2815_v39 = vmul.f32 %v6588_v33, %v2799_v19 }
 0x178   : > { %v2791_v30 = vpop.permute.xlu1 %2790  ;;  %v3765_v57 = vmul.f32 %v6815_v46, %v3757_v36 }
 0x179   : > { %v2871_v18 = vadd.f32 %v2863_v5, %v2819_v11  ;;  %v2813_v13 = vmul.f32 %v6588_v33, %v2791_v30  ;;  %v2769_v5 = vmul.f32 %v6591_v40, %v6829_v63 }
 0x17b   : > { %v2879_v17 = vmax.f32 %v2871_v18, 0.0  ;;  %v3020_v18 = vrot.slane %v6787_v32, %v5312_v10  ;;  %v2821_v19 = vadd.f32 %v2813_v13, %v2769_v5  ;;  %v6934_v13 = vmul.f32 %v6847_v38, %v3836_v45 }
 0x17c   : > { %v2823_v5 = vadd.f32 %v2815_v39, %v2771_v26 }
 0x17d   : > { %v6911_v11 = vmin.f32 %v2879_v17, 6.0  ;;  %v2843_v63 = vpop.permute.xlu1 %2842 }
 0x17e   : > { %v2865_v55 = vmul.f32 %v6594_v43, %v2843_v63  ;;  %v6938_v63 = vadd.f32 %v3765_v57, %v3753_v56 }
 0x17f   : > { %v6927_v36 = vcombine.high %v6911_v11, %v6911_v11  ;;  %v3290_v8 = vrot.slane %v6911_v11, %v5324_v16  ;;  %v3008_v28 = vrot.slane %v6911_v11, %v5312_v10  ;;  %v3092_v23 = vrot.slane %v6911_v11, %v7639_v1 }
 0x180   : > { %v2873_v17 = vadd.f32 %v2865_v55, %v2821_v19 }
 0x181   : > { %v3297_v46 = vrot.slane %v6927_v36, %v5324_v16  ;;  %v3298_v52 = vcombine.high %v3290_v8, %v3290_v8  ;;  %v3399_v49 = vrot.slane %v3290_v8, %v5309_v9  ;;  %v3485_v7 = vrot.slane %v3290_v8, %v5312_v10  ;;  %v2851_v4 = vpop.permute.xlu1 %2850 }
 0x182   : > { %v2881_v0 = vmax.f32 %v2873_v17, 0.0  ;;  %v2867_v45 = vmul.f32 %v6594_v43, %v2851_v4  ;;  %v3012_v55 = vrot.slane %v6927_v36, %v5312_v10  ;;  %v3056_v39 = vsel %vm1373_vm5, %v3008_v28, %v6724_v24 }
 0x183   : > { %v3299_v26 = vcombine.high %v3297_v46, %v3297_v46  ;;  %v3403_v56 = vrot.slane %v3298_v52, %v5309_v9  ;;  %v3407_v57 = vrot.slane %v3297_v46, %v5309_v9  ;;  %v3489_v19 = vrot.slane %v3298_v52, %v5312_v10 }
 0x184   : > { %v3493_v62 = vrot.slane %v3297_v46, %v5312_v10  ;;  %v6953_v8 = vmin.f32 %v2881_v0, 6.0  ;;  %v2875_v17 = vadd.f32 %v2867_v45, %v2823_v5  ;;  %v3057_v4 = vsel %vm1375_vm6, %v3012_v55, %v3056_v39 }
 0x185   : > { %v3411_v2 = vrot.slane %v3299_v26, %v5309_v9  ;;  %v3447_v54 = vsel %vm1367_vm2, %v3403_v56, %v3399_v49  ;;  %v3497_v24 = vrot.slane %v3299_v26, %v5312_v10  ;;  %v3533_v28 = vsel %vm1369_vm3, %v3489_v19, %v3485_v7 }
 0x186   : > { %v3448_v30 = vsel %vm1369_vm3, %v3407_v57, %v3447_v54  ;;  %v3534_v50 = vsel %vm1371_vm4, %v3493_v62, %v3533_v28  ;;  %v6964_v52 = vcombine.high %v6953_v8, %v6953_v8  ;;  %v3176_v0 = vrot.slane %v6911_v11, %v7641_v44 }
 0x187   : > { %v3449_v46 = vsel %vm1371_vm4, %v3411_v2, %v3448_v30  ;;  %v3535_v5 = vsel %vm1373_vm5, %v3497_v24, %v3534_v50  ;;  %v3322_v49 = vrot.slane %v6953_v8, %v5324_v16  ;;  %v2883_v45 = vmax.f32 %v2875_v17, 0.0  ;;  %v2759_v7 = vpop.permute.xlu0 %2758  ;;  %v2803_v55 = vpop.permute.xlu1 %2802 }
 0x188   : > { %3463 = vst.msk [vmem:[#allocation3 + $0x80] sm:$0xf] %vm3461_vm12, %v3449_v46  ;;  %v3329_v54 = vrot.slane %v6964_v52, %v5324_v16  ;;  %v2772_v62 = vmul.f32 %v6591_v40, %v2759_v7  ;;  %v3058_v2 = vsel %vm1377_vm7, %v3016_v22, %v3057_v4  ;;  %v2816_v50 = vmul.f32 %v6588_v33, %v2803_v55 }
 0x189   : > { %3548 = vst.msk [vmem:[#allocation3 + $0x58] sm:$0x1e] %vm3546_vm13, %v3535_v5  ;;  %v3330_v30 = vcombine.high %v3322_v49, %v3322_v49  ;;  %v3415_v39 = vrot.slane %v3322_v49, %v5309_v9  ;;  %v3501_v26 = vrot.slane %v3322_v49, %v5312_v10  ;;  %v6984_v56 = vmin.f32 %v2883_v45, 6.0 }
 0x18a   : > { %v3331_v57 = vcombine.high %v3329_v54, %v3329_v54  ;;  %v3423_v19 = vrot.slane %v3329_v54, %v5309_v9  ;;  %v3509_v17 = vrot.slane %v3329_v54, %v5312_v10  ;;  %v3059_v40 = vsel %vm1379_vm8, %v3020_v18, %v3058_v2 }
 0x18b   : > { %v3419_v24 = vrot.slane %v3330_v30, %v5309_v9  ;;  %v3505_v22 = vrot.slane %v3330_v30, %v5312_v10  ;;  %v6993_v33 = vcombine.high %v6984_v56, %v6984_v56  ;;  %v3354_v4 = vrot.slane %v6984_v56, %v5324_v16  ;;  %3067 = vrot.lane.b32.xlu0 %v3059_v40, %s5114_s20 }
 0x18c   : > { %v3427_v28 = vrot.slane %v3331_v57, %v5309_v9  ;;  %v3513_v46 = vrot.slane %v3331_v57, %v5312_v10  ;;  %v2824_v5 = vadd.f32 %v2816_v50, %v2772_v62  ;;  %v3096_v18 = vrot.slane %v6927_v36, %v7639_v1 }
 0x18d   : > { %v3450_v49 = vsel %vm1367_vm2, %v3419_v24, %v3415_v39  ;;  %v3536_v45 = vsel %vm1369_vm3, %v3505_v22, %v3501_v26  ;;  %v3361_v7 = vrot.slane %v6993_v33, %v5324_v16  ;;  %v3362_v55 = vcombine.high %v3354_v4, %v3354_v4  ;;  %v2855_v26 = vpop.permute.xlu1 %2854 }
 0x18e   : > { %v3451_v54 = vsel %vm1369_vm3, %v3423_v19, %v3450_v49  ;;  %v3537_v2 = vsel %vm1371_vm4, %v3509_v17, %v3536_v45  ;;  %v3431_v30 = vrot.slane %v3354_v4, %v5309_v9  ;;  %v3517_v57 = vrot.slane %v3354_v4, %v5312_v10 }
 0x18f   : > { %v3452_v62 = vsel %vm1371_vm4, %v3427_v28, %v3451_v54  ;;  %v3538_v50 = vsel %vm1373_vm5, %v3513_v46, %v3537_v2  ;;  %v3363_v40 = vcombine.high %v3361_v7, %v3361_v7  ;;  %v3435_v39 = vrot.slane %v3362_v55, %v5309_v9 }
 0x190   : > { %3464 = vst.msk [vmem:[#allocation3 + $0x88] sm:$0xf] %vm3461_vm12, %v3452_v62  ;;  %v3439_v19 = vrot.slane %v3361_v7, %v5309_v9  ;;  %v3521_v17 = vrot.slane %v3362_v55, %v5312_v10  ;;  %v3525_v24 = vrot.slane %v3361_v7, %v5312_v10  ;;  %v3140_v22 = vsel %vm1373_vm5, %v3092_v23, %v6758_v29 }
 0x191   : > { %3549 = vst.msk [vmem:[#allocation3 + $0x60] sm:$0x1e] %vm3546_vm13, %v3538_v50  ;;  %v3443_v4 = vrot.slane %v3363_v40, %v5309_v9  ;;  %v3453_v28 = vsel %vm1367_vm2, %v3435_v39, %v3431_v30  ;;  %v3529_v46 = vrot.slane %v3363_v40, %v5312_v10  ;;  %v3141_v49 = vsel %vm1375_vm6, %v3096_v18, %v3140_v22  ;;  %v3772_v39 = vld [vmem:[#allocation3 + $0x58] sm:$0xf] }
 0x192   : > { %v3454_v45 = vsel %vm1369_vm3, %v3439_v19, %v3453_v28  ;;  %v3539_v55 = vsel %vm1369_vm3, %v3521_v17, %v3517_v57  ;;  %v7648_v7 = vrot.slane %v6781_v61, %v7639_v1  ;;  %v2868_v2 = vmul.f32 %v6594_v43, %v2855_v26 }
 0x193   : > { %v3455_v29 = vsel %vm1371_vm4, %v3443_v4, %v3454_v45  ;;  %v3540_v23 = vsel %vm1371_vm4, %v3525_v24, %v3539_v55  ;;  %v7649_v30 = vrot.slane %v6787_v32, %v7639_v1  ;;  %v3024_v50 = vrot.slane %v6953_v8, %v5312_v10 }
 0x194   : > { %v3142_v54 = vsel %vm1377_vm7, %v7648_v7, %v3141_v49  ;;  %3465 = vst.msk [vmem:[#allocation3 + $0x90] sm:$0xf] %vm3461_vm12, %v3455_v29  ;;  %v3541_v57 = vsel %vm1373_vm5, %v3529_v46, %v3540_v23  ;;  %v2876_v43 = vadd.f32 %v2868_v2, %v2824_v5  ;;  %v3028_v40 = vrot.slane %v6964_v52, %v5312_v10 }
 0x195   : > { %v3143_v18 = vsel %vm1379_vm8, %v7649_v30, %v3142_v54  ;;  %3550 = vst.msk [vmem:[#allocation3 + $0x68] sm:$0x1e] %vm3546_vm13, %v3541_v57  ;;  %v3040_v26 = vrot.slane %v6984_v56, %v5312_v10  ;;  %v3044_v19 = vrot.slane %v6993_v33, %v5312_v10  ;;  %v3108_v17 = vrot.slane %v6953_v8, %v7639_v1 }
 0x196   : > { %3151 = vrot.lane.b32.xlu0 %v3143_v18, %s5115_s28  ;;  %v3112_v5 = vrot.slane %v6964_v52, %v7639_v1  ;;  %v2884_v24 = vmax.f32 %v2876_v43, 0.0  ;;  %v3060_v22 = vsel %vm1367_vm2, %v3028_v40, %v3024_v50  ;;  %v3124_v4 = vrot.slane %v6984_v56, %v7639_v1 }
 0x197   : > { %v3180_v28 = vrot.slane %v6927_v36, %v7641_v44  ;;  %v7650_v46 = vrot.slane %v6706_v34, %v5312_v10  ;;  %v3224_v55 = vsel %vm1373_vm5, %v3176_v0, %v6773_v41  ;;  %v3780_v54 = vmul.f32 %v6823_v35, %v3772_v39 }
 0x198   : > { %v3144_v45 = vsel %vm1367_vm2, %v3112_v5, %v3108_v17  ;;  %v3773_v7 = vld [vmem:[#allocation3 + $0x60] sm:$0xf]  ;;  %v7074_v2 = vmin.f32 %v2884_v24, 6.0  ;;  %v7651_v29 = vrot.slane %v6719_v27, %v5312_v10  ;;  %v7652_v30 = vrot.slane %v6706_v34, %v7639_v1 }
 0x199   : > { %v3061_v49 = vsel %vm1369_vm3, %v7650_v46, %v3060_v22  ;;  %v3225_v57 = vsel %vm1375_vm6, %v3180_v28, %v3224_v55  ;;  %v3128_v41 = vrot.slane %v6993_v33, %v7639_v1  ;;  %v7653_v0 = vrot.slane %v6719_v27, %v7639_v1  ;;  %v3805_v47 = vld [vmem:[#allocation3 + $0x61] sm:$0xf] }
 0x19a   : > { %v3062_v23 = vsel %vm1371_vm4, %v7651_v29, %v3061_v49  ;;  %v3145_v18 = vsel %vm1369_vm3, %v7652_v30, %v3144_v45  ;;  %v7654_v40 = vrot.slane %v6781_v61, %v7641_v44  ;;  %v3370_v17 = vrot.slane %v7074_v2, %v5324_v16 }
 0x19b   : > { %v3063_v43 = vsel %vm1373_vm5, %v3040_v26, %v3062_v23  ;;  %v3146_v50 = vsel %vm1371_vm4, %v7653_v0, %v3145_v18  ;;  %v7100_v5 = vcombine.high %v7074_v2, %v7074_v2  ;;  %v3048_v26 = vrot.slane %v7074_v2, %v5312_v10 }
 0x19c   : > { %v3226_v39 = vsel %vm1377_vm7, %v7654_v40, %v3225_v57  ;;  %v3781_v24 = vmul.f32 %v6823_v35, %v3773_v7  ;;  %v3064_v22 = vsel %vm1375_vm6, %v3044_v19, %v3063_v43  ;;  %v3132_v28 = vrot.slane %v7074_v2, %v7639_v1  ;;  %v3774_v57 = vld [vmem:[#allocation3 + $0x68] sm:$0xf] }
 0x19d   : > { %v3147_v46 = vsel %vm1373_vm5, %v3124_v4, %v3146_v50  ;;  %v7655_v49 = vrot.slane %v6787_v32, %v7641_v44  ;;  %v3378_v55 = vcombine.high %v3370_v17, %v3370_v17  ;;  %v3602_v29 = vrot.slane %v3370_v17, %v5309_v9 }
 0x19e   : > { %v3052_v23 = vrot.slane %v7100_v5, %v5312_v10  ;;  %v3784_v7 = vadd.f32 %v3780_v54, %v6873_v51  ;;  %v3687_v19 = vrot.slane %v3370_v17, %v5312_v10  ;;  %v3065_v30 = vsel %vm1377_vm7, %v3048_v26, %v3064_v22  ;;  %v3788_v26 = vld [vmem:[#allocation3 + $0x80] sm:$0xf]  ;;  %v3789_v22 = vld [vmem:[#allocation3 + $0x88] sm:$0xf] }
 0x19f   : > { %v3227_v45 = vsel %vm1379_vm8, %v7655_v49, %v3226_v39  ;;  %v3377_v4 = vrot.slane %v7100_v5, %v5324_v16  ;;  %v3136_v18 = vrot.slane %v7100_v5, %v7639_v1  ;;  %v3606_v43 = vrot.slane %v3378_v55, %v5309_v9 }
 0x1a0   : > { %v3691_v0 = vrot.slane %v3378_v55, %v5312_v10  ;;  %v3066_v50 = vsel %vm1379_vm8, %v3052_v23, %v3065_v30  ;;  %v3148_v40 = vsel %vm1375_vm6, %v3128_v41, %v3147_v46  ;;  %v3782_v55 = vmul.f32 %v6823_v35, %v3774_v57  ;;  %v3790_v41 = vld [vmem:[#allocation3 + $0x90] sm:$0xf] }
 0x1a1   : > { %v3379_v51 = vcombine.high %v3377_v4, %v3377_v4  ;;  %v3610_v54 = vrot.slane %v3377_v4, %v5309_v9  ;;  %v3695_v39 = vrot.slane %v3377_v4, %v5312_v10  ;;  %3069 = vrot.lane.b32.xlu1 %v3066_v50, %s5114_s20  ;;  %v3149_v17 = vsel %vm1377_vm7, %v3132_v28, %v3148_v40  ;;  %v3852_v46 = vld [vmem:[#allocation3 + $0x11] sm:$0xf]  ;;  %v3804_v40 = vld [vmem:[#allocation3 + $0x59] sm:$0xf]  ;;  %s4729_s20 = sshll.u32 %s7235_s15, 3 }
 0x1a2   : > { %v3624_v49 = vsel %vm1367_vm2, %v3606_v43, %v3602_v29  ;;  %v3709_v62 = vsel %vm1369_vm3, %v3691_v0, %v3687_v19  ;;  %v3785_v23 = vadd.f32 %v3781_v24, %v6938_v63  ;;  %v3150_v29 = vsel %vm1379_vm8, %v3136_v18, %v3149_v17  ;;  %v3806_v0 = vld [vmem:[#allocation3 + $0x69] sm:$0xf]  ;;  %s7363_s16 = scalar_lea.vmem [#allocation8], %s4729_s20  ;;  %s4505_s20 = sand.u32 1, %s5210_s25  }
 0x1a3   : > { %v3614_v30 = vrot.slane %v3379_v51, %v5309_v9  ;;  %v3625_v4 = vsel %vm1369_vm3, %v3610_v54, %v3624_v49  ;;  %v3699_v50 = vrot.slane %v3379_v51, %v5312_v10  ;;  %v3710_v28 = vsel %vm1371_vm4, %v3695_v39, %v3709_v62  ;;  %s4545_s2 = sshll.u32 %s7363_s16, 4  ;;  %s7438_s19 = scalar_lea.sflag [#allocation9], %s4505_s20  ;;  %s7435_s2 = int_to_ptr.vmem [resolvable:$true] %s4545_s2 }
 0x1a4   : > { %v3786_v19 = vadd.f32 %v3782_v55, %v6899_v48  ;;  %v3796_v35 = vmul.f32 %v6827_v42, %v3788_v26  ;;  %v3797_v63 = vmul.f32 %v6827_v42, %v3789_v22  ;;  %v3798_v43 = vmul.f32 %v6827_v42, %v3790_v41  ;;  %s4952_s4 = scalar_lea.vmem %s7435_s2, 128 }
 0x1a5   : > { %v3626_v24 = vsel %vm1371_vm4, %v3614_v30, %v3625_v4  ;;  %v3711_v57 = vsel %vm1373_vm5, %v3699_v50, %v3710_v28  ;;  %3153 = vrot.lane.b32.xlu1 %v3150_v29, %s5115_s28  ;;  %v3860_v62 = vmul.f32 %v6861_v20, %v3852_v46  ;;  %v3812_v51 = vmul.f32 %v6833_v3, %v3804_v40  ;;  %p4953_p11 = scmp.ne.s32.totalorder %s7435_s2, %s4952_s4 }
 0x1a6   : > { %3635 = vst.msk [vmem:[#allocation3 + $0x48] sm:$0xf] %vm3461_vm12, %v3626_v24  ;;  %v3800_v18 = vadd.f32 %v3796_v35, %v3784_v7  ;;  %v3801_v48 = vadd.f32 %v3797_v63, %v3785_v23  ;;  %v3813_v54 = vmul.f32 %v6833_v3, %v3805_v47  ;;  %v2944_v39 = vrot.slane %v6953_v8, %v5309_v9 }
 0x1a7   : > { %3720 = vst.msk [vmem:[#allocation3 + $0x20] sm:$0x1e] %vm3546_vm13, %v3711_v57  ;;  %v7656_v42 = vrot.slane %v6911_v11, %v5309_v9  ;;  %v2932_v26 = vrot.slane %v6927_v36, %v5309_v9  ;;  %v2948_v7 = vrot.slane %v6964_v52, %v5309_v9  ;;  %v3802_v22 = vadd.f32 %v3798_v43, %v3786_v19  ;;  %p4954_p12 = pnand %p4953_p11, %p5229_p5 }
 0x1a8   : > { %v3816_v49 = vadd.f32 %v3812_v51, %v3800_v18  ;;  %v3817_v55 = vadd.f32 %v3813_v54, %v3801_v48  ;;  %v2960_v47 = vrot.slane %v6984_v56, %v5309_v9  ;;  %v3814_v23 = vmul.f32 %v6833_v3, %v3806_v0 }
 0x1a9   : > { %v2976_v17 = vsel %vm1373_vm5, %v7656_v42, %v6776_v59  ;;  %3235 = vrot.lane.b32.xlu1 %v3227_v45, %s7610_s29  ;;  %v2964_v59 = vrot.slane %v6993_v33, %v5309_v9  ;;  %v2980_v36 = vsel %vm1367_vm2, %v2948_v7, %v2944_v39  ;;  %v7657_v30 = vrot.slane %v6781_v61, %v5309_v9  ;;  %p4955_p13 = pneg %p4954_p12 }
 0x1aa   : > { %v2977_v11 = vsel %vm1375_vm6, %v2932_v26, %v2976_v17  ;;  %v3832_v41 = vadd.f32 %v6921_v15, %v3816_v49  ;;  %v3833_v46 = vadd.f32 %v6886_v53, %v3817_v55  ;;  %v7658_v45 = vrot.slane %v6706_v34, %v5309_v9 }
 0x1ab   : > { %v2978_v4 = vsel %vm1377_vm7, %v7657_v30, %v2977_v11  ;;  %v7659_v50 = vrot.slane %v6787_v32, %v5309_v9  ;;  %v2968_v15 = vrot.slane %v7074_v2, %v5309_v9  ;;  %v7660_v53 = vrot.slane %v6719_v27, %v5309_v9 }
 0x1ac   : > { %v2981_v3 = vsel %vm1369_vm3, %v7658_v45, %v2980_v36  ;;  %v2972_v40 = vrot.slane %v7100_v5, %v5309_v9  ;;  %v3848_v29 = vadd.f32 %v6934_v13, %v3832_v41  ;;  %v3849_v19 = vadd.f32 %v6889_v21, %v3833_v46 }
 0x1ad   : > { %v2979_v28 = vsel %vm1379_vm8, %v7659_v50, %v2978_v4  ;;  %v2982_v61 = vsel %vm1371_vm4, %v7660_v53, %v2981_v3  ;;  %v3196_v32 = vrot.slane %v6964_v52, %v7641_v44  ;;  %v3818_v63 = vadd.f32 %v3814_v23, %v3802_v22  ;;  %v3838_v57 = vld [vmem:[#allocation3 + $0x48] sm:$0xf] }
 0x1ae   : > { %v2983_v35 = vsel %vm1373_vm5, %v2960_v47, %v2982_v61  ;;  %v3822_v24 = vld [vmem:[#allocation3 + $0x20] sm:$0xf]  ;;  %v3863_v43 = vadd.f32 %v6876_v60, %v6883_v37  ;;  %v3192_v48 = vrot.slane %v6953_v8, %v7641_v44  ;;  %v3864_v0 = vadd.f32 %v3860_v62, %v3848_v29 }
 0x1af   : > { %v2984_v18 = vsel %vm1375_vm6, %v2964_v59, %v2983_v35  ;;  %v3830_v13 = vmul.f32 %v6836_v6, %v3822_v24  ;;  %v3208_v21 = vrot.slane %v6984_v56, %v7641_v44  ;;  %v3212_v52 = vrot.slane %v6993_v33, %v7641_v44  ;;  %v3854_v54 = vld [vmem:[#allocation3 + $0x21] sm:$0xf]  ;;  %v4925_v35 = vld [vmem:[%s7663_s6 + $0x10] sm:$0xff]  }
 0x1b0   : > { %v3846_v51 = vmul.f32 %v6847_v38, %v3838_v57  ;;  %v2985_v39 = vsel %vm1377_vm7, %v2968_v15, %v2984_v18  ;;  %v3216_v60 = vrot.slane %v7074_v2, %v7641_v44  ;;  %v3228_v37 = vsel %vm1367_vm2, %v3196_v32, %v3192_v48  ;;  %v4926_v32 = vld [vmem:[%s7663_s6 + $0x18] sm:$0xff]  }
 0x1b1   : > { %v3834_v8 = vadd.f32 %v3830_v13, %v3818_v63  ;;  %v3865_v6 = vadd.f32 %v6892_v25, %v3849_v19  ;;  %v2986_v62 = vsel %vm1379_vm8, %v2972_v40, %v2985_v39  ;;  %v7661_v56 = vrot.slane %v6706_v34, %v7641_v44  ;;  %v4923_v19 = vld [vmem:[%s7663_s6] sm:$0xff]   ;;  %v4108_v13 = vld [vmem:[#allocation4 + $0xc] sm:$0x3] }
 0x1b2   : > { %v3220_v38 = vrot.slane %v7100_v5, %v7641_v44  ;;  %v7662_v42 = vrot.slane %v6719_v27, %v7641_v44  ;;  %v3862_v26 = vmul.f32 %v6861_v20, %v3854_v54  ;;  %v3868_v7 = vmax.f32 %v3864_v0, 0.0  ;;  %v7271_v63 = vld [vmem:[%s7664_s5] sm:$0xff] }
 0x1b3   : > { %v3229_v33 = vsel %vm1369_vm3, %v7661_v56, %v3228_v37  ;;  %v3850_v17 = vadd.f32 %v3846_v51, %v3834_v8  ;;  %v3867_v34 = vmax.f32 %v3863_v43, 0.0  ;;  %v3869_v55 = vmax.f32 %v3865_v6, 0.0  ;;  %v4098_v51 = vld [vmem:[#allocation4] sm:$0x3] }
 0x1b4   : > { %v3230_v2 = vsel %vm1371_vm4, %v7662_v42, %v3229_v33  ;;  %v3872_v23 = vmin.f32 %v3868_v7, 6.0  ;;  %v7275_v48 = vrot.slane %v7271_v63, %v5309_v9  ;;  %v7279_v0 = vrot.slane %v7271_v63, %v5312_v10  ;;  %v4118_v39 = vld [vmem:[#allocation4 + $0x1] sm:$0x3] }
 0x1b5   : > { %v3231_v25 = vsel %vm1373_vm5, %v3208_v21, %v3230_v2  ;;  %v3866_v49 = vadd.f32 %v3862_v26, %v3850_v17  ;;  %v3871_v11 = vmin.f32 %v3867_v34, 6.0  ;;  %v3873_v59 = vmin.f32 %v3869_v55, 6.0 }
 0x1b6   : > { %v3232_v22 = vsel %vm1375_vm6, %v3212_v52, %v3231_v25  ;;  %v7283_v54 = vrot.slane %v7271_v63, %v7639_v1  ;;  %v4104_v6 = vmul.f32 %v7275_v48, %v4098_v51  ;;  %vm4079_vm12 = vcmask 518145  }
 0x1b7   : > { %v3233_v47 = vsel %vm1377_vm7, %v3216_v60, %v3232_v22  ;;  %v3870_v27 = vmax.f32 %v3866_v49, 0.0  ;;  %v3879_v20 = vcombine.low %v3871_v11, %v3872_v23 }
 0x1b8   : > { %v7230_v5 = vsel %vm1379_vm8, %v3220_v38, %v3233_v47  ;;  %v4124_v38 = vmul.f32 %v7283_v54, %v4118_v39 }
 0x1b9   : > { %v3874_v36 = vmin.f32 %v3870_v27, 6.0 }
 0x1bb   : > { %v3880_v41 = vcombine.low %v3873_v59, %v3874_v36 }
 0x1bd   : > { %v3883_v46 = vpack.c.bf16 %v3880_v41, %v3879_v20 }
 0x1bf   : > { %4789 = vmatmul.mubr.msk.bf16.vlgmr.msra.gmra.mrb[0].mxu1 %vm3241_vm15, %v3883_v46 }
 0x1c0   : > { %4800 = vmatprep.mubr.msk.bf16.mxu1 %vm5113_vm14, %v7640_v14  ;;  %4793 = vmatpush3.bf16.msra.mxu1 %v4923_v19 }
 0x1c1   : > { %4794 = vmatprep.subr.bf16.mxu1 %v7640_v14 }
 0x1fd   : > { %v3068_v30 = vpop.permute.xlu0 %3067 }
 0x1fe   : > { %v3242_v53 = vsel %vm3241_vm15, %v2979_v28, %v3068_v30  ;;  %v4924_v28 = vld [vmem:[%s7663_s6 + $0x8] sm:$0xff]  }
 0x1ff   : > { %4795 = vmatpush3.bf16.msra.mxu1 %v4924_v28  ;;  %v4927_v30 = vld [vmem:[%s7580_s8 + $0x4] ss:$8 sps:$4 sm:$0xff]  }
 0x200   : > { %4796 = vmatprep.subr.bf16.mxu1 %v7640_v14  ;;  %4432 = vmatprep.subr.bf16.mxu0 %v4927_v30 }
 0x203   : > { %4797 = vmatpush3.bf16.msra.mxu1 %v4925_v35 }
 0x204   : > { %4798 = vmatprep.subr.bf16.mxu1 %v7640_v14 }
 0x207   : > { %4799 = vmatpush3.bf16.msra.mxu1 %v4926_v32 }
 0x208   : > { %v3152_v50 = vpop.permute.xlu0 %3151 }
 0x209   : > { %v3245_v61 = vsel %vm3244_vm0, %v3242_v53, %v3152_v50 }
 0x213   : > { %v3070_v4 = vpop.permute.xlu1 %3069 }
 0x214   : > { %v3243_v45 = vsel %vm3241_vm15, %v2986_v62, %v3070_v4  ;;  %v4114_v62 = vmul.f32 %v7279_v0, %v4108_v13 }
 0x216   : > { %v4116_v47 = vadd.f32 %v4114_v62, %v4104_v6 }
 0x217   : > { %v3154_v3 = vpop.permute.xlu1 %3153 }
 0x218   : > { %v7239_v15 = vsel %vm3244_vm0, %v3243_v45, %v3154_v3 }
 0x21b   : > { %v3236_v40 = vpop.permute.xlu1 %3235 }
 0x21c   : > { %v3248_v29 = vsel %vm3247_vm1, %v3245_v61, %v3236_v40 }
 0x21d   : > { %3250 = vst [vmem:[%s7243_s17] sm:$0xff] %v3248_v29 }
 0x292   : > { %v3937_v24 = vpop.f32.mrb[0].mxu1 }
 0x293   : > { %v3944_v57 = vmax.f32 %v3937_v24, 0.0  ;;  %v4790_v43 = vpop.f32.mrb[1].mxu1 }
 0x294   : > { %v3940_v18 = vpop.f32.mrb[2].mxu1 }
 0x295   : > { %v3946_v14 = vmin.f32 %v3944_v57, 6.0  ;;  %v3945_v21 = vmax.f32 %v3940_v18, 0.0  ;;  %v4791_v52 = vpop.f32.mrb[3].mxu1 }
 0x297   : > { %v3950_v60 = vcombine.high %v3946_v14, %v3946_v14  ;;  %v3957_v37 = vrot.slane %v3946_v14, %v5324_v16  ;;  %v3947_v8 = vmin.f32 %v3945_v21, 6.0  ;;  %v4133_v14 = vrot.slane %v7271_v63, %v7641_v44 }
 0x298   : > { %v4143_v44 = vrot.slane %v7271_v63, %v7644_v31 }
 0x299   : > { %v3964_v56 = vrot.slane %v3950_v60, %v5324_v16  ;;  %v3965_v33 = vcombine.high %v3957_v37, %v3957_v37  ;;  %v3987_v42 = vrot.slane %v3957_v37, %v5309_v9  ;;  %v4027_v1 = vrot.slane %v3957_v37, %v5312_v10 }
 0x29a   : > { %v3967_v2 = vcombine.high %v3947_v8, %v3947_v8  ;;  %v3974_v17 = vrot.slane %v3947_v8, %v5324_v16 }
 0x29b   : > { %v3966_v26 = vcombine.high %v3964_v56, %v3964_v56  ;;  %v3991_v7 = vrot.slane %v3965_v33, %v5309_v9  ;;  %v3995_v25 = vrot.slane %v3964_v56, %v5309_v9  ;;  %v4031_v22 = vrot.slane %v3965_v33, %v5312_v10 }
 0x29c   : > { %v4035_v49 = vrot.slane %v3964_v56, %v5312_v10  ;;  %v3981_v34 = vrot.slane %v3967_v2, %v5324_v16  ;;  %v3982_v55 = vcombine.high %v3974_v17, %v3974_v17  ;;  %v4003_v41 = vrot.slane %v3974_v17, %v5309_v9 }
 0x29d   : > { %v3999_v27 = vrot.slane %v3966_v26, %v5309_v9  ;;  %v4016_v23 = vsel %vm1367_vm2, %v3991_v7, %v3987_v42  ;;  %v4039_v11 = vrot.slane %v3966_v26, %v5312_v10  ;;  %v4056_v59 = vsel %vm1367_vm2, %v4031_v22, %v4027_v1 }
 0x29e   : > { %v4017_v36 = vsel %vm1369_vm3, %v3995_v25, %v4016_v23  ;;  %4073 = vst.msk [vmem:[#allocation4 + $0x24] sm:$0x3] %vm4072_vm11, %v4016_v23  ;;  %v4075_v20 = vsel %vm1369_vm3, %v4031_v22, %v4027_v1  ;;  %v4007_v46 = vrot.slane %v3982_v55, %v5309_v9  ;;  %v4043_v3 = vrot.slane %v3974_v17, %v5312_v10 }
 0x29f   : > { %4080 = vst.msk [vmem:[#allocation4 + $0x18] sm:$0x6] %vm4079_vm12, %v4075_v20  ;;  %v4082_v4 = vsel %vm1367_vm2, %v3999_v27, %v3995_v25  ;;  %v4089_v45 = vsel %vm1369_vm3, %v4039_v11, %v4035_v49  ;;  %v4047_v50 = vrot.slane %v3982_v55, %v5312_v10  ;;  %v4011_v53 = vrot.slane %v3981_v34, %v5309_v9 }
 0x2a0   : > { %4087 = vst.msk [vmem:[#allocation4 + $0x10] sm:$0x3] %vm4072_vm11, %v4082_v4  ;;  %v4068_v61 = vsel %vm1367_vm2, %v4007_v46, %v4003_v41  ;;  %v3983_v40 = vcombine.high %v3981_v34, %v3981_v34  ;;  %v4057_v29 = vsel %vm1369_vm3, %v4035_v49, %v4056_v59  ;;  %v4051_v28 = vrot.slane %v3981_v34, %v5312_v10 }
 0x2a1   : > { %4094 = vst.msk [vmem:[#allocation4 + $0x4] sm:$0x6] %vm4079_vm12, %v4089_v45  ;;  %v4076_v19 = vsel %vm1369_vm3, %v4047_v50, %v4043_v3  ;;  %v4058_v35 = vsel %vm1371_vm4, %v4039_v11, %v4057_v29  ;;  %v4018_v32 = vsel %vm1371_vm4, %v3999_v27, %v4017_v36  ;;  %v4153_v1 = vrot.slane %v7271_v63, %v7645_v58 }
 0x2a2   : > { %4074 = vst.msk [vmem:[#allocation4 + $0x28] sm:$0x3] %vm4072_vm11, %v4068_v61  ;;  %v4055_v24 = vrot.slane %v3983_v40, %v5312_v10  ;;  %v4059_v57 = vsel %vm1373_vm5, %v4043_v3, %v4058_v35  ;;  %v4015_v43 = vrot.slane %v3983_v40, %v5309_v9  ;;  %v4019_v18 = vsel %vm1373_vm5, %v4003_v41, %v4018_v32 }
 0x2a3   : > { %4081 = vst.msk [vmem:[#allocation4 + $0x1c] sm:$0x6] %vm4079_vm12, %v4076_v19  ;;  %v4060_v13 = vsel %vm1375_vm6, %v4047_v50, %v4059_v57  ;;  %v4020_v21 = vsel %vm1375_vm6, %v4007_v46, %v4019_v18  ;;  %v4126_v9 = vadd.f32 %v4124_v38, %v4116_v47  ;;  %v4163_v25 = vrot.slane %v7271_v63, %v7646_v12 }
 0x2a4   : > { %v4061_v52 = vsel %vm1377_vm7, %v4051_v28, %v4060_v13  ;;  %v4090_v51 = vsel %vm1369_vm3, %v4055_v24, %v4051_v28  ;;  %v4083_v39 = vsel %vm1367_vm2, %v4015_v43, %v4011_v53  ;;  %v4021_v10 = vsel %vm1377_vm7, %v4011_v53, %v4020_v21 }
 0x2a5   : > { %v4062_v60 = vsel %vm1379_vm8, %v4055_v24, %v4061_v52  ;;  %4095 = vst.msk [vmem:[#allocation4 + $0x8] sm:$0x6] %vm4079_vm12, %v4090_v51  ;;  %v4022_v37 = vsel %vm1379_vm8, %v4015_v43, %v4021_v10  ;;  %v4138_v6 = vld [vmem:[#allocation4 + $0x24] sm:$0x3] }
 0x2a6   : > { %4088 = vst.msk [vmem:[#allocation4 + $0x14] sm:$0x3] %vm4072_vm11, %v4083_v39  ;;  %4063 = vrot.lane.b32.xlu0 %v4062_v60, %s5115_s28  ;;  %v4128_v8 = vld [vmem:[#allocation4 + $0x18] sm:$0x3]  ;;  %v4144_v7 = vmul.f32 %v4143_v44, %v4138_v6  ;;  %s7665_s28 = smov 96  }
 0x2a7   : > { %v4109_v56 = vld [vmem:[#allocation4 + $0x10] sm:$0x3]  ;;  %v4134_v42 = vmul.f32 %v4133_v14, %v4128_v8  ;;  %v4148_v17 = vld [vmem:[#allocation4 + $0x19] sm:$0x3]  ;;  %v4933_v8 = vld [vmem:[%s7580_s8 + $0x24] ss:$8 sps:$4 sm:$0xff]  }
 0x2a8   : > { %v4099_v62 = vld [vmem:[#allocation4 + $0x4] sm:$0x3]  ;;  %v4115_v38 = vmul.f32 %v7279_v0, %v4109_v56  ;;  %v4154_v47 = vmul.f32 %v4153_v1, %v4148_v17  ;;  %v4168_v11 = vld [vmem:[#allocation4 + $0x10] sm:$0x3]  ;;  %v4935_v6 = vld [vmem:[%s7580_s8 + $0x20] ss:$8 sps:$4 sm:$0xff]  }
 0x2a9   : > { %v4119_v33 = vld [vmem:[#allocation4 + $0x5] sm:$0x3]  ;;  %v4105_v2 = vmul.f32 %v7275_v48, %v4099_v62  ;;  %v4136_v31 = vadd.f32 %v4134_v42, %v4126_v9  ;;  %v4139_v55 = vld [vmem:[#allocation4 + $0x28] sm:$0x3]  ;;  %v7666_v48 = vld [vmem:[#allocation22_spill] sm:$0xff] }
 0x2aa   : > { %v4129_v26 = vld [vmem:[#allocation4 + $0x1c] sm:$0x3]  ;;  %3237 = vrot.lane.b32.xlu0 %v7230_v5, %s7665_s28  ;;  %v4125_v49 = vmul.f32 %v7283_v54, %v4119_v33  ;;  %v4158_v34 = vld [vmem:[#allocation4 + $0x4] sm:$0x3]  ;;  %v4173_v0 = vrot.slane %v7271_v63, %v7666_v48  ;;  %v4145_v41 = vmul.f32 %v4143_v44, %v4139_v55  ;;  %v4739_v5 = vld [vmem:[%s7664_s5 + $0x8] ss:$0 sm:$0xff] }
 0x2ab   : > { %v4117_v22 = vadd.f32 %v4115_v38, %v4105_v2  ;;  %v4146_v58 = vadd.f32 %v4144_v7, %v4136_v31  ;;  %v4135_v23 = vmul.f32 %v4133_v14, %v4129_v26  ;;  %v4149_v59 = vld [vmem:[#allocation4 + $0x1d] sm:$0x3]  ;;  %v4164_v20 = vmul.f32 %v4163_v25, %v4158_v34  ;;  %v4178_v4 = vld [vmem:[#allocation4 + $0x5] sm:$0x3]  ;;  %v4929_v9 = vld [vmem:[%s7580_s8] ss:$8 sps:$4 sm:$0xff]  }
 0x2ac   : > { %v4159_v54 = vld [vmem:[#allocation4 + $0x8] sm:$0x3]  ;;  %v4174_v30 = vmul.f32 %v4173_v0, %v4168_v11  ;;  %v4155_v3 = vmul.f32 %v4153_v1, %v4149_v59  ;;  %v4184_v40 = vmul.f32 %v4739_v5, %v4178_v4  ;;  %4433 = vmatpush1.bf16.msra.mxu0 %v4929_v9  ;;  %v4938_v62 = vld [vmem:[%s7580_s8 + $0x30] ss:$8 sps:$4 sm:$0xff]   ;;  %v4939_v56 = vld [vmem:[%s7580_s8 + $0x44] ss:$8 sps:$4 sm:$0xff]  }
 0x2ad   : > { %v4127_v27 = vadd.f32 %v4125_v49, %v4117_v22  ;;  %v4156_v36 = vadd.f32 %v4154_v47, %v4146_v58  ;;  %v4169_v50 = vld [vmem:[#allocation4 + $0x14] sm:$0x3]  ;;  %v4165_v61 = vmul.f32 %v4163_v25, %v4159_v54  ;;  %v4179_v29 = vld [vmem:[#allocation4 + $0x9] sm:$0x3]  ;;  %v4944_v1 = vld [vmem:[%s7580_s8 + $0x50] ss:$8 sps:$4 sm:$0xff]  }
 0x2ae   : > { %v4175_v28 = vmul.f32 %v4173_v0, %v4169_v50  ;;  %v4185_v24 = vmul.f32 %v4739_v5, %v4179_v29  ;;  %v4941_v33 = vld [vmem:[%s7580_s8 + $0x40] ss:$8 sps:$4 sm:$0xff]   ;;  %v4942_v42 = vld [vmem:[%s7580_s8 + $0x54] ss:$8 sps:$4 sm:$0xff]   ;;  %v4945_v2 = vld [vmem:[%s7580_s8 + $0x64] ss:$8 sps:$4 sm:$0xff]  }
 0x2af   : > { %v4137_v12 = vadd.f32 %v4135_v23, %v4127_v27  ;;  %v4166_v46 = vadd.f32 %v4164_v20, %v4156_v36  ;;  %v4947_v38 = vld [vmem:[%s7580_s8 + $0x60] ss:$8 sps:$4 sm:$0xff]   ;;  %v4948_v17 = vld [vmem:[%s7580_s8 + $0x74] ss:$8 sps:$4 sm:$0xff]   ;;  %v4950_v26 = vld [vmem:[%s7580_s8 + $0x70] ss:$8 sps:$4 sm:$0xff]  }
 0x2b0   : > { %v4289_v31 = vld [vmem:[%s7667_s7] sm:$0xff]  ;;  %v4291_v25 = vld [vmem:[#allocation5] sm:$0x1]  ;;  %v4294_v22 = vld [vmem:[#allocation5 + $0x4] sm:$0x1] }
 0x2b1   : > { %v4147_v45 = vadd.f32 %v4145_v41, %v4137_v12  ;;  %v4176_v63 = vadd.f32 %v4174_v30, %v4166_v46  ;;  %v4296_v7 = vrot.slane %v4289_v31, 1  ;;  %v4292_v49 = vmul.f32 %v4291_v25, %v4289_v31  ;;  %v4300_v47 = vld [vmem:[#allocation5 + $0x1] sm:$0x1]  ;;  %v4305_v12 = vld [vmem:[#allocation5 + $0x8] sm:$0x1] }
 0x2b2   : > { %v4301_v55 = vrot.slane %v4289_v31, 2  ;;  %v4306_v20 = vrot.slane %v4289_v31, 3  ;;  %v4311_v54 = vrot.slane %v4289_v31, 4  ;;  %v4316_v30 = vrot.slane %v4289_v31, 5  ;;  %v4320_v50 = vld [vmem:[#allocation5 + $0x2] sm:$0x1] }
 0x2b3   : > { %v4157_v53 = vadd.f32 %v4155_v3, %v4147_v45  ;;  %v4186_v35 = vadd.f32 %v4184_v40, %v4176_v63  ;;  %v4298_v34 = vmul.f32 %v4296_v7, %v4294_v22  ;;  %v4321_v4 = vrot.slane %v4289_v31, 6 }
 0x2b4   : > { %v4303_v36 = vmul.f32 %v4301_v55, %v4300_v47  ;;  %v4308_v5 = vmul.f32 %v4306_v20, %v4305_v12  ;;  %v4326_v29 = vrot.slane %v4289_v31, 7 }
 0x2b5   : > { %v4167_v19 = vadd.f32 %v4165_v61, %v4157_v53  ;;  %v4188_v43 = vmax.f32 %v4186_v35, 0.0  ;;  %v4299_v59 = vadd.f32 %v4298_v34, %v4292_v49  ;;  %v4323_v40 = vmul.f32 %v4321_v4, %v4320_v50  ;;  %v4290_v35 = vld [vmem:[%s7667_s7 + $0x8] sm:$0x1] }
 0x2b7   : > { %v4177_v32 = vadd.f32 %v4175_v28, %v4167_v19  ;;  %v4190_v13 = vmin.f32 %v4188_v43, 6.0  ;;  %v4304_v41 = vadd.f32 %v4303_v36, %v4299_v59 }
 0x2b9   : > { %v4187_v57 = vadd.f32 %v4185_v24, %v4177_v32  ;;  %v4309_v46 = vadd.f32 %v4308_v5, %v4304_v41 }
 0x2bb   : > { %v4189_v18 = vmax.f32 %v4187_v57, 0.0 }
 0x2bd   : > { %v4191_v14 = vmin.f32 %v4189_v18, 6.0 }
 0x2bf   : > { %v4194_v21 = vcombine.low %v4190_v13, %v4191_v14 }
 0x2c1   : > { %v4201_v52 = vrot.slane %v4194_v21, %v5324_v16  ;;  %v4930_v16 = vld [vmem:[%s7580_s8 + $0x14] ss:$8 sps:$4 sm:$0xff]  }
 0x2c2   : > { %4434 = vmatprep.subr.bf16.mxu0 %v4930_v16 }
 0x2c3   : > { %v4203_v51 = vpack.c.bf16 %v4201_v52, %v4201_v52 }
 0x2c5   : > { %4801 = vmatmul.mubr.msk.bf16.vlgmr.msra.gmra.mrb[4].mxu1 %vm3244_vm0, %v4203_v51 }
 0x318   : > { %v4064_v39 = vpop.permute.xlu0 %4063 }
 0x319   : > { %v4066_v10 = vsel %vm3244_vm0, %v4022_v37, %v4064_v39  ;;  %v4932_v37 = vld [vmem:[%s7580_s8 + $0x10] ss:$8 sps:$4 sm:$0xff]  }
 0x31a   : > { %4067 = vst [vmem:[%s7363_s16] sm:$0xff] %v4066_v10  ;;  %4435 = vmatpush1.bf16.msra.mxu0 %v4932_v37 }
 0x31b   : > { %4436 = vmatprep.subr.bf16.mxu0 %v4933_v8 }
 0x31c   : > { %v3238_v60 = vpop.permute.xlu0 %3237 }
 0x31d   : > { %v3249_v44 = vsel %vm3247_vm1, %v7239_v15, %v3238_v60  ;;  %v4936_v15 = vld [vmem:[%s7580_s8 + $0x34] ss:$8 sps:$4 sm:$0xff]  }
 0x31e   : > { %3251 = vst [vmem:[%s7243_s17 + $0x8] sm:$0xff] %v3249_v44  ;;  %4437 = vmatpush1.bf16.msra.mxu0 %v4935_v6  ;;  %s5117_s17 = smov [#allocation8]  }
 0x31f   : > { %4438 = vmatprep.subr.bf16.mxu0 %v4936_v15  ;;  %s4956_s5 = sshll.u32 %s5117_s17, 4  ;;  %s4957_s5 = int_to_ptr.vmem [resolvable:$false] %s4956_s5 }
 0x320   : > { %s4958_s29 = scalar_lea.vmem %s4957_s5, 256  ;;  %p4959_p0 = scmp.lt.s32.totalorder %s7435_s2, %s4957_s5 }
 0x321   : > { %p4960_p1 = scmp.lt.s32.totalorder %s4958_s29, %s4952_s4 }
 0x322   : > { %4439 = vmatpush1.bf16.msra.mxu0 %v4938_v62 }
 0x323   : > { %4440 = vmatprep.subr.bf16.mxu0 %v4939_v56  ;;  %p4961_p2 = por %p4960_p1, %p4959_p0 }
 0x325   : > { %p4962_p3 = pnand %p4961_p2, %p4955_p13 }
 0x326   : > { %4441 = vmatpush1.bf16.msra.mxu0 %v4941_v33 }
 0x327   : > { %4442 = vmatprep.subr.bf16.mxu0 %v4942_v42 }
 0x32a   : > { %4443 = vmatpush1.bf16.msra.mxu0 %v4944_v1 }
 0x32b   : > { %4444 = vmatprep.subr.bf16.mxu0 %v4945_v2 }
 0x32e   : > { %4445 = vmatpush1.bf16.msra.mxu0 %v4947_v38 }
 0x32f   : > { %4446 = vmatprep.subr.bf16.mxu0 %v4948_v17 }
 0x332   : > { %4447 = vmatpush1.bf16.msra.mxu0 %v4950_v26 }
 0x398   : > { %v4273_v58 = vpop.f32.mrb[4].mxu1 }
 0x399   : > { %v4279_v48 = vmax.f32 %v4273_v58, 0.0  ;;  %v4802_v0 = vpop.f32.mrb[5].mxu1 }
 0x39a   : > { %v4276_v27 = vpop.f32.mrb[6].mxu1 }
 0x39b   : > { %v4280_v23 = vmin.f32 %v4279_v48, 6.0  ;;  %v4803_v11 = vpop.f32.mrb[7].mxu1 }
 0x39d   : > { %4283 = vst [vmem:[#allocation5 + $0xc] sm:$0x1] %v4280_v23  ;;  %4284 = vst [vmem:[#allocation5 + $0x8] sm:$0x2] %v4280_v23 }
 0x39e   : > { %4286 = vst [vmem:[#allocation5 + $0x4] sm:$0x4] %v4280_v23  ;;  %4288 = vst [vmem:[#allocation5] sm:$0x8] %v4280_v23 }
 0x39f   : > { %4281 = vst [vmem:[%s7418_s3] sm:$0xf] %v4280_v23 }
 0x3a4   : > { %v4310_v45 = vld [vmem:[#allocation5 + $0xc] sm:$0x1]  ;;  %v4315_v3 = vld [vmem:[#allocation5 + $0x9] sm:$0x1] }
 0x3a5   : > { %v4313_v63 = vmul.f32 %v4311_v54, %v4310_v45  ;;  %v4318_v61 = vmul.f32 %v4316_v30, %v4315_v3  ;;  %v4325_v19 = vld [vmem:[#allocation5 + $0x6] sm:$0x1]  ;;  %v4330_v32 = vld [vmem:[#allocation5 + $0x3] sm:$0x1] }
 0x3a6   : > { %v4328_v57 = vmul.f32 %v4326_v29, %v4325_v19  ;;  %v4331_v18 = vmul.f32 %v4330_v32, %v4290_v35 }
 0x3a7   : > { %v4314_v53 = vadd.f32 %v4313_v63, %v4309_v46 }
 0x3a9   : > { %v4319_v28 = vadd.f32 %v4318_v61, %v4314_v53 }
 0x3ab   : > { %v4324_v24 = vadd.f32 %v4323_v40, %v4319_v28 }
 0x3ad   : > { %v4329_v43 = vadd.f32 %v4328_v57, %v4324_v24 }
 0x3af   : > { %v4332_v13 = vadd.f32 %v4331_v18, %v4329_v43 }
 0x3b1   : > { %v4333_v14 = vmax.f32 %v4332_v13, 0.0 }
 0x3b3   : > { %v4334_v21 = vmin.f32 %v4333_v14, 6.0 }
 0x3b5   : > { %v4335_v52 = vpack.c.bf16 %v4334_v21, %v4334_v21 }
 0x3b7   : > { %4465 = vmatmul.mubr.bf16.vlgmr.msra.gmra.mrb[0].mxu0 %v4335_v52 }
 0x3b8   : > { %4965 = shalt.err (!%p4962_p3)
}
 0x3b9   : > { %s4966_s16 = scalar_lea.hbm %s7432_s18, 128  ;;  %s4970_s28 = scalar_lea.hbm %s7582_s10, 256 }
 0x3ba   : > { %p4967_p4 = scmp.ne.s32.totalorder %s7432_s18, %s4966_s16  ;;  %p4971_p9 = scmp.lt.u32.totalorder %s7432_s18, %s7582_s10 }
 0x3bb   : > { %p4972_p10 = scmp.lt.u32.totalorder %s4970_s28, %s4966_s16  ;;  %p4974_p12 = scmp.lt.u32.totalorder %s4966_s16, %s7432_s18 }
 0x3bc   : > { %p4968_p7 = pnand %p4967_p4, %p5229_p5 }
 0x3bd   : > { %p4973_p11 = por %p4972_p10, %p4971_p9 }
 0x3be   : > { %p4969_p8 = pneg %p4968_p7 }
 0x3bf   : > { %p4975_p13 = por %p4974_p12, %p4973_p11 }
 0x3c1   : > { %p4976_p0 = pnand %p4975_p13, %p4969_p8 }
 0x3c3   : > { %4979 = shalt.err (!%p4976_p0)
}
 0x3c4   : > { %4805 = dma.vmem_to_hbm [thread:$0]  (%p5229_p5), %s7435_s2, 128, %s7432_s18, %s7438_s19  }
 0x3c5   : > { %s7467_s16 = scalar_lea.hbm %s7581_s9, %s4774_s0  ;;  %s4768_s20 = sshll.u32 %s5210_s25, 6 }
 0x3c6   : > { %s4501_s26 = scalar_lea.sflag [#allocation7], %s7235_s15  ;;  %s4980_s28 = scalar_lea.vmem %s7425_s1, 256 }
 0x3c7   : > { %p4981_p1 = scmp.ne.s32.totalorder %s7425_s1, %s4980_s28  ;;  %s5118_s17 = smov [#allocation6]  }
 0x3c8   : > { %s4984_s5 = sshll.u32 %s5118_s17, 4  ;;  %s4985_s5 = int_to_ptr.vmem [resolvable:$false] %s4984_s5 }
 0x3c9   : > { %p4982_p2 = pnand %p4981_p1, %p5229_p5  ;;  %s4986_s6 = scalar_lea.vmem %s4985_s5, 512 }
 0x3ca   : > { %p4987_p4 = scmp.lt.s32.totalorder %s7425_s1, %s4985_s5  ;;  %p4988_p7 = scmp.lt.s32.totalorder %s4986_s6, %s4980_s28 }
 0x3cb   : > { %p4983_p3 = pneg %p4982_p2 }
 0x3cc   : > { %p4989_p8 = por %p4988_p7, %p4987_p4 }
 0x3ce   : > { %p4990_p9 = pnand %p4989_p8, %p4983_p3 }
 0x3d0   : > { %4993 = shalt.err (!%p4990_p9)
}
 0x3d1   : > { %s4994_s18 = scalar_lea.hbm %s7467_s16, 256  ;;  %s4998_s4 = scalar_lea.hbm %s7581_s9, 512 }
 0x3d2   : > { %p4995_p10 = scmp.ne.s32.totalorder %s7467_s16, %s4994_s18  ;;  %p4999_p13 = scmp.lt.u32.totalorder %s7467_s16, %s7581_s9 }
 0x3d3   : > { %p5000_p0 = scmp.lt.u32.totalorder %s4998_s4, %s4994_s18  ;;  %p5002_p2 = scmp.lt.u32.totalorder %s4994_s18, %s7467_s16 }
 0x3d4   : > { %p4996_p11 = pnand %p4995_p10, %p5229_p5 }
 0x3d5   : > { %p5001_p1 = por %p5000_p0, %p4999_p13 }
 0x3d6   : > { %p4997_p12 = pneg %p4996_p11 }
 0x3d7   : > { %p5003_p3 = por %p5002_p2, %p5001_p1 }
 0x3d9   : > { %p5004_p4 = pnand %p5003_p3, %p4997_p12 }
 0x3db   : > { %5007 = shalt.err (!%p5004_p4)
}
 0x3dc   : > { %s5119_s6 = smov 128   ;;  %s5120_s28 = smov 8  }
 0x3dd   : > { %4804 = dma.vmem_to_hbm [thread:$0]  (%p5229_p5), %s7425_s1, 256, %s7467_s16, %s4501_s26, %s5119_s6, %s5119_s6, %s5120_s28  }
 0x3de   : > { %s7499_s18 = scalar_lea.hbm %s7583_s11, %s4768_s20  ;;  %s4558_s0 = sshll.u32 %s7418_s3, 4  ;;  %s4559_s0 = int_to_ptr.vmem [resolvable:$true] %s4558_s0 }
 0x3df   : > { %s5008_s4 = scalar_lea.vmem %s4559_s0, 64  ;;  %s5121_s29 = smov [#allocation10]  }
 0x3e0   : > { %p5009_p7 = scmp.ne.s32.totalorder %s4559_s0, %s5008_s4  ;;  %s5012_s17 = sshll.u32 %s5121_s29, 4  ;;  %s5013_s17 = int_to_ptr.vmem [resolvable:$false] %s5012_s17 }
 0x3e1   : > { %s5014_s7 = scalar_lea.vmem %s5013_s17, 128  ;;  %p5015_p10 = scmp.lt.s32.totalorder %s4559_s0, %s5013_s17 }
 0x3e2   : > { %p5010_p8 = pnand %p5009_p7, %p5229_p5  ;;  %p5016_p11 = scmp.lt.s32.totalorder %s5014_s7, %s5008_s4 }
 0x3e4   : > { %p5011_p9 = pneg %p5010_p8  ;;  %p5017_p12 = por %p5016_p11, %p5015_p10 }
 0x3e6   : > { %p5018_p13 = pnand %p5017_p12, %p5011_p9 }
 0x3e8   : > { %5021 = shalt.err (!%p5018_p13)
}
 0x3e9   : > { %s5022_s3 = scalar_lea.hbm %s7499_s18, 64  ;;  %s5026_s20 = scalar_lea.hbm %s7583_s11, 128 }
 0x3ea   : > { %p5023_p0 = scmp.ne.s32.totalorder %s7499_s18, %s5022_s3  ;;  %p5027_p3 = scmp.lt.u32.totalorder %s7499_s18, %s7583_s11 }
 0x3eb   : > { %p5028_p4 = scmp.lt.u32.totalorder %s5026_s20, %s5022_s3  ;;  %p5030_p8 = scmp.lt.u32.totalorder %s5022_s3, %s7499_s18 }
 0x3ec   : > { %p5024_p1 = pnand %p5023_p0, %p5229_p5 }
 0x3ed   : > { %p5029_p7 = por %p5028_p4, %p5027_p3 }
 0x3ee   : > { %p5025_p2 = pneg %p5024_p1 }
 0x3ef   : > { %p5031_p9 = por %p5030_p8, %p5029_p7 }
 0x3f1   : > { %p5032_p10 = pnand %p5031_p9, %p5025_p2 }
 0x3f3   : > { %5035 = shalt.err (!%p5032_p10)
}
 0x3f4   : > { %4806 = dma.vmem_to_hbm [thread:$0]  (%p5229_p5), %s4559_s0, 64, %s7499_s18, %s7438_s19   ;;  %v5122_v51 = vmov 1966171168   ;;  %v7668_v62 = vld [vmem:[#allocation16_spill] sm:$0xff]  ;;  %v7669_v1 = vlaneseq }
 0x3f5   : > { %v4481_v39 = vunpack.c.l.s4 %v5122_v51  ;;  %s4731_s7 = sshll.u32 %s7235_s15, 1  ;;  %s4775_s28 = sshll.u32 %s5210_s25, 5 }
 0x3f6   : > { %s434_s5 = scalar_lea.vmem [#allocation11], %s4731_s7  ;;  %vm4497_vm2 = vcmp.lt.s32.totalorder %v7669_v1, 256  ;;  %s7527_s0 = scalar_lea.hbm %s7584_s12, %s4775_s28 }
 0x3f7   : > { %v4482_v60 = vunpack.c.0.s8 %v4481_v39  ;;  %s4572_s19 = sshll.u32 %s434_s5, 4  ;;  %s4516_s4 = scalar_lea.sflag [#allocation12], %s7235_s15  ;;  %s7529_s19 = int_to_ptr.vmem [resolvable:$true] %s4572_s19 }
 0x3f8   : > { %s5036_s29 = scalar_lea.vmem %s7529_s19, 32  ;;  %s5123_s25 = smov [#allocation11]  }
 0x3f9   : > { %v4485_v56 = vsub.s32 %v4482_v60, %v7668_v62  ;;  %p5037_p11 = scmp.ne.s32.totalorder %s7529_s19, %s5036_s29  ;;  %s5040_s17 = sshll.u32 %s5123_s25, 4  ;;  %s5041_s17 = int_to_ptr.vmem [resolvable:$false] %s5040_s17 }
 0x3fa   : > { %s5042_s3 = scalar_lea.vmem %s5041_s17, 64  ;;  %p5043_p0 = scmp.lt.s32.totalorder %s7529_s19, %s5041_s17 }
 0x3fb   : > { %p5038_p12 = pnand %p5037_p11, %p5229_p5  ;;  %p5044_p1 = scmp.lt.s32.totalorder %s5042_s3, %s5036_s29 }
 0x3fd   : > { %p5039_p13 = pneg %p5038_p12  ;;  %p5045_p2 = por %p5044_p1, %p5043_p0 }
 0x3ff   : > { %p5046_p3 = pnand %p5045_p2, %p5039_p13 }
 0x48a   : > { %v4466_v10 = vpop.f32.mrb[0].mxu0 }
 0x48b   : > { %v4473_v9 = vmax.f32 %v4466_v10, 0.0  ;;  %v4468_v16 = vpop.f32.mrb[1].mxu0 }
 0x48c   : > { %v4474_v44 = vmax.f32 %v4468_v16, 0.0  ;;  %v4470_v37 = vpop.f32.mrb[2].mxu0 }
 0x48d   : > { %v4475_v8 = vmin.f32 %v4473_v9, 6.0  ;;  %v4471_v6 = vpop.f32.mrb[3].mxu0 }
 0x48e   : > { %v4476_v15 = vmin.f32 %v4474_v44, 6.0 }
 0x490   : > { %v4479_v33 = vcombine.low %v4475_v8, %v4476_v15 }
 0x492   : > { %v4486_v42 = vrot.slane %v4479_v33, %v4485_v56 }
 0x494   : > { %v4493_v2 = vrot.slane %v4486_v42, %v4485_v56 }
 0x496   : > { %4499 = vst.msk [vmem:[%s434_s5] sm:$0x3] %vm4497_vm2, %v4493_v2 }
 0x497   : > { %5049 = shalt.err (!%p5046_p3)
}
 0x498   : > { %s5050_s15 = scalar_lea.hbm %s7527_s0, 32  ;;  %s5054_s20 = scalar_lea.hbm %s7584_s12, 64 }
 0x499   : > { %p5051_p4 = scmp.ne.s32.totalorder %s7527_s0, %s5050_s15  ;;  %p5055_p9 = scmp.lt.u32.totalorder %s7527_s0, %s7584_s12 }
 0x49a   : > { %p5056_p10 = scmp.lt.u32.totalorder %s5054_s20, %s5050_s15  ;;  %p5058_p12 = scmp.lt.u32.totalorder %s5050_s15, %s7527_s0 }
 0x49b   : > { %p5052_p7 = pnand %p5051_p4, %p5229_p5 }
 0x49c   : > { %p5057_p11 = por %p5056_p10, %p5055_p9 }
 0x49d   : > { %p5053_p8 = pneg %p5052_p7 }
 0x49e   : > { %p5059_p13 = por %p5058_p12, %p5057_p11 }
 0x4a0   : > { %p5060_p0 = pnand %p5059_p13, %p5053_p8 }
 0x4a2   : > { %5063 = shalt.err (!%p5060_p0)
}
 0x4a3   : > { %4807 = dma.vmem_to_hbm [thread:$0]  (%p5229_p5), %s7529_s19, 32, %s7527_s0, %s4516_s4  }
 0x4a4 PF: > { %p4825_p1 = scmp.ge.s32.totalorder %s5106_s24, 2  ;;  %s4584_s7 = sand.u32 1, %s5094_s21  }
 0x4a5   : > { %s4585_s28 = scalar_lea.sflag [#allocation7], %s4584_s7 }
 0x4a6   : > { %p4813_p2 = pnand %p4825_p1, %p5233_p6 }
 0x4a8   : > { %5081 = dma.done.wait (!%p4813_p2), %s4585_s28, 256  }
 0x4a9   : > { %5083 = vsyncadd (!%p4813_p2), %s4585_s28, 4294967040  ;;  %s7670_s5 = sadd.s32 4294967294, %s5106_s24  }
 0x4aa   : > { %s4593_s2 = sand.u32 1, %s7670_s5  }
 0x4ab   : > { %s4594_s18 = scalar_lea.sflag [#allocation9], %s4593_s2 }
 0x4ac   : > { %5085 = dma.done.wait (!%p4813_p2), %s4594_s18, 192  }
 0x4ad   : > { %5087 = vsyncadd (!%p4813_p2), %s4594_s18, 4294967104  ;;  %s4612_s13 = scalar_lea.sflag [#allocation12], %s4584_s7 }
 0x4ae   : > { %5089 = dma.done.wait (!%p4813_p2), %s4612_s13, 32  }
 0x4af   : > { %5091 = vsyncadd (!%p4813_p2), %s4612_s13, 4294967264  ;;  %p29_p5 = scmp.ge.s32.totalorder %s5214_s27, 4   ;;  %s7671_s21 = smov %s5098_s22 }
 0x4b0   : > { %s7672_s22 = smov %s5102_s23  ;;  %s7673_s23 = smov %s5227_s30 }
 0x4b1   : > { %s7674_s24 = smov %s5214_s27  ;;  %31 = sbr.rel (!%p29_p5) target bundleno = 16 (0x10), region = 160 }
 0x4b8   :  { %4617 = vsyncpa [#allocation7], 1 }
 0x4b9   :  { %4619 = vsyncpa [#allocation7 + $0x1], 1 }
 0x4ba   :  { %4620 = vsyncpa [#allocation9], 1 }
 0x4bb   :  { %4622 = vsyncpa [#allocation9 + $0x1], 1 }
 0x4bc   :  { %4623 = vsyncpa [#allocation12], 1 }
 0x4bd   :  { %4625 = vsyncpa [#allocation12 + $0x1], 1 }

</bundles_post_ra>
